<compile_context>
chip_gen: v5e
topology: v5e:2x2
jax: 0.10.0
libtpu: 0.0.40
codegen_flags: <defaults>
</compile_context>

<pallas_src>
import functools

import numpy as np
import jax
import jax.numpy as jnp
from jax import lax
from jax.experimental import pallas as pl
from jax.experimental.pallas import tpu as pltpu

LEAKY_SLOPE = 0.2
BN_EPS = 1e-5


def _round_up(x, m):
    return (x + m - 1) // m * m


def _row_tile(m):
    """Row (sublane) tile: fills the MXU M dim, multiple of 8, VMEM-safe."""
    return 512 if m >= 512 else _round_up(max(m, 8), 8)


def _pad_rows(x2d, m_pad):
    m = x2d.shape[0]
    if m_pad == m:
        return x2d
    return jnp.pad(x2d, ((0, m_pad - m), (0, 0)))


# ----------------------------- kernel bodies ------------------------------ #

def _matmul_bias_act_kernel(x_ref, w_ref, b_ref, o_ref, *, act):
    """(TM, K) @ (K, N) + bias, optional LeakyReLU(0.2). One MXU matmul/step."""
    acc = jnp.dot(x_ref[...], w_ref[...],
                  preferred_element_type=jnp.float32,
                  precision=lax.Precision.HIGHEST)
    acc = acc + b_ref[...]
    if act:
        acc = jnp.where(acc >= 0.0, acc, LEAKY_SLOPE * acc)
    o_ref[...] = acc.astype(o_ref.dtype)


def _bn_stats_kernel(x_ref, sum_ref, sq_ref):
    """Accumulate per-channel sum / sum-of-squares across the M-tile grid."""
    @pl.when(pl.program_id(0) == 0)
    def _():
        sum_ref[...] = jnp.zeros_like(sum_ref)
        sq_ref[...] = jnp.zeros_like(sq_ref)

    x = x_ref[...]
    sum_ref[...] += jnp.sum(x, axis=0, keepdims=True)
    sq_ref[...] += jnp.sum(x * x, axis=0, keepdims=True)


def _bn_apply_kernel(x_ref, sum_ref, sq_ref, g_ref, b_ref, o_ref, *, count):
    """Training-mode BatchNorm (biased variance) + affine + LeakyReLU(0.2)."""
    inv_n = 1.0 / count
    mean = sum_ref[...] * inv_n
    var = sq_ref[...] * inv_n - mean * mean
    scale = g_ref[...] * lax.rsqrt(var + BN_EPS)
    shift = b_ref[...] - mean * scale
    y = x_ref[...] * scale + shift
    o_ref[...] = jnp.where(y >= 0.0, y, LEAKY_SLOPE * y)


_BLUR_TAPS = tuple(float(v) / 16.0
                   for v in (1., 2., 1., 2., 4., 2., 1., 2., 1.))


def _blur_kernel(x_ref, o_ref):
    """Depthwise 3x3 [1,2,1]⊗[1,2,1]/16 blur as a 9-tap weighted sum (VPU)."""
    acc = _BLUR_TAPS[0] * x_ref[0, 0]
    for t in range(1, 9):
        acc = acc + _BLUR_TAPS[t] * x_ref[0, t]
    o_ref[0] = acc.astype(o_ref.dtype)


# --------------------------- pallas_call wrappers -------------------------- #

def _parallel(n):
    return pltpu.CompilerParams(dimension_semantics=("parallel",) * n)


def conv4x4(x_nhwc, w, b, *, act, stride=1, pad=1):
    """4x4 conv (stride/pad as given) + optional bias + optional LeakyReLU.

    Lowered to an im2col matmul: all (B, Ho, Wo) output positions are folded
    into one M dimension so the MXU sees (TM, 16*Cin) x (16*Cin, Cout) tiles.
    The 16-tap patch extraction is pure XLA slicing in the wrapper.
    """
    B, H, W, Cin = x_nhwc.shape
    kw = w.shape[0]
    Cout = w.shape[-1]
    Ho = (H + 2 * pad - kw) // stride + 1
    Wo = (W + 2 * pad - kw) // stride + 1

    xp = jnp.pad(x_nhwc, ((0, 0), (pad, pad), (pad, pad), (0, 0)))
    taps = []
    for ki in range(kw):
        for kj in range(kw):
            taps.append(xp[:, ki:ki + stride * (Ho - 1) + 1:stride,
                           kj:kj + stride * (Wo - 1) + 1:stride, :])
    cols = jnp.concatenate(taps, axis=-1).reshape(B * Ho * Wo, kw * kw * Cin)

    M, K = cols.shape
    tm = _row_tile(M)
    m_pad = _round_up(M, tm)
    cols = _pad_rows(cols, m_pad)

    w2 = w.reshape(K, Cout)
    bias = (b if b is not None else jnp.zeros((Cout,), jnp.float32)).reshape(1, Cout)

    out = pl.pallas_call(
        functools.partial(_matmul_bias_act_kernel, act=act),
        out_shape=jax.ShapeDtypeStruct((m_pad, Cout), jnp.float32),
        grid=(m_pad // tm,),
        in_specs=[pl.BlockSpec((tm, K), lambda i: (i, 0)),
                  pl.BlockSpec((K, Cout), lambda i: (0, 0)),
                  pl.BlockSpec((1, Cout), lambda i: (0, 0))],
        out_specs=pl.BlockSpec((tm, Cout), lambda i: (i, 0)),
        compiler_params=_parallel(1),
    )(cols, w2, bias)
    return out[:M].reshape(B, Ho, Wo, Cout)


def batchnorm_leaky(x_nhwc, gamma, beta):
    """Training-mode BatchNorm2d over (B, H, W) per channel + LeakyReLU(0.2)."""
    B, H, W, C = x_nhwc.shape
    M = B * H * W
    x2 = x_nhwc.reshape(M, C)
    tm = _row_tile(M)
    m_pad = _round_up(M, tm)
    x2p = _pad_rows(x2, m_pad)          # zero pad rows: add 0 to sum / sumsq
    n_tiles = m_pad // tm

    ssum, ssq = pl.pallas_call(
        _bn_stats_kernel,
        out_shape=(jax.ShapeDtypeStruct((1, C), jnp.float32),
                   jax.ShapeDtypeStruct((1, C), jnp.float32)),
        grid=(n_tiles,),
        in_specs=[pl.BlockSpec((tm, C), lambda i: (i, 0))],
        out_specs=(pl.BlockSpec((1, C), lambda i: (0, 0)),
                   pl.BlockSpec((1, C), lambda i: (0, 0))),
        compiler_params=pltpu.CompilerParams(
            dimension_semantics=("arbitrary",)),   # resident (1, C) accumulators
    )(x2p)

    out = pl.pallas_call(
        functools.partial(_bn_apply_kernel, count=float(M)),
        out_shape=jax.ShapeDtypeStruct((m_pad, C), jnp.float32),
        grid=(n_tiles,),
        in_specs=[pl.BlockSpec((tm, C), lambda i: (i, 0)),
                  pl.BlockSpec((1, C), lambda i: (0, 0)),
                  pl.BlockSpec((1, C), lambda i: (0, 0)),
                  pl.BlockSpec((1, C), lambda i: (0, 0)),
                  pl.BlockSpec((1, C), lambda i: (0, 0))],
        out_specs=pl.BlockSpec((tm, C), lambda i: (i, 0)),
        compiler_params=_parallel(1),
    )(x2p, ssum, ssq, gamma.reshape(1, C), beta.reshape(1, C))
    return out[:M].reshape(B, H, W, C)


def blur_downsample(x_nhwc):
    """Anti-alias Downsample: reflect pad 1 + depthwise [1,2,1]⊗[1,2,1]/16, stride 2."""
    B, H, W, C = x_nhwc.shape
    xp = jnp.pad(x_nhwc, ((0, 0), (1, 1), (1, 1), (0, 0)), mode="reflect")
    Ho = (H + 2 - 3) // 2 + 1
    Wo = (W + 2 - 3) // 2 + 1
    slabs = []
    for ki in range(3):
        for kj in range(3):
            slabs.append(xp[:, ki:ki + 2 * (Ho - 1) + 1:2,
                            kj:kj + 2 * (Wo - 1) + 1:2, :])
    s = jnp.stack(slabs, axis=1).reshape(B, 9, Ho * Wo, C)

    out = pl.pallas_call(
        _blur_kernel,
        out_shape=jax.ShapeDtypeStruct((B, Ho * Wo, C), jnp.float32),
        grid=(B,),
        in_specs=[pl.BlockSpec((1, 9, Ho * Wo, C), lambda b: (b, 0, 0, 0))],
        out_specs=pl.BlockSpec((1, Ho * Wo, C), lambda b: (b, 0, 0)),
        compiler_params=_parallel(1),
    )(s)
    return out.reshape(B, Ho, Wo, C)


# ------------------------------- module port ------------------------------- #

class NLayerDiscriminator:
    """JAX/Pallas port of the PyTorch PatchGAN NLayerDiscriminator forward.

    norm_layer is BatchNorm2d (the PyTorch default), hence use_bias=False for
    the inner convolutions.  Weights are initialized deterministically with a
    fan-in uniform bound (PyTorch Conv2d-style).
    """

    def __init__(self, input_nc, ndf=64, n_layers=3, no_antialias=False, *, key=None):
        if key is None:
            key = jax.random.PRNGKey(0)
        self.no_antialias = no_antialias
        use_bias = False            # norm_layer == BatchNorm2d
        kw = 4

        def conv_init(k, cin, cout, with_bias):
            k1, k2 = jax.random.split(k)
            bound = 1.0 / np.sqrt(cin * kw * kw)
            w = jax.random.uniform(k1, (kw, kw, cin, cout), jnp.float32, -bound, bound)
            bias = (jax.random.uniform(k2, (cout,), jnp.float32, -bound, bound)
                    if with_bias else None)
            return w, bias

        stages = []
        key, k = jax.random.split(key)
        w, bias = conv_init(k, input_nc, ndf, True)
        stages.append(dict(w=w, b=bias, stride=2 if no_antialias else 1,
                           bn=None, act=True, down=not no_antialias))

        nf_mult = 1
        for n in range(1, n_layers):
            nf_prev, nf_mult = nf_mult, min(2 ** n, 8)
            key, k = jax.random.split(key)
            w, bias = conv_init(k, ndf * nf_prev, ndf * nf_mult, use_bias)
            stages.append(dict(w=w, b=bias, stride=2 if no_antialias else 1,
                               bn=(jnp.ones((ndf * nf_mult,), jnp.float32),
                                   jnp.zeros((ndf * nf_mult,), jnp.float32)),
                               act=True, down=not no_antialias))

        nf_prev, nf_mult = nf_mult, min(2 ** n_layers, 8)
        key, k = jax.random.split(key)
        w, bias = conv_init(k, ndf * nf_prev, ndf * nf_mult, use_bias)
        stages.append(dict(w=w, b=bias, stride=1,
                           bn=(jnp.ones((ndf * nf_mult,), jnp.float32),
                               jnp.zeros((ndf * nf_mult,), jnp.float32)),
                           act=True, down=False))

        key, k = jax.random.split(key)
        w, bias = conv_init(k, ndf * nf_mult, 1, True)
        stages.append(dict(w=w, b=bias, stride=1, bn=None, act=False, down=False))
        self.stages = stages

    def __call__(self, x_nchw):
        x = jnp.transpose(x_nchw, (0, 2, 3, 1))           # NCHW -> NHWC (lane = C)
        for st in self.stages:
            if st["bn"] is None:
                x = conv4x4(x, st["w"], st["b"], act=st["act"], stride=st["stride"])
            else:
                x = conv4x4(x, st["w"], st["b"], act=False, stride=st["stride"])
                x = batchnorm_leaky(x, *st["bn"])
            if st["down"]:
                x = blur_downsample(x)
        return jnp.transpose(x, (0, 3, 1, 2))             # back to NCHW


# ------------------------------ pure-JAX reference ------------------------- #

def _ref_forward(model, x_nchw):
    x = jnp.transpose(x_nchw, (0, 2, 3, 1))
    for st in model.stages:
        y = lax.conv_general_dilated(
            x, st["w"], (st["stride"], st["stride"]), ((1, 1), (1, 1)),
            dimension_numbers=("NHWC", "HWIO", "NHWC"),
            precision=lax.Precision.HIGHEST)
        if st["b"] is not None:
            y = y + st["b"]
        if st["bn"] is not None:
            g, be = st["bn"]
            mean = jnp.mean(y, axis=(0, 1, 2), keepdims=True)
            var = jnp.mean(jnp.square(y - mean), axis=(0, 1, 2), keepdims=True)
            y = (y - mean) / jnp.sqrt(var + BN_EPS) * g + be
        if st["act"]:
            y = jnp.where(y >= 0.0, y, LEAKY_SLOPE * y)
        if st["down"]:
            C = y.shape[-1]
            a = jnp.array([1.0, 2.0, 1.0], jnp.float32)
            filt = (a[:, None] * a[None, :]) / 16.0
            fw = jnp.tile(filt[:, :, None, None], (1, 1, 1, C))
            yp = jnp.pad(y, ((0, 0), (1, 1), (1, 1), (0, 0)), mode="reflect")
            y = lax.conv_general_dilated(
                yp, fw, (2, 2), "VALID",
                dimension_numbers=("NHWC", "HWIO", "NHWC"),
                feature_group_count=C, precision=lax.Precision.HIGHEST)
        x = y
    return jnp.transpose(x, (0, 3, 1, 2))


# ----------------------------------- demo ---------------------------------- #

if __name__ == "__main__":
    root = jax.random.PRNGKey(0)
    k_param, k_x = jax.random.split(root)

    # Small but representative: B=2, 3-channel 32x32 image, ndf=16, n_layers=3.
    x = jax.random.normal(k_x, (2, 3, 32, 32), jnp.float32)
    model = NLayerDiscriminator(input_nc=3, ndf=16, n_layers=3, key=k_param)

    out = model(x)
    out = jax.block_until_ready(out)

    ref = _ref_forward(model, x)
    assert out.shape == ref.shape, (out.shape, ref.shape)
    max_err = float(jnp.max(jnp.abs(out - ref)))
    assert jnp.allclose(out, ref, atol=2e-3, rtol=2e-3), max_err

    print("KERNEL_OK")
</pallas_src>

<mosaic_0001>
module attributes {stable_mosaic.version = 11 : i64} {
  func.func @_matmul_bias_act_kernel(%arg0: i32, %arg1: memref<512x48xf32, #tpu.memory_space<vmem>>, %arg2: memref<48x16xf32, #tpu.memory_space<vmem>>, %arg3: memref<1x16xf32, #tpu.memory_space<vmem>>, %arg4: memref<512x16xf32, #tpu.memory_space<vmem>>) attributes {dimension_semantics = [#tpu.dimension_semantics<parallel>], iteration_bounds = array<i64: 4>, scalar_prefetch = 0 : i64, scratch_operands = 0 : i64, tpu.core_type = #tpu.core_type<tc>, window_params = [{transform_indices = @transform_0, window_bounds = array<i64: 512, 48>}, {pipeline_mode = #tpu.pipeline_mode<synchronous>, transform_indices = @transform_1, window_bounds = array<i64: 48, 16>}, {pipeline_mode = #tpu.pipeline_mode<synchronous>, transform_indices = @transform_2, window_bounds = array<i64: 1, 16>}, {transform_indices = @transform_3, window_bounds = array<i64: 512, 16>}]} {
    %c0 = arith.constant 0 : index
    %c0_0 = arith.constant 0 : index
    %0 = vector.load %arg1[%c0, %c0_0] : memref<512x48xf32, #tpu.memory_space<vmem>>, vector<512x48xf32>
    %c0_1 = arith.constant 0 : index
    %c0_2 = arith.constant 0 : index
    %1 = vector.load %arg2[%c0_1, %c0_2] : memref<48x16xf32, #tpu.memory_space<vmem>>, vector<48x16xf32>
    %cst = arith.constant dense<0.000000e+00> : vector<512x16xf32>
    %2 = tpu.matmul %0, %1, %cst {dimension_numbers = #tpu.dot_dimension_numbers<[1], [0], [0], [1], [0, 0, 1, 1], [], []>, precision = #tpu.contract_precision<fp32>} : vector<512x48xf32>, vector<48x16xf32>, vector<512x16xf32> -> vector<512x16xf32>
    %c0_3 = arith.constant 0 : index
    %c0_4 = arith.constant 0 : index
    %3 = vector.load %arg3[%c0_3, %c0_4] : memref<1x16xf32, #tpu.memory_space<vmem>>, vector<1x16xf32>
    %4 = vector.broadcast %3 : vector<1x16xf32> to vector<512x16xf32>
    %5 = arith.addf %2, %4 : vector<512x16xf32>
    %cst_5 = arith.constant 0.000000e+00 : f32
    %6 = vector.broadcast %cst_5 : f32 to vector<512x16xf32>
    %7 = arith.cmpf oge, %5, %6 : vector<512x16xf32>
    %cst_6 = arith.constant 2.000000e-01 : f32
    %8 = vector.broadcast %cst_6 : f32 to vector<512x16xf32>
    %9 = arith.mulf %8, %5 : vector<512x16xf32>
    %10 = arith.select %7, %5, %9 : vector<512x16xi1>, vector<512x16xf32>
    %c0_7 = arith.constant 0 : index
    %c0_8 = arith.constant 0 : index
    %11 = vector.load %arg4[%c0_7, %c0_8] : memref<512x16xf32, #tpu.memory_space<vmem>>, vector<512x16xf32>
    tpu.vector_store %arg4[%c0_7, %c0_8], %10 {strides = array<i32>} : memref<512x16xf32, #tpu.memory_space<vmem>>, vector<512x16xf32>,
    return
  }
  func.func @transform_0(%arg0: i32) -> (i32, i32) {
    %c0_i32 = arith.constant 0 : i32
    %c0_i32_0 = arith.constant 0 : i32
    return %arg0, %c0_i32 : i32, i32
  }
  func.func @transform_1(%arg0: i32) -> (i32, i32) {
    %c0_i32 = arith.constant 0 : i32
    %c0_i32_0 = arith.constant 0 : i32
    %c0_i32_1 = arith.constant 0 : i32
    return %c0_i32, %c0_i32_0 : i32, i32
  }
  func.func @transform_2(%arg0: i32) -> (i32, i32) {
    %c0_i32 = arith.constant 0 : i32
    %c0_i32_0 = arith.constant 0 : i32
    %c0_i32_1 = arith.constant 0 : i32
    return %c0_i32, %c0_i32_0 : i32, i32
  }
  func.func @transform_3(%arg0: i32) -> (i32, i32) {
    %c0_i32 = arith.constant 0 : i32
    %c0_i32_0 = arith.constant 0 : i32
    return %arg0, %c0_i32 : i32, i32
  }
}

</mosaic_0001>

<bundles_post_ra>
// kernel: tpu_custom_call.1
= control target key start
LH: loop header
LB: loop body
LE: loop exit
PB: predicated region body
PF: predicated region fallthrough
CT: control target
= control target key end

     0   :  { %s2980_s12 = smov 0   ;;  %s4697_s0 = inlined_call_operand.vmem [shape: f32[2048,48], index: 0, kind: input, shape index: {}]   ;;  %s4698_s1 = inlined_call_operand.vmem [shape: f32[48,16], index: 1, kind: input, shape index: {}]   ;;  %s4699_s2 = inlined_call_operand.vmem [shape: f32[1,16], index: 2, kind: input, shape index: {}]   ;;  %s4700_s3 = inlined_call_operand.vmem [shape: f32[2048,16], index: 3, kind: output, shape index: {}]  }
   0x1 LB: > { %s2918_s13 = sadd.s32 4294967295, %s2958_s12   ;;  %p2922_p0 = scmp.ge.s32.totalorder %s2958_s12, 1  ;;  %s2958_s12 = sphi %s2980_s12, %s13_s12  }
   0x2   : > { %p138_p1 = scmp.lt.s32.totalorder %s2958_s12, 5 }
   0x4   : > { %p139_p2 = pnand %p2922_p0, %p138_p1 }
   0x6   : > { %142 = sbr.rel (%p139_p2) target bundleno = 935 (0x3a7), region = 32 }
   0xb   : > { %v243_v0 = vld [vmem:[%s4698_s1 + $0x28] sm:$0xff]  ;;  %v242_v1 = vld [vmem:[%s4698_s1 + $0x20] sm:$0xff]  ;;  %v241_v2 = vld [vmem:[%s4698_s1 + $0x18] sm:$0xff]  ;;  %s2923_s20 = sshll.u32 %s2918_s13, 6  ;;  %vm248_vm0 = vcmask 392192   ;;  %vm2797_vm2 = vcmask 130048  }
   0xc   : > { %v2997_v3 = vand.u32 4294901760, %v243_v0  ;;  %v2999_v4 = vand.u32 4294901760, %v242_v1  ;;  %v3001_v5 = vand.u32 4294901760, %v241_v2  ;;  %v240_v6 = vld [vmem:[%s4698_s1 + $0x10] sm:$0xff]  ;;  %v239_v7 = vld [vmem:[%s4698_s1 + $0x8] sm:$0xff]  ;;  %v238_v8 = vld [vmem:[%s4698_s1] sm:$0xff] }
   0xd   : > { %v3012_v9 = vand.u32 4294901760, %v240_v6  ;;  %v3014_v10 = vand.u32 4294901760, %v239_v7  ;;  %v3016_v11 = vand.u32 4294901760, %v238_v8  ;;  %p163_p3 = scmp.lt.s32.totalorder %s2923_s20, 255 }
   0xe   : > { %2929 = vmatpush.msra.mxu2 %v2997_v3  ;;  %v3020_v12 = vsub.f32 %v243_v0, %v2997_v3  ;;  %v3023_v13 = vsub.f32 %v242_v1, %v2999_v4  ;;  %v3026_v14 = vsub.f32 %v241_v2, %v3001_v5  ;;  %452 = vmatpush.msra.mxu0 %v2997_v3 }
   0xf   : > { %v3030_v15 = vsub.f32 %v240_v6, %v3012_v9  ;;  %s5288_s20 = smov (!%p163_p3, %s2923_s20), 255  ;;  %v3035_v16 = vsub.f32 %v239_v7, %v3014_v10  ;;  %v3038_v17 = vsub.f32 %v238_v8, %v3016_v11 }
  0x10   : > { %2930 = vmatpush.msra.mxu2 %v2999_v4  ;;  %v988_v18 = vand.u32 4294901760, %v3020_v12  ;;  %v994_v19 = vand.u32 4294901760, %v3023_v13  ;;  %v1000_v20 = vand.u32 4294901760, %v3026_v14  ;;  %454 = vmatpush.msra.mxu0 %v2999_v4  ;;  %s2924_s27 = sshll.u32 %s5288_s20, 3 }
  0x11   : > { %v1006_v21 = vand.u32 4294901760, %v3030_v15  ;;  %v1012_v22 = vand.u32 4294901760, %v3035_v16  ;;  %s3061_s30 = scalar_lea.vmem %s4697_s0, %s2924_s27  ;;  %v1018_v27 = vand.u32 4294901760, %v3038_v17  ;;  %s4210_s10 = scalar_lea.vmem %s4700_s3, %s2924_s27 }
  0x12   : > { %v989_v23 = vsub.f32 %v3020_v12, %v988_v18  ;;  %2931 = vmatpush.msra.mxu2 %v3001_v5  ;;  %v995_v24 = vsub.f32 %v3023_v13, %v994_v19  ;;  %v1001_v25 = vsub.f32 %v3026_v14, %v1000_v20  ;;  %456 = vmatpush.msra.mxu0 %v3001_v5  ;;  %v206_v26 = vld [vmem:[%s3061_s30 + $0x100] sm:$0xff]  ;;  %v207_v28 = vld [vmem:[%s3061_s30 + $0x108] sm:$0xff]  ;;  %v208_v37 = vld [vmem:[%s3061_s30 + $0x110] sm:$0xff] }
  0x13   : > { %v174_v29 = vld [vmem:[%s3061_s30] sm:$0xff]  ;;  %v1007_v32 = vsub.f32 %v3030_v15, %v1006_v21  ;;  %v346_v33 = vsel %vm248_vm0, %v206_v26, 0  ;;  %v175_v34 = vld [vmem:[%s3061_s30 + $0x8] sm:$0xff]  ;;  %v1013_v36 = vsub.f32 %v3035_v16, %v1012_v22  ;;  %v349_v39 = vsel %vm248_vm0, %v207_v28, 0  ;;  %v176_v45 = vld [vmem:[%s3061_s30 + $0x10] sm:$0xff] }
  0x14   : > { %v990_v30 = vand.u32 4294901760, %v989_v23  ;;  %v996_v31 = vand.u32 4294901760, %v995_v24  ;;  %2932 = vmatpush.msra.mxu2 %v3012_v9  ;;  %458 = vmatpush.msra.mxu0 %v3012_v9  ;;  %v3075_v35 = vand.u32 4294901760, %v346_v33  ;;  %v1002_v38 = vand.u32 4294901760, %v1001_v25  ;;  %v209_v0 = vld [vmem:[%s3061_s30 + $0x118] sm:$0xff]  ;;  %v210_v26 = vld [vmem:[%s3061_s30 + $0x120] sm:$0xff] }
  0x15   : > { %v250_v40 = vsel %vm248_vm0, %v174_v29, 0  ;;  %v253_v41 = vsel %vm248_vm0, %v175_v34, 0  ;;  %v3089_v43 = vand.u32 4294901760, %v349_v39  ;;  %v1008_v46 = vand.u32 4294901760, %v1007_v32  ;;  %v177_v8 = vld [vmem:[%s3061_s30 + $0x18] sm:$0xff] }
  0x16   : > { %4938 = vst [vmem:[#allocation2_spill] sm:$0xff] %v3075_v35  ;;  %2935 = vmatpush.msra.mxu3 %v990_v30  ;;  %2933 = vmatpush.msra.mxu2 %v3014_v10  ;;  %v3086_v42 = vsub.f32 %v346_v33, %v3075_v35  ;;  %v3091_v44 = vand.u32 4294901760, %v250_v40  ;;  %v1019_v47 = vsub.f32 %v3038_v17, %v1018_v27  ;;  %v352_v48 = vsel %vm248_vm0, %v208_v37, 0  ;;  %v179_v37 = vld [vmem:[%s3061_s30 + $0x28] sm:$0xff] }
  0x17   : > { %991 = vmatpush.msra.mxu1 %v990_v30  ;;  %460 = vmatpush.msra.mxu0 %v3014_v10  ;;  %4940 = vst [vmem:[#allocation4_spill] sm:$0xff] %v3089_v43  ;;  %v3099_v49 = vand.u32 4294901760, %v253_v41  ;;  %v3104_v51 = vsub.f32 %v349_v39, %v3089_v43  ;;  %v1014_v53 = vand.u32 4294901760, %v1013_v36  ;;  %v256_v55 = vsel %vm248_vm0, %v176_v45, 0  ;;  %v178_v30 = vld [vmem:[%s3061_s30 + $0x20] sm:$0xff] }
  0x18   : > { %4939 = vst [vmem:[#allocation3_spill] sm:$0xff] %v3086_v42  ;;  %2936 = vmatpush.msra.mxu3 %v996_v31  ;;  %2934 = vmatpush.msra.mxu2 %v3016_v11  ;;  %v4709_v50 = vand.u32 4294901760, %v3086_v42  ;;  %v3107_v52 = vsub.f32 %v250_v40, %v3091_v44  ;;  %v3119_v59 = vand.u32 4294901760, %v352_v48  ;;  %v1020_v60 = vand.u32 4294901760, %v1019_v47  ;;  %v212_v47 = vld [vmem:[%s3061_s30 + $0x130] sm:$0xff] }
  0x19   : > { %997 = vmatpush.msra.mxu1 %v996_v31  ;;  %4941 = vst [vmem:[#allocation5_spill] sm:$0xff] %v3104_v51  ;;  %462 = vmatpush.msra.mxu0 %v3016_v11  ;;  %v3111_v54 = vsub.f32 %v253_v41, %v3099_v49  ;;  %v4708_v57 = vand.u32 4294901760, %v3104_v51  ;;  %v3127_v1 = vand.u32 4294901760, %v256_v55 }
  0x1a   : > { %1291 = vmatpush.msrb.mxu2 %v3020_v12  ;;  %2937 = vmatpush.msra.mxu3 %v1002_v38  ;;  %v722_v56 = vsub.f32 %v3086_v42, %v4709_v50  ;;  %v4723_v58 = vand.u32 4294901760, %v3107_v52  ;;  %4942 = vst [vmem:[#allocation6_spill] sm:$0xff] %v3119_v59  ;;  %v3136_v7 = vsub.f32 %v352_v48, %v3119_v59  ;;  %v355_v12 = vsel %vm248_vm0, %v209_v0, 0 }
  0x1b   : > { %1003 = vmatpush.msra.mxu1 %v1002_v38  ;;  %2048 = vmatpush.msrb.mxu0 %v988_v18  ;;  %v4721_v63 = vand.u32 4294901760, %v3111_v54  ;;  %v730_v2 = vsub.f32 %v3104_v51, %v4708_v57  ;;  %v3147_v18 = vsub.f32 %v256_v55, %v3127_v1 }
  0x1c   : > { %2938 = vmatpush.msra.mxu3 %v1008_v46  ;;  %1294 = vmatpush.msrb.mxu2 %v3023_v13  ;;  %v723_v61 = vand.u32 4294901760, %v722_v56  ;;  %v466_v62 = vsub.f32 %v3107_v52, %v4723_v58  ;;  %4943 = vst [vmem:[#allocation7_spill] sm:$0xff] %v3136_v7  ;;  %v180_v56 = vld [vmem:[%s3061_s30 + $0x30] sm:$0xff] }
  0x1d   : > { %1009 = vmatpush.msra.mxu1 %v1008_v46  ;;  %2052 = vmatpush.msrb.mxu0 %v994_v19  ;;  %v474_v13 = vsub.f32 %v3111_v54, %v4721_v63  ;;  %v259_v19 = vsel %vm248_vm0, %v177_v8, 0  ;;  %v731_v23 = vand.u32 4294901760, %v730_v2  ;;  %v4719_v25 = vand.u32 4294901760, %v3147_v18 }
  0x1e   : > { %2939 = vmatpush.msra.mxu3 %v1014_v53  ;;  %1297 = vmatpush.msrb.mxu2 %v3026_v14  ;;  %v467_v6 = vand.u32 4294901760, %v466_v62  ;;  %v4707_v14 = vand.u32 4294901760, %v3136_v7  ;;  %v3160_v28 = vand.u32 4294901760, %v259_v19  ;;  %v268_v0 = vsel %vm248_vm0, %v180_v56, 0 }
  0x1f   : > { %724 = vmatmul.f32.vlgmr.msra.gmra.mxu2 %v723_v61  ;;  %1015 = vmatpush.msra.mxu1 %v1014_v53  ;;  %v475_v24 = vand.u32 4294901760, %v474_v13 }
  0x20   : > { %2940 = vmatpush.msra.mxu3 %v1020_v60  ;;  %2056 = vmatpush.msrb.mxu0 %v1000_v20  ;;  %v3153_v20 = vand.u32 4294901760, %v355_v12 }
  0x21   : > { %1151 = vmatmul.f32.vlgmr.msra.gmra.mxu3 %v3075_v35  ;;  %468 = vmatmul.f32.vlgmr.msra.gmra.mxu0 %v467_v6  ;;  %v227_v35 = vld [vmem:[%s3061_s30 + $0x1a8] sm:$0xff] }
  0x22   : > { %1639 = vmatpush.msrb.mxu3 %v2997_v3  ;;  %1021 = vmatpush.msra.mxu1 %v1020_v60  ;;  %4944 = vst [vmem:[#allocation8_spill] sm:$0xff] %v3153_v20  ;;  %v3171_v29 = vsub.f32 %v355_v12, %v3153_v20  ;;  %v364_v60 = vsel %vm248_vm0, %v212_v47, 0 }
  0x23   : > { %1023 = vmatmul.f32.vlgmr.msra.gmra.mxu1 %v3091_v44  ;;  %1300 = vmatpush.msrb.mxu2 %v3030_v15  ;;  %v358_v15 = vsel %vm248_vm0, %v210_v26, 0  ;;  %v3245_v8 = vand.u32 4294901760, %v364_v60 }
  0x24   : > { %2337 = vmatpush.msrb.mxu1 %v2997_v3  ;;  %1641 = vmatpush.msrb.mxu3 %v2999_v4  ;;  %v738_v3 = vsub.f32 %v3136_v7, %v4707_v14  ;;  %4945 = vst [vmem:[#allocation9_spill] sm:$0xff] %v3171_v29  ;;  %v3191_v31 = vand.u32 4294901760, %v358_v15 }
  0x25   : > { %2060 = vmatpush.msrb.mxu0 %v1006_v21  ;;  %1303 = vmatpush.msrb.mxu2 %v3035_v16  ;;  %v3184_v21 = vsub.f32 %v259_v19, %v3160_v28  ;;  %v262_v16 = vsel %vm248_vm0, %v178_v30, 0  ;;  %4950 = vst [vmem:[#allocation14_spill] sm:$0xff] %v3245_v8  ;;  %v213_v19 = vld [vmem:[%s3061_s30 + $0x138] sm:$0xff]  ;;  %v3255_v26 = vsub.f32 %v364_v60, %v3245_v8 }
  0x26   : > { %2339 = vmatpush.msrb.mxu1 %v2999_v4  ;;  %1643 = vmatpush.msrb.mxu3 %v3001_v5  ;;  %v482_v4 = vsub.f32 %v3147_v18, %v4719_v25  ;;  %4946 = vst [vmem:[#allocation10_spill] sm:$0xff] %v3191_v31  ;;  %v3198_v34 = vand.u32 4294901760, %v262_v16  ;;  %v367_v30 = vsel %vm248_vm0, %v213_v19, 0 }
  0x27   : > { %732 = vmatmul.f32.gmra.mxu2 %v731_v23  ;;  %2064 = vmatpush.msrb.mxu0 %v1012_v22  ;;  %v4706_v22 = vand.u32 4294901760, %v3171_v29  ;;  %v4718_v33 = vand.u32 4294901760, %v3184_v21  ;;  %v3249_v23 = vand.u32 4294901760, %v268_v0  ;;  %4951 = vst [vmem:[#allocation15_spill] sm:$0xff] %v3255_v26 }
  0x28   : > { %2341 = vmatpush.msrb.mxu1 %v3001_v5  ;;  %1645 = vmatpush.msrb.mxu3 %v3012_v9  ;;  %v739_v5 = vand.u32 4294901760, %v738_v3  ;;  %v483_v32 = vand.u32 4294901760, %v482_v4  ;;  %v181_v3 = vld [vmem:[%s3061_s30 + $0x38] sm:$0xff] }
  0x29   : > { %1155 = vmatmul.f32.gmra.mxu3 %v3089_v43  ;;  %476 = vmatmul.f32.gmra.mxu0 %v475_v24  ;;  %v746_v36 = vsub.f32 %v3171_v29, %v4706_v22  ;;  %v3264_v4 = vsub.f32 %v268_v0, %v3249_v23  ;;  %v194_v43 = vld [vmem:[%s3061_s30 + $0xa0] sm:$0xff] }
  0x2a   : > { %2343 = vmatpush.msrb.mxu1 %v3012_v9  ;;  %1647 = vmatpush.msrb.mxu3 %v3014_v10  ;;  %v211_v9 = vld [vmem:[%s3061_s30 + $0x128] sm:$0xff] }
  0x2b   : > { %1027 = vmatmul.f32.gmra.mxu1 %v3099_v49  ;;  %1306 = vmatpush.msrb.mxu2 %v3038_v17  ;;  %v361_v38 = vsel %vm248_vm0, %v211_v9, 0  ;;  %v3216_v17 = vsub.f32 %v262_v16, %v3198_v34  ;;  %v747_v39 = vand.u32 4294901760, %v746_v36  ;;  %v271_v16 = vsel %vm248_vm0, %v181_v3, 0 }
  0x2c   : > { %2345 = vmatpush.msrb.mxu1 %v3014_v10  ;;  %1649 = vmatpush.msrb.mxu3 %v3016_v11  ;;  %v3207_v10 = vsub.f32 %v358_v15, %v3191_v31  ;;  %v3221_v41 = vand.u32 4294901760, %v361_v38  ;;  %v3269_v9 = vand.u32 4294901760, %v367_v30 }
  0x2d   : > { %2068 = vmatpush.msrb.mxu0 %v1018_v27  ;;  %v265_v27 = vsel %vm248_vm0, %v179_v37, 0  ;;  %v4717_v46 = vand.u32 4294901760, %v3216_v17  ;;  %v4713_v37 = vand.u32 4294901760, %v3264_v4 }
  0x2e   : > { %2347 = vmatpush.msrb.mxu1 %v3016_v11  ;;  %4947 = vst [vmem:[#allocation11_spill] sm:$0xff] %v3207_v10  ;;  %v490_v11 = vsub.f32 %v3184_v21, %v4718_v33  ;;  %v4705_v40 = vand.u32 4294901760, %v3207_v10  ;;  %v3225_v48 = vand.u32 4294901760, %v265_v27  ;;  %v3231_v55 = vsub.f32 %v361_v38, %v3221_v41  ;;  %v214_v38 = vld [vmem:[%s3061_s30 + $0x140] sm:$0xff] }
  0x2f   : > { %740 = vmatmul.f32.gmra.mxu2 %v739_v5  ;;  %4948 = vst [vmem:[#allocation12_spill] sm:$0xff] %v3221_v41  ;;  %v498_v61 = vsub.f32 %v3216_v17, %v4717_v46  ;;  %v370_v47 = vsel %vm248_vm0, %v214_v38, 0 }
  0x30   : > { %v491_v45 = vand.u32 4294901760, %v490_v11  ;;  %v754_v53 = vsub.f32 %v3207_v10, %v4705_v40  ;;  %4949 = vst [vmem:[#allocation13_spill] sm:$0xff] %v3231_v55  ;;  %v3240_v62 = vsub.f32 %v265_v27, %v3225_v48  ;;  %v4703_v6 = vand.u32 4294901760, %v3231_v55 }
  0x31   : > { %1159 = vmatmul.f32.gmra.mxu3 %v3119_v59  ;;  %484 = vmatmul.f32.gmra.mxu0 %v483_v32  ;;  %v499_v12 = vand.u32 4294901760, %v498_v61  ;;  %v4702_v32 = vand.u32 4294901760, %v3255_v26  ;;  %4952 = vst [vmem:[#allocation16_spill] sm:$0xff] %v3269_v9  ;;  %v3273_v11 = vand.u32 4294901760, %v271_v16  ;;  %v226_v59 = vld [vmem:[%s3061_s30 + $0x1a0] sm:$0xff] }
  0x32   : > { %v755_v2 = vand.u32 4294901760, %v754_v53  ;;  %v4715_v13 = vand.u32 4294901760, %v3240_v62  ;;  %v762_v24 = vsub.f32 %v3231_v55, %v4703_v6  ;;  %v514_v53 = vsub.f32 %v3264_v4, %v4713_v37 }
  0x33   : > { %1031 = vmatmul.f32.gmra.mxu1 %v3127_v1  ;;  %v770_v27 = vsub.f32 %v3255_v26, %v4702_v32  ;;  %v3288_v56 = vsub.f32 %v271_v16, %v3273_v11  ;;  %v183_v16 = vld [vmem:[%s3061_s30 + $0x48] sm:$0xff] }
  0x34   : > { %v506_v15 = vsub.f32 %v3240_v62, %v4715_v13  ;;  %v763_v5 = vand.u32 4294901760, %v762_v24  ;;  %v215_v24 = vld [vmem:[%s3061_s30 + $0x148] sm:$0xff] }
  0x35   : > { %v771_v61 = vand.u32 4294901760, %v770_v27  ;;  %v4712_v19 = vand.u32 4294901760, %v3288_v56  ;;  %v277_v27 = vsel %vm248_vm0, %v183_v16, 0  ;;  %v184_v16 = vld [vmem:[%s3061_s30 + $0x50] sm:$0xff] }
  0x36   : > { %v507_v36 = vand.u32 4294901760, %v506_v15  ;;  %v280_v6 = vsel %vm248_vm0, %v184_v16, 0  ;;  %v185_v16 = vld [vmem:[%s3061_s30 + $0x58] sm:$0xff] }
  0x37   : > { %748 = vmatmul.f32.gmra.mxu2 %v747_v39  ;;  %v3279_v39 = vsub.f32 %v367_v30, %v3269_v9  ;;  %v3345_v14 = vand.u32 4294901760, %v280_v6  ;;  %v283_v50 = vsel %vm248_vm0, %v185_v16, 0  ;;  %v186_v16 = vld [vmem:[%s3061_s30 + $0x60] sm:$0xff] }
  0x38   : > { %v3369_v37 = vand.u32 4294901760, %v283_v50  ;;  %v286_v13 = vsel %vm248_vm0, %v186_v16, 0  ;;  %v187_v16 = vld [vmem:[%s3061_s30 + $0x68] sm:$0xff] }
  0x39   : > { %1163 = vmatmul.f32.gmra.mxu3 %v3153_v20  ;;  %492 = vmatmul.f32.gmra.mxu0 %v491_v45  ;;  %4953 = vst [vmem:[#allocation17_spill] sm:$0xff] %v3279_v39  ;;  %v182_v45 = vld [vmem:[%s3061_s30 + $0x40] sm:$0xff]  ;;  %v4701_v0 = vand.u32 4294901760, %v3279_v39  ;;  %v3393_v25 = vand.u32 4294901760, %v286_v13  ;;  %v289_v63 = vsel %vm248_vm0, %v187_v16, 0  ;;  %v188_v16 = vld [vmem:[%s3061_s30 + $0x70] sm:$0xff] }
  0x3a   : > { %v274_v60 = vsel %vm248_vm0, %v182_v45, 0 }
  0x3b   : > { %1035 = vmatmul.f32.gmra.mxu1 %v3160_v28  ;;  %v3297_v3 = vand.u32 4294901760, %v274_v60  ;;  %v778_v30 = vsub.f32 %v3279_v39, %v4701_v0  ;;  %v3321_v0 = vand.u32 4294901760, %v277_v27 }
  0x3d   : > { %v3312_v38 = vsub.f32 %v274_v60, %v3297_v3  ;;  %v779_v45 = vand.u32 4294901760, %v778_v30 }
  0x3f   : > { %756 = vmatmul.f32.gmra.mxu2 %v755_v2  ;;  %v3293_v2 = vand.u32 4294901760, %v370_v47 }
  0x41   : > { %1167 = vmatmul.f32.gmra.mxu3 %v3191_v31  ;;  %500 = vmatmul.f32.gmra.mxu0 %v499_v12  ;;  %4954 = vst [vmem:[#allocation18_spill] sm:$0xff] %v3293_v2  ;;  %v515_v12 = vand.u32 4294901760, %v514_v53  ;;  %v3303_v15 = vsub.f32 %v370_v47, %v3293_v2 }
  0x43   : > { %1039 = vmatmul.f32.gmra.mxu1 %v3198_v34  ;;  %4955 = vst [vmem:[#allocation19_spill] sm:$0xff] %v3303_v15  ;;  %v4704_v47 = vand.u32 4294901760, %v3303_v15 }
  0x45   : > { %v786_v60 = vsub.f32 %v3303_v15, %v4704_v47 }
  0x47   : > { %764 = vmatmul.f32.gmra.mxu2 %v763_v5  ;;  %v373_v5 = vsel %vm248_vm0, %v215_v24, 0  ;;  %v4711_v24 = vand.u32 4294901760, %v3312_v38  ;;  %v787_v47 = vand.u32 4294901760, %v786_v60 }
  0x48   : > { %v3317_v53 = vand.u32 4294901760, %v373_v5 }
  0x49   : > { %1171 = vmatmul.f32.gmra.mxu3 %v3221_v41  ;;  %508 = vmatmul.f32.gmra.mxu0 %v507_v36  ;;  %v522_v36 = vsub.f32 %v3288_v56, %v4712_v19 }
  0x4a   : > { %4956 = vst [vmem:[#allocation20_spill] sm:$0xff] %v3317_v53  ;;  %v3327_v30 = vsub.f32 %v373_v5, %v3317_v53 }
  0x4b   : > { %1043 = vmatmul.f32.gmra.mxu1 %v3225_v48 }
  0x4c   : > { %4957 = vst [vmem:[#allocation21_spill] sm:$0xff] %v3327_v30  ;;  %v4710_v5 = vand.u32 4294901760, %v3327_v30 }
  0x4f   : > { %772 = vmatmul.f32.gmra.mxu2 %v771_v61  ;;  %v523_v61 = vand.u32 4294901760, %v522_v36  ;;  %v530_v36 = vsub.f32 %v3312_v38, %v4711_v24 }
  0x51   : > { %1175 = vmatmul.f32.gmra.mxu3 %v3245_v8  ;;  %516 = vmatmul.f32.gmra.mxu0 %v515_v12  ;;  %v216_v12 = vld [vmem:[%s3061_s30 + $0x150] sm:$0xff] }
  0x52   : > { %v376_v32 = vsel %vm248_vm0, %v216_v12, 0  ;;  %v531_v12 = vand.u32 4294901760, %v530_v36 }
  0x53   : > { %1047 = vmatmul.f32.gmra.mxu1 %v3249_v23  ;;  %v3341_v40 = vand.u32 4294901760, %v376_v32 }
  0x55   : > { %4958 = vst [vmem:[#allocation22_spill] sm:$0xff] %v3341_v40  ;;  %v3351_v60 = vsub.f32 %v376_v32, %v3341_v40 }
  0x57   : > { %780 = vmatmul.f32.gmra.mxu2 %v779_v45  ;;  %v3336_v45 = vsub.f32 %v277_v27, %v3321_v0  ;;  %v794_v27 = vsub.f32 %v3327_v30, %v4710_v5  ;;  %4959 = vst [vmem:[#allocation23_spill] sm:$0xff] %v3351_v60  ;;  %v4716_v32 = vand.u32 4294901760, %v3351_v60 }
  0x59   : > { %1179 = vmatmul.f32.gmra.mxu3 %v3269_v9  ;;  %524 = vmatmul.f32.gmra.mxu0 %v523_v61  ;;  %v4714_v22 = vand.u32 4294901760, %v3336_v45  ;;  %v217_v61 = vld [vmem:[%s3061_s30 + $0x158] sm:$0xff]  ;;  %v795_v5 = vand.u32 4294901760, %v794_v27 }
  0x5a   : > { %v379_v57 = vsel %vm248_vm0, %v217_v61, 0 }
  0x5b   : > { %1051 = vmatmul.f32.gmra.mxu1 %v3273_v11  ;;  %v538_v36 = vsub.f32 %v3336_v45, %v4714_v22  ;;  %v3365_v24 = vand.u32 4294901760, %v379_v57 }
  0x5d   : > { %4960 = vst [vmem:[#allocation24_spill] sm:$0xff] %v3365_v24  ;;  %v539_v61 = vand.u32 4294901760, %v538_v36  ;;  %v3375_v27 = vsub.f32 %v379_v57, %v3365_v24 }
  0x5f   : > { %788 = vmatmul.f32.gmra.mxu2 %v787_v47  ;;  %v3360_v47 = vsub.f32 %v280_v6, %v3345_v14  ;;  %v802_v6 = vsub.f32 %v3351_v60, %v4716_v32  ;;  %4961 = vst [vmem:[#allocation25_spill] sm:$0xff] %v3375_v27  ;;  %v4722_v57 = vand.u32 4294901760, %v3375_v27  ;;  %v292_v60 = vsel %vm248_vm0, %v188_v16, 0  ;;  %v189_v16 = vld [vmem:[%s3061_s30 + $0x78] sm:$0xff] }
  0x60   : > { %v295_v30 = vsel %vm248_vm0, %v189_v16, 0  ;;  %v190_v16 = vld [vmem:[%s3061_s30 + $0x80] sm:$0xff] }
  0x61   : > { %1183 = vmatmul.f32.gmra.mxu3 %v3293_v2  ;;  %532 = vmatmul.f32.gmra.mxu0 %v531_v12  ;;  %v4720_v19 = vand.u32 4294901760, %v3360_v47  ;;  %v218_v12 = vld [vmem:[%s3061_s30 + $0x160] sm:$0xff]  ;;  %v803_v32 = vand.u32 4294901760, %v802_v6  ;;  %v3465_v2 = vand.u32 4294901760, %v295_v30  ;;  %v298_v15 = vsel %vm248_vm0, %v190_v16, 0  ;;  %v191_v16 = vld [vmem:[%s3061_s30 + $0x88] sm:$0xff] }
  0x62   : > { %v382_v22 = vsel %vm248_vm0, %v218_v12, 0  ;;  %v3489_v9 = vand.u32 4294901760, %v298_v15  ;;  %v301_v39 = vsel %vm248_vm0, %v191_v16, 0  ;;  %v192_v16 = vld [vmem:[%s3061_s30 + $0x90] sm:$0xff] }
  0x63   : > { %1055 = vmatmul.f32.gmra.mxu1 %v3297_v3  ;;  %v546_v36 = vsub.f32 %v3360_v47, %v4720_v19  ;;  %v3389_v46 = vand.u32 4294901760, %v382_v22  ;;  %v3513_v8 = vand.u32 4294901760, %v301_v39  ;;  %v304_v26 = vsel %vm248_vm0, %v192_v16, 0 }
  0x64   : > { %v3537_v41 = vand.u32 4294901760, %v304_v26 }
  0x65   : > { %4962 = vst [vmem:[#allocation26_spill] sm:$0xff] %v3389_v46  ;;  %v547_v12 = vand.u32 4294901760, %v546_v36  ;;  %v3399_v6 = vsub.f32 %v382_v22, %v3389_v46 }
  0x66   : > { %4973 = vst [vmem:[#allocation37_spill] sm:$0xff] %v3513_v8  ;;  %v3561_v10 = vsub.f32 %v304_v26, %v3537_v41 }
  0x67   : > { %796 = vmatmul.f32.gmra.mxu2 %v795_v5  ;;  %v3384_v5 = vsub.f32 %v283_v50, %v3369_v37  ;;  %v810_v50 = vsub.f32 %v3375_v27, %v4722_v57  ;;  %4963 = vst [vmem:[#allocation27_spill] sm:$0xff] %v3399_v6  ;;  %v4731_v22 = vand.u32 4294901760, %v3399_v6 }
  0x68   : > { %4976 = vst [vmem:[#allocation40_spill] sm:$0xff] %v3537_v41  ;;  %v4807_v26 = vand.u32 4294901760, %v3561_v10 }
  0x69   : > { %1187 = vmatmul.f32.gmra.mxu3 %v3317_v53  ;;  %540 = vmatmul.f32.gmra.mxu0 %v539_v61  ;;  %v4728_v33 = vand.u32 4294901760, %v3384_v5  ;;  %v219_v61 = vld [vmem:[%s3061_s30 + $0x168] sm:$0xff]  ;;  %v811_v57 = vand.u32 4294901760, %v810_v50  ;;  %v3441_v53 = vand.u32 4294901760, %v292_v60  ;;  %4979 = vst [vmem:[#allocation42_spill] sm:$0xff] %v3561_v10 }
  0x6a   : > { %v385_v19 = vsel %vm248_vm0, %v219_v61, 0 }
  0x6b   : > { %1059 = vmatmul.f32.gmra.mxu1 %v3321_v0  ;;  %v554_v36 = vsub.f32 %v3384_v5, %v4728_v33  ;;  %v3413_v58 = vand.u32 4294901760, %v385_v19 }
  0x6d   : > { %4964 = vst [vmem:[#allocation28_spill] sm:$0xff] %v3413_v58  ;;  %v555_v61 = vand.u32 4294901760, %v554_v36  ;;  %v3423_v50 = vsub.f32 %v385_v19, %v3413_v58 }
  0x6f   : > { %804 = vmatmul.f32.gmra.mxu2 %v803_v32  ;;  %v3408_v32 = vsub.f32 %v286_v13, %v3393_v25  ;;  %v818_v13 = vsub.f32 %v3399_v6, %v4731_v22  ;;  %4965 = vst [vmem:[#allocation29_spill] sm:$0xff] %v3423_v50  ;;  %v4741_v19 = vand.u32 4294901760, %v3423_v50 }
  0x71   : > { %1191 = vmatmul.f32.gmra.mxu3 %v3341_v40  ;;  %548 = vmatmul.f32.gmra.mxu0 %v547_v12  ;;  %v4738_v27 = vand.u32 4294901760, %v3408_v32  ;;  %v220_v12 = vld [vmem:[%s3061_s30 + $0x170] sm:$0xff]  ;;  %v3417_v40 = vand.u32 4294901760, %v289_v63  ;;  %v819_v22 = vand.u32 4294901760, %v818_v13 }
  0x72   : > { %v388_v33 = vsel %vm248_vm0, %v220_v12, 0 }
  0x73   : > { %1063 = vmatmul.f32.gmra.mxu1 %v3345_v14  ;;  %v562_v36 = vsub.f32 %v3408_v32, %v4738_v27  ;;  %v3437_v6 = vand.u32 4294901760, %v388_v33 }
  0x75   : > { %4966 = vst [vmem:[#allocation30_spill] sm:$0xff] %v3437_v6  ;;  %v563_v12 = vand.u32 4294901760, %v562_v36  ;;  %v3447_v13 = vsub.f32 %v388_v33, %v3437_v6 }
  0x77   : > { %812 = vmatmul.f32.gmra.mxu2 %v811_v57  ;;  %v3432_v57 = vsub.f32 %v289_v63, %v3417_v40  ;;  %v826_v63 = vsub.f32 %v3423_v50, %v4741_v19  ;;  %4967 = vst [vmem:[#allocation31_spill] sm:$0xff] %v3447_v13  ;;  %v4751_v33 = vand.u32 4294901760, %v3447_v13 }
  0x79   : > { %1195 = vmatmul.f32.gmra.mxu3 %v3365_v24  ;;  %556 = vmatmul.f32.gmra.mxu0 %v555_v61  ;;  %v4748_v24 = vand.u32 4294901760, %v3432_v57  ;;  %v221_v61 = vld [vmem:[%s3061_s30 + $0x178] sm:$0xff]  ;;  %v827_v19 = vand.u32 4294901760, %v826_v63 }
  0x7a   : > { %v391_v27 = vsel %vm248_vm0, %v221_v61, 0 }
  0x7b   : > { %1067 = vmatmul.f32.gmra.mxu1 %v3369_v37  ;;  %v570_v36 = vsub.f32 %v3432_v57, %v4748_v24  ;;  %v3461_v50 = vand.u32 4294901760, %v391_v27 }
  0x7d   : > { %4968 = vst [vmem:[#allocation32_spill] sm:$0xff] %v3461_v50  ;;  %v571_v61 = vand.u32 4294901760, %v570_v36  ;;  %v3471_v63 = vsub.f32 %v391_v27, %v3461_v50 }
  0x7f   : > { %820 = vmatmul.f32.gmra.mxu2 %v819_v22  ;;  %v3456_v22 = vsub.f32 %v292_v60, %v3441_v53  ;;  %v834_v60 = vsub.f32 %v3447_v13, %v4751_v33  ;;  %4969 = vst [vmem:[#allocation33_spill] sm:$0xff] %v3471_v63  ;;  %v4761_v27 = vand.u32 4294901760, %v3471_v63 }
  0x81   : > { %1199 = vmatmul.f32.gmra.mxu3 %v3389_v46  ;;  %564 = vmatmul.f32.gmra.mxu0 %v563_v12  ;;  %v4758_v46 = vand.u32 4294901760, %v3456_v22  ;;  %v222_v12 = vld [vmem:[%s3061_s30 + $0x180] sm:$0xff]  ;;  %v835_v33 = vand.u32 4294901760, %v834_v60 }
  0x82   : > { %v394_v24 = vsel %vm248_vm0, %v222_v12, 0 }
  0x83   : > { %1071 = vmatmul.f32.gmra.mxu1 %v3393_v25  ;;  %v578_v36 = vsub.f32 %v3456_v22, %v4758_v46  ;;  %v3485_v13 = vand.u32 4294901760, %v394_v24 }
  0x85   : > { %4970 = vst [vmem:[#allocation34_spill] sm:$0xff] %v3485_v13  ;;  %v579_v12 = vand.u32 4294901760, %v578_v36  ;;  %v3495_v60 = vsub.f32 %v394_v24, %v3485_v13 }
  0x87   : > { %828 = vmatmul.f32.gmra.mxu2 %v827_v19  ;;  %v3480_v19 = vsub.f32 %v295_v30, %v3465_v2  ;;  %v842_v30 = vsub.f32 %v3471_v63, %v4761_v27  ;;  %4971 = vst [vmem:[#allocation35_spill] sm:$0xff] %v3495_v60  ;;  %v4771_v24 = vand.u32 4294901760, %v3495_v60 }
  0x89   : > { %1203 = vmatmul.f32.gmra.mxu3 %v3413_v58  ;;  %572 = vmatmul.f32.gmra.mxu0 %v571_v61  ;;  %v4768_v58 = vand.u32 4294901760, %v3480_v19  ;;  %v223_v61 = vld [vmem:[%s3061_s30 + $0x188] sm:$0xff]  ;;  %v843_v27 = vand.u32 4294901760, %v842_v30 }
  0x8a   : > { %v397_v46 = vsel %vm248_vm0, %v223_v61, 0 }
  0x8b   : > { %1075 = vmatmul.f32.gmra.mxu1 %v3417_v40  ;;  %v586_v36 = vsub.f32 %v3480_v19, %v4768_v58  ;;  %v3509_v63 = vand.u32 4294901760, %v397_v46 }
  0x8d   : > { %4972 = vst [vmem:[#allocation36_spill] sm:$0xff] %v3509_v63  ;;  %v587_v61 = vand.u32 4294901760, %v586_v36  ;;  %v3519_v30 = vsub.f32 %v397_v46, %v3509_v63 }
  0x8f   : > { %836 = vmatmul.f32.gmra.mxu2 %v835_v33  ;;  %v3504_v33 = vsub.f32 %v298_v15, %v3489_v9  ;;  %v850_v15 = vsub.f32 %v3495_v60, %v4771_v24  ;;  %4974 = vst [vmem:[#allocation38_spill] sm:$0xff] %v3519_v30  ;;  %v4785_v46 = vand.u32 4294901760, %v3519_v30 }
  0x91   : > { %1207 = vmatmul.f32.gmra.mxu3 %v3437_v6  ;;  %580 = vmatmul.f32.gmra.mxu0 %v579_v12  ;;  %v4778_v6 = vand.u32 4294901760, %v3504_v33  ;;  %v224_v12 = vld [vmem:[%s3061_s30 + $0x190] sm:$0xff]  ;;  %v851_v24 = vand.u32 4294901760, %v850_v15  ;;  %v858_v15 = vsub.f32 %v3519_v30, %v4785_v46 }
  0x92   : > { %v400_v58 = vsel %vm248_vm0, %v224_v12, 0 }
  0x93   : > { %1079 = vmatmul.f32.gmra.mxu1 %v3441_v53  ;;  %v594_v36 = vsub.f32 %v3504_v33, %v4778_v6  ;;  %v3533_v60 = vand.u32 4294901760, %v400_v58  ;;  %v859_v20 = vand.u32 4294901760, %v858_v15 }
  0x95   : > { %4975 = vst [vmem:[#allocation39_spill] sm:$0xff] %v3533_v60  ;;  %v595_v12 = vand.u32 4294901760, %v594_v36  ;;  %v3550_v16 = vsub.f32 %v400_v58, %v3533_v60  ;;  %v193_v36 = vld [vmem:[%s3061_s30 + $0x98] sm:$0xff] }
  0x96   : > { %v307_v58 = vsel %vm248_vm0, %v193_v36, 0 }
  0x97   : > { %844 = vmatmul.f32.gmra.mxu2 %v843_v27  ;;  %v3528_v27 = vsub.f32 %v301_v39, %v3513_v8  ;;  %v3544_v39 = vld [vmem:[%s4699_s2] ss:$0 sm:$0xff]  ;;  %4977 = vst [vmem:[#allocation41_spill] sm:$0xff] %v3550_v16  ;;  %v3573_v7 = vand.u32 4294901760, %v307_v58 }
  0x99   : > { %1211 = vmatmul.f32.gmra.mxu3 %v3461_v50  ;;  %588 = vmatmul.f32.gmra.mxu0 %v587_v61  ;;  %v225_v50 = vld [vmem:[%s3061_s30 + $0x198] sm:$0xff]  ;;  %4982 = vst [vmem:[#allocation45_spill] sm:$0xff] %v3573_v7 }
  0x9a   : > { %v403_v55 = vsel %vm248_vm0, %v225_v50, 0  ;;  %v4802_v50 = vand.u32 4294901760, %v3550_v16 }
  0x9b   : > { %1083 = vmatmul.f32.gmra.mxu1 %v3465_v2 }
  0x9e   : > { %v3539_v6 = vpop.f32.mrf.mxu0 }
  0x9f   : > { %852 = vmatmul.f32.gmra.mxu2 %v851_v24  ;;  %v4978_v24 = vand.u32 4294901760, %v3528_v27 }
  0xa0   : > { %v3553_v61 = vpop.f32.mrf.mxu1 }
  0xa1   : > { %1215 = vmatmul.f32.gmra.mxu3 %v3485_v13  ;;  %596 = vmatmul.f32.gmra.mxu0 %v595_v12  ;;  %v602_v31 = vsub.f32 %v3528_v27, %v4978_v24  ;;  %v3567_v13 = vand.u32 4294901760, %v403_v55 }
  0xa2   : > { %v725_v46 = vpop.f32.mrf.mxu2 }
  0xa3   : > { %v726_v30 = vadd.f32 %v3544_v39, %v725_v46  ;;  %1087 = vmatmul.f32.gmra.mxu1 %v3489_v9  ;;  %4980 = vst [vmem:[#allocation43_spill] sm:$0xff] %v3567_v13  ;;  %v603_v24 = vand.u32 4294901760, %v602_v31  ;;  %v866_v46 = vsub.f32 %v3550_v16, %v4802_v50  ;;  %v3581_v15 = vsub.f32 %v403_v55, %v3567_v13 }
  0xa4   : > { %v1152_v12 = vpop.f32.mrf.mxu3  ;;  %v406_v31 = vsel %vm248_vm0, %v226_v59, 0  ;;  %v310_v55 = vsel %vm248_vm0, %v194_v43, 0 }
  0xa5   : > { %v3569_v29 = vadd.f32 %v1152_v12, %v726_v30  ;;  %4983 = vst [vmem:[#allocation46_spill] sm:$0xff] %v3581_v15  ;;  %v3592_v30 = vsub.f32 %v307_v58, %v3573_v7  ;;  %v867_v16 = vand.u32 4294901760, %v866_v46  ;;  %v4816_v59 = vand.u32 4294901760, %v3581_v15 }
  0xa6   : > { %v3575_v36 = vpop.f32.mrf.mxu0  ;;  %v3604_v42 = vand.u32 4294901760, %v310_v55 }
  0xa7   : > { %4981 = vst [vmem:[#allocation44_spill] sm:$0xff] %v3569_v29  ;;  %860 = vmatmul.f32.gmra.mxu2 %v859_v20  ;;  %v610_v20 = vsub.f32 %v3561_v10, %v4807_v26  ;;  %v4821_v58 = vand.u32 4294901760, %v3592_v30  ;;  %v874_v46 = vsub.f32 %v3581_v15, %v4816_v59  ;;  %v195_v10 = vld [vmem:[%s3061_s30 + $0xa8] sm:$0xff] }
  0xa8   : > { %v3584_v51 = vpop.f32.mrf.mxu1  ;;  %4984 = vst [vmem:[#allocation47_spill] sm:$0xff] %v3592_v30 }
  0xa9   : > { %1219 = vmatmul.f32.gmra.mxu3 %v3509_v63  ;;  %604 = vmatmul.f32.gmra.mxu0 %v603_v24  ;;  %v3598_v63 = vand.u32 4294901760, %v406_v31  ;;  %v611_v26 = vand.u32 4294901760, %v610_v20  ;;  %4987 = vst [vmem:[#allocation50_spill] sm:$0xff] %v3604_v42  ;;  %v3623_v20 = vsub.f32 %v310_v55, %v3604_v42  ;;  %v875_v15 = vand.u32 4294901760, %v874_v46 }
  0xaa   : > { %v733_v12 = vpop.f32.mrf.mxu2 }
  0xab   : > { %v734_v50 = vadd.f32 %v3544_v39, %v733_v12  ;;  %1091 = vmatmul.f32.gmra.mxu1 %v3513_v8  ;;  %4985 = vst [vmem:[#allocation48_spill] sm:$0xff] %v3598_v63  ;;  %v3612_v12 = vsub.f32 %v406_v31, %v3598_v63  ;;  %v313_v31 = vsel %vm248_vm0, %v195_v10, 0  ;;  %v4831_v55 = vand.u32 4294901760, %v3623_v20 }
  0xac   : > { %v1156_v24 = vpop.f32.mrf.mxu3  ;;  %4991 = vst [vmem:[#allocation54_spill] sm:$0xff] %v3623_v20 }
  0xad   : > { %v3600_v29 = vadd.f32 %v1156_v24, %v734_v50  ;;  %4989 = vst [vmem:[#allocation52_spill] sm:$0xff] %v3612_v12  ;;  %v409_v50 = vsel %vm248_vm0, %v227_v35, 0  ;;  %v4826_v35 = vand.u32 4294901760, %v3612_v12 }
  0xae   : > { %v3606_v43 = vpop.f32.mrf.mxu0 }
  0xaf   : > { %4986 = vst [vmem:[#allocation49_spill] sm:$0xff] %v3600_v29  ;;  %868 = vmatmul.f32.gmra.mxu2 %v867_v16  ;;  %v618_v16 = vsub.f32 %v3592_v30, %v4821_v58  ;;  %v228_v30 = vld [vmem:[%s3061_s30 + $0x1b0] sm:$0xff]  ;;  %v882_v46 = vsub.f32 %v3612_v12, %v4826_v35 }
  0xb0   : > { %4988 = vst [vmem:[#allocation51_spill] sm:$0xff] %v3606_v43  ;;  %v3615_v8 = vpop.f32.mrf.mxu1 }
  0xb1   : > { %4990 = vst [vmem:[#allocation53_spill] sm:$0xff] %v3615_v8  ;;  %1223 = vmatmul.f32.gmra.mxu3 %v3533_v60  ;;  %612 = vmatmul.f32.gmra.mxu0 %v611_v26  ;;  %v3629_v60 = vand.u32 4294901760, %v409_v50  ;;  %v619_v58 = vand.u32 4294901760, %v618_v16  ;;  %v3635_v8 = vand.u32 4294901760, %v313_v31  ;;  %v883_v12 = vand.u32 4294901760, %v882_v46 }
  0xb2   : > { %v741_v24 = vpop.f32.mrf.mxu2 }
  0xb3   : > { %v742_v59 = vadd.f32 %v3544_v39, %v741_v24  ;;  %1095 = vmatmul.f32.gmra.mxu1 %v3537_v41  ;;  %4992 = vst [vmem:[#allocation55_spill] sm:$0xff] %v3629_v60  ;;  %v3643_v24 = vsub.f32 %v409_v50, %v3629_v60  ;;  %v196_v41 = vld [vmem:[%s3061_s30 + $0xb0] sm:$0xff]  ;;  %v3654_v16 = vsub.f32 %v313_v31, %v3635_v8 }
  0xb4   : > { %v1160_v26 = vpop.f32.mrf.mxu3  ;;  %4994 = vst [vmem:[#allocation57_spill] sm:$0xff] %v3635_v8  ;;  %v316_v50 = vsel %vm248_vm0, %v196_v41, 0 }
  0xb5   : > { %v3631_v29 = vadd.f32 %v1160_v26, %v742_v59  ;;  %4996 = vst [vmem:[#allocation59_spill] sm:$0xff] %v3643_v24  ;;  %v412_v59 = vsel %vm248_vm0, %v228_v30, 0  ;;  %v4836_v30 = vand.u32 4294901760, %v3643_v24  ;;  %v4841_v31 = vand.u32 4294901760, %v3654_v16 }
  0xb6   : > { %v3637_v10 = vpop.f32.mrf.mxu0  ;;  %4998 = vst [vmem:[#allocation61_spill] sm:$0xff] %v3654_v16 }
  0xb7   : > { %4993 = vst [vmem:[#allocation56_spill] sm:$0xff] %v3631_v29  ;;  %876 = vmatmul.f32.gmra.mxu2 %v875_v15  ;;  %v626_v15 = vsub.f32 %v3623_v20, %v4831_v55  ;;  %v229_v20 = vld [vmem:[%s3061_s30 + $0x1b8] sm:$0xff]  ;;  %v890_v46 = vsub.f32 %v3643_v24, %v4836_v30 }
  0xb8   : > { %4995 = vst [vmem:[#allocation58_spill] sm:$0xff] %v3637_v10  ;;  %v3646_v43 = vpop.f32.mrf.mxu1 }
  0xb9   : > { %4997 = vst [vmem:[#allocation60_spill] sm:$0xff] %v3646_v43  ;;  %1227 = vmatmul.f32.gmra.mxu3 %v3567_v13  ;;  %620 = vmatmul.f32.gmra.mxu0 %v619_v58  ;;  %v3660_v13 = vand.u32 4294901760, %v412_v59  ;;  %v627_v55 = vand.u32 4294901760, %v626_v15  ;;  %v3666_v43 = vand.u32 4294901760, %v316_v50  ;;  %v891_v24 = vand.u32 4294901760, %v890_v46 }
  0xba   : > { %v749_v26 = vpop.f32.mrf.mxu2 }
  0xbb   : > { %v750_v35 = vadd.f32 %v3544_v39, %v749_v26  ;;  %1099 = vmatmul.f32.gmra.mxu1 %v3573_v7  ;;  %4999 = vst [vmem:[#allocation62_spill] sm:$0xff] %v3660_v13  ;;  %v3674_v26 = vsub.f32 %v412_v59, %v3660_v13  ;;  %v197_v7 = vld [vmem:[%s3061_s30 + $0xb8] sm:$0xff]  ;;  %v3685_v15 = vsub.f32 %v316_v50, %v3666_v43 }
  0xbc   : > { %v1164_v58 = vpop.f32.mrf.mxu3  ;;  %5001 = vst [vmem:[#allocation64_spill] sm:$0xff] %v3666_v43  ;;  %v319_v59 = vsel %vm248_vm0, %v197_v7, 0 }
  0xbd   : > { %v3662_v29 = vadd.f32 %v1164_v58, %v750_v35  ;;  %5003 = vst [vmem:[#allocation66_spill] sm:$0xff] %v3674_v26  ;;  %v415_v35 = vsel %vm248_vm0, %v229_v20, 0  ;;  %v4846_v20 = vand.u32 4294901760, %v3674_v26  ;;  %v4851_v50 = vand.u32 4294901760, %v3685_v15 }
  0xbe   : > { %v3668_v41 = vpop.f32.mrf.mxu0  ;;  %5005 = vst [vmem:[#allocation68_spill] sm:$0xff] %v3685_v15 }
  0xbf   : > { %5000 = vst [vmem:[#allocation63_spill] sm:$0xff] %v3662_v29  ;;  %884 = vmatmul.f32.gmra.mxu2 %v883_v12  ;;  %v634_v12 = vsub.f32 %v3654_v16, %v4841_v31  ;;  %v230_v16 = vld [vmem:[%s3061_s30 + $0x1c0] sm:$0xff]  ;;  %v898_v46 = vsub.f32 %v3674_v26, %v4846_v20 }
  0xc0   : > { %5002 = vst [vmem:[#allocation65_spill] sm:$0xff] %v3668_v41  ;;  %v3677_v10 = vpop.f32.mrf.mxu1 }
  0xc1   : > { %5004 = vst [vmem:[#allocation67_spill] sm:$0xff] %v3677_v10  ;;  %1231 = vmatmul.f32.gmra.mxu3 %v3598_v63  ;;  %628 = vmatmul.f32.gmra.mxu0 %v627_v55  ;;  %v3691_v63 = vand.u32 4294901760, %v415_v35  ;;  %v635_v31 = vand.u32 4294901760, %v634_v12  ;;  %v3697_v10 = vand.u32 4294901760, %v319_v59  ;;  %v899_v26 = vand.u32 4294901760, %v898_v46 }
  0xc2   : > { %v757_v58 = vpop.f32.mrf.mxu2 }
  0xc3   : > { %v758_v30 = vadd.f32 %v3544_v39, %v757_v58  ;;  %1103 = vmatmul.f32.gmra.mxu1 %v3604_v42  ;;  %5006 = vst [vmem:[#allocation69_spill] sm:$0xff] %v3691_v63  ;;  %v3705_v58 = vsub.f32 %v415_v35, %v3691_v63  ;;  %v198_v42 = vld [vmem:[%s3061_s30 + $0xc0] sm:$0xff]  ;;  %v3716_v12 = vsub.f32 %v319_v59, %v3697_v10 }
  0xc4   : > { %v1168_v55 = vpop.f32.mrf.mxu3  ;;  %5008 = vst [vmem:[#allocation71_spill] sm:$0xff] %v3697_v10  ;;  %v322_v35 = vsel %vm248_vm0, %v198_v42, 0 }
  0xc5   : > { %v3693_v29 = vadd.f32 %v1168_v55, %v758_v30  ;;  %5010 = vst [vmem:[#allocation73_spill] sm:$0xff] %v3705_v58  ;;  %v418_v30 = vsel %vm248_vm0, %v230_v16, 0  ;;  %v4856_v16 = vand.u32 4294901760, %v3705_v58  ;;  %v4861_v59 = vand.u32 4294901760, %v3716_v12 }
  0xc6   : > { %v3699_v7 = vpop.f32.mrf.mxu0  ;;  %5012 = vst [vmem:[#allocation75_spill] sm:$0xff] %v3716_v12 }
  0xc7   : > { %5007 = vst [vmem:[#allocation70_spill] sm:$0xff] %v3693_v29  ;;  %892 = vmatmul.f32.gmra.mxu2 %v891_v24  ;;  %v642_v24 = vsub.f32 %v3685_v15, %v4851_v50  ;;  %v231_v15 = vld [vmem:[%s3061_s30 + $0x1c8] sm:$0xff]  ;;  %v906_v46 = vsub.f32 %v3705_v58, %v4856_v16 }
  0xc8   : > { %5009 = vst [vmem:[#allocation72_spill] sm:$0xff] %v3699_v7  ;;  %v3708_v41 = vpop.f32.mrf.mxu1 }
  0xc9   : > { %5011 = vst [vmem:[#allocation74_spill] sm:$0xff] %v3708_v41  ;;  %1235 = vmatmul.f32.gmra.mxu3 %v3629_v60  ;;  %636 = vmatmul.f32.gmra.mxu0 %v635_v31  ;;  %v3722_v60 = vand.u32 4294901760, %v418_v30  ;;  %v643_v50 = vand.u32 4294901760, %v642_v24  ;;  %v3728_v41 = vand.u32 4294901760, %v322_v35  ;;  %v907_v58 = vand.u32 4294901760, %v906_v46 }
  0xca   : > { %v765_v55 = vpop.f32.mrf.mxu2 }
  0xcb   : > { %v766_v20 = vadd.f32 %v3544_v39, %v765_v55  ;;  %1107 = vmatmul.f32.gmra.mxu1 %v3635_v8  ;;  %5013 = vst [vmem:[#allocation76_spill] sm:$0xff] %v3722_v60  ;;  %v3736_v55 = vsub.f32 %v418_v30, %v3722_v60  ;;  %v199_v8 = vld [vmem:[%s3061_s30 + $0xc8] sm:$0xff]  ;;  %v3747_v24 = vsub.f32 %v322_v35, %v3728_v41 }
  0xcc   : > { %v1172_v31 = vpop.f32.mrf.mxu3  ;;  %5015 = vst [vmem:[#allocation78_spill] sm:$0xff] %v3728_v41  ;;  %v325_v30 = vsel %vm248_vm0, %v199_v8, 0 }
  0xcd   : > { %v3724_v29 = vadd.f32 %v1172_v31, %v766_v20  ;;  %5017 = vst [vmem:[#allocation80_spill] sm:$0xff] %v3736_v55  ;;  %v421_v20 = vsel %vm248_vm0, %v231_v15, 0  ;;  %v4866_v15 = vand.u32 4294901760, %v3736_v55  ;;  %v4871_v35 = vand.u32 4294901760, %v3747_v24 }
  0xce   : > { %v3730_v42 = vpop.f32.mrf.mxu0  ;;  %5019 = vst [vmem:[#allocation82_spill] sm:$0xff] %v3747_v24 }
  0xcf   : > { %5014 = vst [vmem:[#allocation77_spill] sm:$0xff] %v3724_v29  ;;  %900 = vmatmul.f32.gmra.mxu2 %v899_v26  ;;  %v650_v26 = vsub.f32 %v3716_v12, %v4861_v59  ;;  %v232_v12 = vld [vmem:[%s3061_s30 + $0x1d0] sm:$0xff]  ;;  %v914_v46 = vsub.f32 %v3736_v55, %v4866_v15 }
  0xd0   : > { %5016 = vst [vmem:[#allocation79_spill] sm:$0xff] %v3730_v42  ;;  %v3739_v7 = vpop.f32.mrf.mxu1 }
  0xd1   : > { %5018 = vst [vmem:[#allocation81_spill] sm:$0xff] %v3739_v7  ;;  %1239 = vmatmul.f32.gmra.mxu3 %v3660_v13  ;;  %644 = vmatmul.f32.gmra.mxu0 %v643_v50  ;;  %v3753_v13 = vand.u32 4294901760, %v421_v20  ;;  %v651_v59 = vand.u32 4294901760, %v650_v26  ;;  %v3759_v7 = vand.u32 4294901760, %v325_v30  ;;  %v915_v55 = vand.u32 4294901760, %v914_v46 }
  0xd2   : > { %v773_v31 = vpop.f32.mrf.mxu2 }
  0xd3   : > { %v774_v16 = vadd.f32 %v3544_v39, %v773_v31  ;;  %1111 = vmatmul.f32.gmra.mxu1 %v3666_v43  ;;  %5020 = vst [vmem:[#allocation83_spill] sm:$0xff] %v3753_v13  ;;  %v3767_v31 = vsub.f32 %v421_v20, %v3753_v13  ;;  %v200_v43 = vld [vmem:[%s3061_s30 + $0xd0] sm:$0xff]  ;;  %v3778_v26 = vsub.f32 %v325_v30, %v3759_v7 }
  0xd4   : > { %v1176_v50 = vpop.f32.mrf.mxu3  ;;  %5022 = vst [vmem:[#allocation85_spill] sm:$0xff] %v3759_v7  ;;  %v328_v20 = vsel %vm248_vm0, %v200_v43, 0 }
  0xd5   : > { %v3755_v29 = vadd.f32 %v1176_v50, %v774_v16  ;;  %5024 = vst [vmem:[#allocation87_spill] sm:$0xff] %v3767_v31  ;;  %v424_v16 = vsel %vm248_vm0, %v232_v12, 0  ;;  %v4876_v12 = vand.u32 4294901760, %v3767_v31  ;;  %v4881_v30 = vand.u32 4294901760, %v3778_v26 }
  0xd6   : > { %v3761_v8 = vpop.f32.mrf.mxu0  ;;  %5026 = vst [vmem:[#allocation89_spill] sm:$0xff] %v3778_v26 }
  0xd7   : > { %5021 = vst [vmem:[#allocation84_spill] sm:$0xff] %v3755_v29  ;;  %908 = vmatmul.f32.gmra.mxu2 %v907_v58  ;;  %v658_v58 = vsub.f32 %v3747_v24, %v4871_v35  ;;  %v233_v24 = vld [vmem:[%s3061_s30 + $0x1d8] sm:$0xff]  ;;  %v922_v46 = vsub.f32 %v3767_v31, %v4876_v12 }
  0xd8   : > { %5023 = vst [vmem:[#allocation86_spill] sm:$0xff] %v3761_v8  ;;  %v3770_v42 = vpop.f32.mrf.mxu1 }
  0xd9   : > { %5025 = vst [vmem:[#allocation88_spill] sm:$0xff] %v3770_v42  ;;  %1243 = vmatmul.f32.gmra.mxu3 %v3691_v63  ;;  %652 = vmatmul.f32.gmra.mxu0 %v651_v59  ;;  %v3784_v63 = vand.u32 4294901760, %v424_v16  ;;  %v659_v35 = vand.u32 4294901760, %v658_v58  ;;  %v3790_v42 = vand.u32 4294901760, %v328_v20  ;;  %v923_v31 = vand.u32 4294901760, %v922_v46 }
  0xda   : > { %v781_v50 = vpop.f32.mrf.mxu2 }
  0xdb   : > { %v782_v15 = vadd.f32 %v3544_v39, %v781_v50  ;;  %1115 = vmatmul.f32.gmra.mxu1 %v3697_v10  ;;  %5027 = vst [vmem:[#allocation90_spill] sm:$0xff] %v3784_v63  ;;  %v3798_v50 = vsub.f32 %v424_v16, %v3784_v63  ;;  %v201_v10 = vld [vmem:[%s3061_s30 + $0xd8] sm:$0xff]  ;;  %v3809_v58 = vsub.f32 %v328_v20, %v3790_v42 }
  0xdc   : > { %v1180_v59 = vpop.f32.mrf.mxu3  ;;  %5029 = vst [vmem:[#allocation92_spill] sm:$0xff] %v3790_v42  ;;  %v331_v16 = vsel %vm248_vm0, %v201_v10, 0 }
  0xdd   : > { %v3786_v29 = vadd.f32 %v1180_v59, %v782_v15  ;;  %5031 = vst [vmem:[#allocation94_spill] sm:$0xff] %v3798_v50  ;;  %v427_v15 = vsel %vm248_vm0, %v233_v24, 0  ;;  %v4886_v24 = vand.u32 4294901760, %v3798_v50  ;;  %v4891_v20 = vand.u32 4294901760, %v3809_v58 }
  0xde   : > { %v3792_v43 = vpop.f32.mrf.mxu0  ;;  %5033 = vst [vmem:[#allocation96_spill] sm:$0xff] %v3809_v58 }
  0xdf   : > { %5028 = vst [vmem:[#allocation91_spill] sm:$0xff] %v3786_v29  ;;  %916 = vmatmul.f32.gmra.mxu2 %v915_v55  ;;  %v666_v55 = vsub.f32 %v3778_v26, %v4881_v30  ;;  %v234_v26 = vld [vmem:[%s3061_s30 + $0x1e0] sm:$0xff]  ;;  %v930_v46 = vsub.f32 %v3798_v50, %v4886_v24 }
  0xe0   : > { %5030 = vst [vmem:[#allocation93_spill] sm:$0xff] %v3792_v43  ;;  %v3801_v8 = vpop.f32.mrf.mxu1 }
  0xe1   : > { %5032 = vst [vmem:[#allocation95_spill] sm:$0xff] %v3801_v8  ;;  %1247 = vmatmul.f32.gmra.mxu3 %v3722_v60  ;;  %660 = vmatmul.f32.gmra.mxu0 %v659_v35  ;;  %v3815_v60 = vand.u32 4294901760, %v427_v15  ;;  %v667_v30 = vand.u32 4294901760, %v666_v55  ;;  %v3821_v8 = vand.u32 4294901760, %v331_v16  ;;  %v931_v50 = vand.u32 4294901760, %v930_v46 }
  0xe2   : > { %v789_v59 = vpop.f32.mrf.mxu2 }
  0xe3   : > { %v790_v12 = vadd.f32 %v3544_v39, %v789_v59  ;;  %1119 = vmatmul.f32.gmra.mxu1 %v3728_v41  ;;  %5034 = vst [vmem:[#allocation97_spill] sm:$0xff] %v3815_v60  ;;  %v3829_v59 = vsub.f32 %v427_v15, %v3815_v60  ;;  %v202_v41 = vld [vmem:[%s3061_s30 + $0xe0] sm:$0xff]  ;;  %v3840_v55 = vsub.f32 %v331_v16, %v3821_v8 }
  0xe4   : > { %v1184_v35 = vpop.f32.mrf.mxu3  ;;  %5036 = vst [vmem:[#allocation99_spill] sm:$0xff] %v3821_v8  ;;  %v334_v15 = vsel %vm248_vm0, %v202_v41, 0 }
  0xe5   : > { %v3817_v29 = vadd.f32 %v1184_v35, %v790_v12  ;;  %5038 = vst [vmem:[#allocation101_spill] sm:$0xff] %v3829_v59  ;;  %v430_v12 = vsel %vm248_vm0, %v234_v26, 0  ;;  %v4896_v26 = vand.u32 4294901760, %v3829_v59  ;;  %v4901_v16 = vand.u32 4294901760, %v3840_v55 }
  0xe6   : > { %v3823_v10 = vpop.f32.mrf.mxu0  ;;  %5040 = vst [vmem:[#allocation103_spill] sm:$0xff] %v3840_v55 }
  0xe7   : > { %5035 = vst [vmem:[#allocation98_spill] sm:$0xff] %v3817_v29  ;;  %924 = vmatmul.f32.gmra.mxu2 %v923_v31  ;;  %v674_v31 = vsub.f32 %v3809_v58, %v4891_v20  ;;  %v235_v58 = vld [vmem:[%s3061_s30 + $0x1e8] sm:$0xff]  ;;  %v938_v46 = vsub.f32 %v3829_v59, %v4896_v26 }
  0xe8   : > { %5037 = vst [vmem:[#allocation100_spill] sm:$0xff] %v3823_v10  ;;  %v3832_v43 = vpop.f32.mrf.mxu1 }
  0xe9   : > { %5039 = vst [vmem:[#allocation102_spill] sm:$0xff] %v3832_v43  ;;  %1251 = vmatmul.f32.gmra.mxu3 %v3753_v13  ;;  %668 = vmatmul.f32.gmra.mxu0 %v667_v30  ;;  %v3846_v13 = vand.u32 4294901760, %v430_v12  ;;  %v675_v20 = vand.u32 4294901760, %v674_v31  ;;  %v3852_v43 = vand.u32 4294901760, %v334_v15  ;;  %v939_v59 = vand.u32 4294901760, %v938_v46 }
  0xea   : > { %v797_v35 = vpop.f32.mrf.mxu2 }
  0xeb   : > { %v798_v24 = vadd.f32 %v3544_v39, %v797_v35  ;;  %1123 = vmatmul.f32.gmra.mxu1 %v3759_v7  ;;  %5041 = vst [vmem:[#allocation104_spill] sm:$0xff] %v3846_v13  ;;  %v3860_v35 = vsub.f32 %v430_v12, %v3846_v13  ;;  %v203_v7 = vld [vmem:[%s3061_s30 + $0xe8] sm:$0xff]  ;;  %v3871_v31 = vsub.f32 %v334_v15, %v3852_v43 }
  0xec   : > { %v1188_v30 = vpop.f32.mrf.mxu3  ;;  %v337_v12 = vsel %vm248_vm0, %v203_v7, 0 }
  0xed   : > { %v3848_v29 = vadd.f32 %v1188_v30, %v798_v24  ;;  %5044 = vst [vmem:[#allocation107_spill] sm:$0xff] %v3860_v35  ;;  %v433_v24 = vsel %vm248_vm0, %v235_v58, 0  ;;  %v4906_v58 = vand.u32 4294901760, %v3860_v35  ;;  %v4911_v15 = vand.u32 4294901760, %v3871_v31 }
  0xee   : > { %v3854_v41 = vpop.f32.mrf.mxu0  ;;  %5046 = vst [vmem:[#allocation109_spill] sm:$0xff] %v3871_v31 }
  0xef   : > { %5042 = vst [vmem:[#allocation105_spill] sm:$0xff] %v3848_v29  ;;  %932 = vmatmul.f32.gmra.mxu2 %v931_v50  ;;  %v682_v50 = vsub.f32 %v3840_v55, %v4901_v16  ;;  %v236_v55 = vld [vmem:[%s3061_s30 + $0x1f0] sm:$0xff]  ;;  %v946_v46 = vsub.f32 %v3860_v35, %v4906_v58 }
  0xf0   : > { %5043 = vst [vmem:[#allocation106_spill] sm:$0xff] %v3854_v41  ;;  %v3863_v10 = vpop.f32.mrf.mxu1 }
  0xf1   : > { %5045 = vst [vmem:[#allocation108_spill] sm:$0xff] %v3863_v10  ;;  %1255 = vmatmul.f32.gmra.mxu3 %v3784_v63  ;;  %676 = vmatmul.f32.gmra.mxu0 %v675_v20  ;;  %v3877_v63 = vand.u32 4294901760, %v433_v24  ;;  %v683_v16 = vand.u32 4294901760, %v682_v50  ;;  %v3883_v10 = vand.u32 4294901760, %v337_v12  ;;  %v947_v35 = vand.u32 4294901760, %v946_v46 }
  0xf2   : > { %v805_v30 = vpop.f32.mrf.mxu2 }
  0xf3   : > { %v806_v26 = vadd.f32 %v3544_v39, %v805_v30  ;;  %1127 = vmatmul.f32.gmra.mxu1 %v3790_v42  ;;  %5047 = vst [vmem:[#allocation110_spill] sm:$0xff] %v3877_v63  ;;  %v3891_v30 = vsub.f32 %v433_v24, %v3877_v63  ;;  %v204_v42 = vld [vmem:[%s3061_s30 + $0xf0] sm:$0xff]  ;;  %v3902_v50 = vsub.f32 %v337_v12, %v3883_v10 }
  0xf4   : > { %v1192_v20 = vpop.f32.mrf.mxu3  ;;  %v340_v24 = vsel %vm248_vm0, %v204_v42, 0 }
  0xf5   : > { %v3879_v29 = vadd.f32 %v1192_v20, %v806_v26  ;;  %5050 = vst [vmem:[#allocation113_spill] sm:$0xff] %v3891_v30  ;;  %v436_v26 = vsel %vm248_vm0, %v236_v55, 0  ;;  %v4916_v55 = vand.u32 4294901760, %v3891_v30  ;;  %v4921_v12 = vand.u32 4294901760, %v3902_v50 }
  0xf6   : > { %v3885_v7 = vpop.f32.mrf.mxu0  ;;  %5052 = vst [vmem:[#allocation115_spill] sm:$0xff] %v3902_v50 }
  0xf7   : > { %5048 = vst [vmem:[#allocation111_spill] sm:$0xff] %v3879_v29  ;;  %940 = vmatmul.f32.gmra.mxu2 %v939_v59  ;;  %v690_v59 = vsub.f32 %v3871_v31, %v4911_v15  ;;  %v237_v31 = vld [vmem:[%s3061_s30 + $0x1f8] sm:$0xff]  ;;  %v954_v46 = vsub.f32 %v3891_v30, %v4916_v55 }
  0xf8   : > { %5049 = vst [vmem:[#allocation112_spill] sm:$0xff] %v3885_v7  ;;  %v3894_v41 = vpop.f32.mrf.mxu1 }
  0xf9   : > { %5051 = vst [vmem:[#allocation114_spill] sm:$0xff] %v3894_v41  ;;  %1259 = vmatmul.f32.gmra.mxu3 %v3815_v60  ;;  %684 = vmatmul.f32.gmra.mxu0 %v683_v16  ;;  %v3908_v60 = vand.u32 4294901760, %v436_v26  ;;  %v691_v15 = vand.u32 4294901760, %v690_v59  ;;  %v3914_v41 = vand.u32 4294901760, %v340_v24  ;;  %v698_v59 = vsub.f32 %v3902_v50, %v4921_v12 }
  0xfa   : > { %v813_v20 = vpop.f32.mrf.mxu2  ;;  %v955_v30 = vand.u32 4294901760, %v954_v46 }
  0xfb   : > { %v814_v58 = vadd.f32 %v3544_v39, %v813_v20  ;;  %1131 = vmatmul.f32.gmra.mxu1 %v3821_v8  ;;  %5053 = vst [vmem:[#allocation116_spill] sm:$0xff] %v3908_v60  ;;  %v3922_v20 = vsub.f32 %v436_v26, %v3908_v60  ;;  %v205_v8 = vld [vmem:[%s3061_s30 + $0xf8] sm:$0xff] }
  0xfc   : > { %v1196_v16 = vpop.f32.mrf.mxu3  ;;  %v343_v55 = vsel %vm248_vm0, %v205_v8, 0 }
  0xfd   : > { %v3910_v29 = vadd.f32 %v1196_v16, %v814_v58  ;;  %5055 = vst [vmem:[#allocation118_spill] sm:$0xff] %v3922_v20  ;;  %v439_v58 = vsel %vm248_vm0, %v237_v31, 0  ;;  %v4924_v31 = vand.u32 4294901760, %v3922_v20 }
  0xfe   : > { %v3916_v42 = vpop.f32.mrf.mxu0 }
  0xff   : > { %5054 = vst [vmem:[#allocation117_spill] sm:$0xff] %v3910_v29  ;;  %948 = vmatmul.f32.gmra.mxu2 %v947_v35  ;;  %v3933_v35 = vsub.f32 %v340_v24, %v3914_v41  ;;  %v3939_v29 = vand.u32 4294901760, %v439_v58  ;;  %v3944_v24 = vand.u32 4294901760, %v343_v55  ;;  %v962_v8 = vsub.f32 %v3922_v20, %v4924_v31 }
 0x100   : > { %v3925_v7 = vpop.f32.mrf.mxu1 }
 0x101   : > { %5056 = vst [vmem:[#allocation119_spill] sm:$0xff] %v3925_v7  ;;  %1263 = vmatmul.f32.gmra.mxu3 %v3846_v13  ;;  %692 = vmatmul.f32.gmra.mxu0 %v691_v15  ;;  %v699_v7 = vand.u32 4294901760, %v698_v59  ;;  %v4929_v12 = vand.u32 4294901760, %v3933_v35  ;;  %v3952_v46 = vsub.f32 %v439_v58, %v3939_v29 }
 0x102   : > { %v821_v16 = vpop.f32.mrf.mxu2  ;;  %5057 = vst [vmem:[#allocation120_spill] sm:$0xff] %v3939_v29 }
 0x103   : > { %v822_v26 = vadd.f32 %v3544_v39, %v821_v16  ;;  %1135 = vmatmul.f32.gmra.mxu1 %v3852_v43  ;;  %5059 = vst [vmem:[#allocation122_spill] sm:$0xff] %v3952_v46  ;;  %v706_v59 = vsub.f32 %v3933_v35, %v4929_v12  ;;  %v4930_v58 = vand.u32 4294901760, %v3952_v46 }
 0x104   : > { %v1200_v15 = vpop.f32.mrf.mxu3 }
 0x105   : > { %v3941_v13 = vadd.f32 %v1200_v15, %v822_v26  ;;  %v3961_v26 = vsub.f32 %v343_v55, %v3944_v24  ;;  %v970_v55 = vsub.f32 %v3952_v46, %v4930_v58 }
 0x106   : > { %v3946_v50 = vpop.f32.mrf.mxu0 }
 0x107   : > { %5058 = vst [vmem:[#allocation121_spill] sm:$0xff] %v3941_v13  ;;  %956 = vmatmul.f32.gmra.mxu2 %v955_v30  ;;  %v963_v13 = vand.u32 4294901760, %v962_v8 }
 0x108   : > { %v3954_v16 = vpop.f32.mrf.mxu1 }
 0x109   : > { %5060 = vst [vmem:[#allocation123_spill] sm:$0xff] %v3954_v16  ;;  %1267 = vmatmul.f32.gmra.mxu3 %v3877_v63  ;;  %700 = vmatmul.f32.gmra.mxu0 %v699_v7  ;;  %v707_v63 = vand.u32 4294901760, %v706_v59  ;;  %v4933_v7 = vand.u32 4294901760, %v3961_v26 }
 0x10a   : > { %v829_v30 = vpop.f32.mrf.mxu2 }
 0x10b   : > { %v830_v15 = vadd.f32 %v3544_v39, %v829_v30  ;;  %1139 = vmatmul.f32.gmra.mxu1 %v3883_v10  ;;  %v971_v30 = vand.u32 4294901760, %v970_v55 }
 0x10c   : > { %v1204_v31 = vpop.f32.mrf.mxu3 }
 0x10d   : > { %v3966_v20 = vadd.f32 %v1204_v31, %v830_v15  ;;  %v714_v31 = vsub.f32 %v3961_v26, %v4933_v7 }
 0x10e   : > { %v3969_v16 = vpop.f32.mrf.mxu0 }
 0x10f   : > { %5061 = vst [vmem:[#allocation124_spill] sm:$0xff] %v3966_v20  ;;  %964 = vmatmul.f32.gmra.mxu2 %v963_v13  ;;  %v715_v20 = vand.u32 4294901760, %v714_v31 }
 0x110   : > { %v3974_v12 = vpop.f32.mrf.mxu1 }
 0x111   : > { %1271 = vmatmul.f32.gmra.mxu3 %v3908_v60  ;;  %708 = vmatmul.f32.gmra.mxu0 %v707_v63 }
 0x112   : > { %v837_v8 = vpop.f32.mrf.mxu2 }
 0x113   : > { %v838_v59 = vadd.f32 %v3544_v39, %v837_v8  ;;  %1143 = vmatmul.f32.gmra.mxu1 %v3914_v41 }
 0x114   : > { %v1208_v13 = vpop.f32.mrf.mxu3 }
 0x115   : > { %v3982_v15 = vadd.f32 %v1208_v13, %v838_v59  ;;  %v5064_v59 = vand.u32 4294901760, %v3107_v52 }
 0x116   : > { %v3984_v58 = vpop.f32.mrf.mxu0 }
 0x117   : > { %5062 = vst [vmem:[#allocation125_spill] sm:$0xff] %v3982_v15  ;;  %972 = vmatmul.f32.gmra.mxu2 %v971_v30 }
 0x118   : > { %v3986_v46 = vpop.f32.mrf.mxu1 }
 0x119   : > { %1275 = vmatmul.f32.gmra.mxu3 %v3939_v29  ;;  %716 = vmatmul.f32.gmra.mxu0 %v715_v20 }
 0x11a   : > { %v845_v63 = vpop.f32.mrf.mxu2 }
 0x11b   : > { %v846_v7 = vadd.f32 %v3544_v39, %v845_v63  ;;  %1147 = vmatmul.f32.gmra.mxu1 %v3944_v24 }
 0x11c   : > { %v1212_v55 = vpop.f32.mrf.mxu3 }
 0x11d   : > { %v3991_v8 = vadd.f32 %v1212_v55, %v846_v7 }
 0x11e   : > { %v3993_v60 = vpop.f32.mrf.mxu0 }
 0x11f   : > { %5063 = vst [vmem:[#allocation126_spill] sm:$0xff] %v3991_v8  ;;  %1309 = vmatmul.f32.vlgmr.msrb.gmra.mxu2 %v3107_v52  ;;  %v5066_v8 = vand.u32 4294901760, %v3111_v54 }
 0x120   : > { %v3996_v31 = vpop.f32.mrf.mxu1 }
 0x121   : > { %1653 = vmatmul.f32.vlgmr.msrb.gmra.mxu3 %v5064_v59  ;;  %2070 = vmatmul.f32.vlgmr.msrb.gmra.mxu0 %v3091_v44 }
 0x122   : > { %v853_v20 = vpop.f32.mrf.mxu2 }
 0x123   : > { %v854_v30 = vadd.f32 %v3544_v39, %v853_v20  ;;  %2349 = vmatmul.f32.vlgmr.msrb.gmra.mxu1 %v3091_v44 }
 0x124   : > { %v1216_v13 = vpop.f32.mrf.mxu3 }
 0x125   : > { %v4003_v63 = vadd.f32 %v1216_v13, %v854_v30 }
 0x126   : > { %v4005_v7 = vpop.f32.mrf.mxu0 }
 0x127   : > { %5065 = vst [vmem:[#allocation127_spill] sm:$0xff] %v4003_v63  ;;  %1314 = vmatmul.f32.gmra.mxu2 %v3111_v54  ;;  %v5068_v63 = vand.u32 4294901760, %v3147_v18 }
 0x128   : > { %v4008_v55 = vpop.f32.mrf.mxu1 }
 0x129   : > { %1659 = vmatmul.f32.gmra.mxu3 %v5066_v8  ;;  %2074 = vmatmul.f32.gmra.mxu0 %v3099_v49 }
 0x12a   : > { %v861_v52 = vpop.f32.mrf.mxu2 }
 0x12b   : > { %v862_v59 = vadd.f32 %v3544_v39, %v861_v52  ;;  %2353 = vmatmul.f32.gmra.mxu1 %v3099_v49 }
 0x12c   : > { %v1220_v44 = vpop.f32.mrf.mxu3 }
 0x12d   : > { %v4015_v20 = vadd.f32 %v1220_v44, %v862_v59 }
 0x12e   : > { %v4017_v30 = vpop.f32.mrf.mxu0 }
 0x12f   : > { %5067 = vst [vmem:[#allocation128_spill] sm:$0xff] %v4015_v20  ;;  %1319 = vmatmul.f32.gmra.mxu2 %v3147_v18  ;;  %v5070_v20 = vand.u32 4294901760, %v3184_v21 }
 0x130   : > { %v4020_v13 = vpop.f32.mrf.mxu1 }
 0x131   : > { %1665 = vmatmul.f32.gmra.mxu3 %v5068_v63  ;;  %2078 = vmatmul.f32.gmra.mxu0 %v3127_v1 }
 0x132   : > { %v869_v54 = vpop.f32.mrf.mxu2 }
 0x133   : > { %v870_v8 = vadd.f32 %v3544_v39, %v869_v54  ;;  %2357 = vmatmul.f32.gmra.mxu1 %v3127_v1 }
 0x134   : > { %v1224_v49 = vpop.f32.mrf.mxu3 }
 0x135   : > { %v4027_v52 = vadd.f32 %v1224_v49, %v870_v8 }
 0x136   : > { %v4029_v59 = vpop.f32.mrf.mxu0 }
 0x137   : > { %5069 = vst [vmem:[#allocation129_spill] sm:$0xff] %v4027_v52  ;;  %1324 = vmatmul.f32.gmra.mxu2 %v3184_v21  ;;  %v5072_v52 = vand.u32 4294901760, %v3216_v17 }
 0x138   : > { %v4032_v44 = vpop.f32.mrf.mxu1 }
 0x139   : > { %1671 = vmatmul.f32.gmra.mxu3 %v5070_v20  ;;  %2082 = vmatmul.f32.gmra.mxu0 %v3160_v28 }
 0x13a   : > { %v877_v18 = vpop.f32.mrf.mxu2 }
 0x13b   : > { %v878_v63 = vadd.f32 %v3544_v39, %v877_v18  ;;  %2361 = vmatmul.f32.gmra.mxu1 %v3160_v28 }
 0x13c   : > { %v1228_v1 = vpop.f32.mrf.mxu3 }
 0x13d   : > { %v4039_v54 = vadd.f32 %v1228_v1, %v878_v63 }
 0x13e   : > { %v4041_v8 = vpop.f32.mrf.mxu0 }
 0x13f   : > { %5071 = vst [vmem:[#allocation130_spill] sm:$0xff] %v4039_v54  ;;  %1329 = vmatmul.f32.gmra.mxu2 %v3216_v17  ;;  %v5074_v54 = vand.u32 4294901760, %v3240_v62 }
 0x140   : > { %v4044_v49 = vpop.f32.mrf.mxu1 }
 0x141   : > { %1677 = vmatmul.f32.gmra.mxu3 %v5072_v52  ;;  %2086 = vmatmul.f32.gmra.mxu0 %v3198_v34 }
 0x142   : > { %v885_v21 = vpop.f32.mrf.mxu2 }
 0x143   : > { %v886_v20 = vadd.f32 %v3544_v39, %v885_v21  ;;  %2365 = vmatmul.f32.gmra.mxu1 %v3198_v34 }
 0x144   : > { %v1232_v28 = vpop.f32.mrf.mxu3 }
 0x145   : > { %v4051_v18 = vadd.f32 %v1232_v28, %v886_v20 }
 0x146   : > { %v4053_v63 = vpop.f32.mrf.mxu0 }
 0x147   : > { %5073 = vst [vmem:[#allocation131_spill] sm:$0xff] %v4051_v18  ;;  %1334 = vmatmul.f32.gmra.mxu2 %v3240_v62  ;;  %v5076_v18 = vand.u32 4294901760, %v3264_v4 }
 0x148   : > { %v4056_v1 = vpop.f32.mrf.mxu1 }
 0x149   : > { %1683 = vmatmul.f32.gmra.mxu3 %v5074_v54  ;;  %2090 = vmatmul.f32.gmra.mxu0 %v3225_v48 }
 0x14a   : > { %v893_v17 = vpop.f32.mrf.mxu2 }
 0x14b   : > { %v894_v52 = vadd.f32 %v3544_v39, %v893_v17  ;;  %2369 = vmatmul.f32.gmra.mxu1 %v3225_v48 }
 0x14c   : > { %v1236_v34 = vpop.f32.mrf.mxu3 }
 0x14d   : > { %v4063_v21 = vadd.f32 %v1236_v34, %v894_v52 }
 0x14e   : > { %v4065_v20 = vpop.f32.mrf.mxu0 }
 0x14f   : > { %5075 = vst [vmem:[#allocation132_spill] sm:$0xff] %v4063_v21  ;;  %1339 = vmatmul.f32.gmra.mxu2 %v3264_v4  ;;  %v5078_v21 = vand.u32 4294901760, %v3288_v56 }
 0x150   : > { %v4068_v28 = vpop.f32.mrf.mxu1 }
 0x151   : > { %1689 = vmatmul.f32.gmra.mxu3 %v5076_v18  ;;  %2094 = vmatmul.f32.gmra.mxu0 %v3249_v23 }
 0x152   : > { %v901_v62 = vpop.f32.mrf.mxu2 }
 0x153   : > { %v902_v54 = vadd.f32 %v3544_v39, %v901_v62  ;;  %2373 = vmatmul.f32.gmra.mxu1 %v3249_v23 }
 0x154   : > { %v1240_v48 = vpop.f32.mrf.mxu3 }
 0x155   : > { %v4075_v17 = vadd.f32 %v1240_v48, %v902_v54 }
 0x156   : > { %v4077_v52 = vpop.f32.mrf.mxu0 }
 0x157   : > { %5077 = vst [vmem:[#allocation133_spill] sm:$0xff] %v4075_v17  ;;  %1344 = vmatmul.f32.gmra.mxu2 %v3288_v56  ;;  %v5080_v17 = vand.u32 4294901760, %v3312_v38 }
 0x158   : > { %v4080_v34 = vpop.f32.mrf.mxu1 }
 0x159   : > { %1695 = vmatmul.f32.gmra.mxu3 %v5078_v21  ;;  %2098 = vmatmul.f32.gmra.mxu0 %v3273_v11 }
 0x15a   : > { %v909_v4 = vpop.f32.mrf.mxu2 }
 0x15b   : > { %v910_v18 = vadd.f32 %v3544_v39, %v909_v4  ;;  %2377 = vmatmul.f32.gmra.mxu1 %v3273_v11 }
 0x15c   : > { %v1244_v23 = vpop.f32.mrf.mxu3 }
 0x15d   : > { %v4087_v62 = vadd.f32 %v1244_v23, %v910_v18 }
 0x15e   : > { %v4089_v54 = vpop.f32.mrf.mxu0 }
 0x15f   : > { %5079 = vst [vmem:[#allocation134_spill] sm:$0xff] %v4087_v62  ;;  %1349 = vmatmul.f32.gmra.mxu2 %v3312_v38  ;;  %v5082_v62 = vand.u32 4294901760, %v3336_v45 }
 0x160   : > { %v4092_v48 = vpop.f32.mrf.mxu1 }
 0x161   : > { %1701 = vmatmul.f32.gmra.mxu3 %v5080_v17  ;;  %2102 = vmatmul.f32.gmra.mxu0 %v3297_v3 }
 0x162   : > { %v917_v56 = vpop.f32.mrf.mxu2 }
 0x163   : > { %v918_v21 = vadd.f32 %v3544_v39, %v917_v56  ;;  %2381 = vmatmul.f32.gmra.mxu1 %v3297_v3 }
 0x164   : > { %v1248_v11 = vpop.f32.mrf.mxu3 }
 0x165   : > { %v4099_v4 = vadd.f32 %v1248_v11, %v918_v21 }
 0x166   : > { %v4101_v18 = vpop.f32.mrf.mxu0 }
 0x167   : > { %5081 = vst [vmem:[#allocation135_spill] sm:$0xff] %v4099_v4  ;;  %1354 = vmatmul.f32.gmra.mxu2 %v3336_v45  ;;  %v5084_v4 = vand.u32 4294901760, %v3360_v47 }
 0x168   : > { %v4104_v23 = vpop.f32.mrf.mxu1 }
 0x169   : > { %1707 = vmatmul.f32.gmra.mxu3 %v5082_v62  ;;  %2106 = vmatmul.f32.gmra.mxu0 %v3321_v0 }
 0x16a   : > { %v925_v38 = vpop.f32.mrf.mxu2 }
 0x16b   : > { %v926_v17 = vadd.f32 %v3544_v39, %v925_v38  ;;  %2385 = vmatmul.f32.gmra.mxu1 %v3321_v0 }
 0x16c   : > { %v1252_v3 = vpop.f32.mrf.mxu3 }
 0x16d   : > { %v4111_v56 = vadd.f32 %v1252_v3, %v926_v17 }
 0x16e   : > { %v4113_v21 = vpop.f32.mrf.mxu0 }
 0x16f   : > { %5083 = vst [vmem:[#allocation136_spill] sm:$0xff] %v4111_v56  ;;  %1359 = vmatmul.f32.gmra.mxu2 %v3360_v47  ;;  %v5086_v56 = vand.u32 4294901760, %v3384_v5 }
 0x170   : > { %v4116_v11 = vpop.f32.mrf.mxu1 }
 0x171   : > { %1713 = vmatmul.f32.gmra.mxu3 %v5084_v4  ;;  %2110 = vmatmul.f32.gmra.mxu0 %v3345_v14 }
 0x172   : > { %v933_v45 = vpop.f32.mrf.mxu2 }
 0x173   : > { %v934_v62 = vadd.f32 %v3544_v39, %v933_v45  ;;  %2389 = vmatmul.f32.gmra.mxu1 %v3345_v14 }
 0x174   : > { %v1256_v0 = vpop.f32.mrf.mxu3 }
 0x175   : > { %v4123_v38 = vadd.f32 %v1256_v0, %v934_v62 }
 0x176   : > { %v4125_v17 = vpop.f32.mrf.mxu0 }
 0x177   : > { %5085 = vst [vmem:[#allocation137_spill] sm:$0xff] %v4123_v38  ;;  %1364 = vmatmul.f32.gmra.mxu2 %v3384_v5  ;;  %v5088_v38 = vand.u32 4294901760, %v3408_v32 }
 0x178   : > { %v4128_v3 = vpop.f32.mrf.mxu1 }
 0x179   : > { %1719 = vmatmul.f32.gmra.mxu3 %v5086_v56  ;;  %2114 = vmatmul.f32.gmra.mxu0 %v3369_v37 }
 0x17a   : > { %v941_v47 = vpop.f32.mrf.mxu2 }
 0x17b   : > { %v942_v4 = vadd.f32 %v3544_v39, %v941_v47  ;;  %2393 = vmatmul.f32.gmra.mxu1 %v3369_v37 }
 0x17c   : > { %v1260_v14 = vpop.f32.mrf.mxu3 }
 0x17d   : > { %v4135_v45 = vadd.f32 %v1260_v14, %v942_v4 }
 0x17e   : > { %v4137_v62 = vpop.f32.mrf.mxu0 }
 0x17f   : > { %5087 = vst [vmem:[#allocation138_spill] sm:$0xff] %v4135_v45  ;;  %1369 = vmatmul.f32.gmra.mxu2 %v3408_v32  ;;  %v5090_v45 = vand.u32 4294901760, %v3432_v57 }
 0x180   : > { %v4140_v0 = vpop.f32.mrf.mxu1 }
 0x181   : > { %1725 = vmatmul.f32.gmra.mxu3 %v5088_v38  ;;  %2118 = vmatmul.f32.gmra.mxu0 %v3393_v25 }
 0x182   : > { %v949_v5 = vpop.f32.mrf.mxu2 }
 0x183   : > { %v950_v56 = vadd.f32 %v3544_v39, %v949_v5  ;;  %2397 = vmatmul.f32.gmra.mxu1 %v3393_v25 }
 0x184   : > { %v1264_v37 = vpop.f32.mrf.mxu3 }
 0x185   : > { %v4147_v47 = vadd.f32 %v1264_v37, %v950_v56 }
 0x186   : > { %v4149_v4 = vpop.f32.mrf.mxu0 }
 0x187   : > { %5089 = vst [vmem:[#allocation139_spill] sm:$0xff] %v4147_v47  ;;  %1374 = vmatmul.f32.gmra.mxu2 %v3432_v57  ;;  %v5092_v47 = vand.u32 4294901760, %v3456_v22 }
 0x188   : > { %v4152_v14 = vpop.f32.mrf.mxu1 }
 0x189   : > { %1731 = vmatmul.f32.gmra.mxu3 %v5090_v45  ;;  %2122 = vmatmul.f32.gmra.mxu0 %v3417_v40 }
 0x18a   : > { %v957_v32 = vpop.f32.mrf.mxu2 }
 0x18b   : > { %v958_v38 = vadd.f32 %v3544_v39, %v957_v32  ;;  %2401 = vmatmul.f32.gmra.mxu1 %v3417_v40 }
 0x18c   : > { %v1268_v25 = vpop.f32.mrf.mxu3 }
 0x18d   : > { %v4159_v5 = vadd.f32 %v1268_v25, %v958_v38 }
 0x18e   : > { %v4161_v56 = vpop.f32.mrf.mxu0 }
 0x18f   : > { %5091 = vst [vmem:[#allocation140_spill] sm:$0xff] %v4159_v5  ;;  %1379 = vmatmul.f32.gmra.mxu2 %v3456_v22  ;;  %v5095_v5 = vand.u32 4294901760, %v3480_v19 }
 0x190   : > { %v4164_v37 = vpop.f32.mrf.mxu1 }
 0x191   : > { %1737 = vmatmul.f32.gmra.mxu3 %v5092_v47  ;;  %2126 = vmatmul.f32.gmra.mxu0 %v3441_v53 }
 0x192   : > { %v965_v57 = vpop.f32.mrf.mxu2 }
 0x193   : > { %v966_v45 = vadd.f32 %v3544_v39, %v965_v57  ;;  %2405 = vmatmul.f32.gmra.mxu1 %v3441_v53  ;;  %v470_v57 = vadd.f32 %v3544_v39, %v3539_v6  ;;  %v4196_v6 = vld [vmem:[%s4699_s2] ss:$0 sm:$0xff] }
 0x194   : > { %v1272_v40 = vpop.f32.mrf.mxu3 }
 0x195   : > { %v4171_v32 = vadd.f32 %v1272_v40, %v966_v45 }
 0x196   : > { %v4173_v38 = vpop.f32.mrf.mxu0 }
 0x197   : > { %5093 = vst [vmem:[#allocation141_spill] sm:$0xff] %v4171_v32  ;;  %1384 = vmatmul.f32.gmra.mxu2 %v3480_v19  ;;  %v1025_v19 = vadd.f32 %v3553_v61, %v470_v57 }
 0x198   : > { %v4176_v25 = vpop.f32.mrf.mxu1 }
 0x199   : > { %5094 = vst [vmem:[#allocation142_spill] sm:$0xff] %v4176_v25  ;;  %1743 = vmatmul.f32.gmra.mxu3 %v5095_v5  ;;  %2130 = vmatmul.f32.gmra.mxu0 %v3465_v2  ;;  %v5097_v5 = vand.u32 4294901760, %v3504_v33 }
 0x19a   : > { %v973_v22 = vpop.f32.mrf.mxu2 }
 0x19b   : > { %v974_v47 = vadd.f32 %v3544_v39, %v973_v22  ;;  %2409 = vmatmul.f32.gmra.mxu1 %v3465_v2  ;;  %v478_v39 = vadd.f32 %v4196_v6, %v3575_v36 }
 0x19c   : > { %v1276_v53 = vpop.f32.mrf.mxu3 }
 0x19d   : > { %v4185_v45 = vadd.f32 %v1276_v53, %v974_v47  ;;  %v1029_v57 = vadd.f32 %v3584_v51, %v478_v39 }
 0x19e   : > { %v2071_v40 = vpop.f32.mrf.mxu0 }
 0x19f   : > { %5096 = vst [vmem:[#allocation143_spill] sm:$0xff] %v4185_v45  ;;  %1389 = vmatmul.f32.gmra.mxu2 %v3504_v33  ;;  %v5102_v45 = vld [vmem:[#allocation53_spill] sm:$0xff] }
 0x1a0   : > { %v2350_v32 = vpop.f32.mrf.mxu1 }
 0x1a1   : > { %1749 = vmatmul.f32.gmra.mxu3 %v5097_v5  ;;  %2134 = vmatmul.f32.gmra.mxu0 %v3489_v9  ;;  %v5099_v5 = vld [vmem:[#allocation37_spill] sm:$0xff] }
 0x1a2   : > { %v1310_v22 = vpop.f32.mrf.mxu2 }
 0x1a3   : > { %v1311_v2 = vadd.f32 %v1310_v22, %v1025_v19  ;;  %2413 = vmatmul.f32.gmra.mxu1 %v3489_v9  ;;  %v5098_v9 = vand.u32 4294901760, %v3528_v27 }
 0x1a4   : > { %v1654_v29 = vpop.f32.mrf.mxu3 }
 0x1a5   : > { %v1655_v61 = vadd.f32 %v1654_v29, %v1311_v2 }
 0x1a6   : > { %v2075_v47 = vpop.f32.mrf.mxu0 }
 0x1a7   : > { %1394 = vmatmul.f32.gmra.mxu2 %v3528_v27  ;;  %v2072_v33 = vadd.f32 %v2071_v40, %v1655_v61  ;;  %v5101_v61 = vld [vmem:[#allocation42_spill] sm:$0xff] }
 0x1a8   : > { %v2354_v53 = vpop.f32.mrf.mxu1 }
 0x1a9   : > { %v2351_v19 = vadd.f32 %v2350_v32, %v2072_v33  ;;  %1755 = vmatmul.f32.gmra.mxu3 %v5098_v9  ;;  %2138 = vmatmul.f32.gmra.mxu0 %v5099_v5  ;;  %v5100_v32 = vld [vmem:[#allocation51_spill] sm:$0xff] }
 0x1aa   : > { %v1315_v22 = vpop.f32.mrf.mxu2  ;;  %v486_v27 = vadd.f32 %v4196_v6, %v5100_v32 }
 0x1ab   : > { %vm2605_vm1 = vcmp.ge.f32.partialorder %v2351_v19, 0.0  ;;  %v2669_v29 = vmul.f32 0.2, %v2351_v19  ;;  %v1316_v36 = vadd.f32 %v1315_v22, %v1029_v57  ;;  %2417 = vmatmul.f32.gmra.mxu1 %v5099_v5  ;;  %v5103_v57 = vand.u32 4294901760, %v5101_v61  ;;  %v5104_v5 = vld [vmem:[#allocation40_spill] sm:$0xff] }
 0x1ac   : > { %v1660_v51 = vpop.f32.mrf.mxu3  ;;  %v1033_v15 = vadd.f32 %v5102_v45, %v486_v27 }
 0x1ad   : > { %v2733_v40 = vsel %vm2605_vm1, %v2351_v19, %v2669_v29  ;;  %v1661_v2 = vadd.f32 %v1660_v51, %v1316_v36  ;;  %v5105_v51 = vld [vmem:[#allocation58_spill] sm:$0xff] }
 0x1ae   : > { %2798 = vst.msk [vmem:[%s4210_s10] sm:$0xff] %vm2797_vm2, %v2733_v40  ;;  %v2079_v39 = vpop.f32.mrf.mxu0  ;;  %v494_v32 = vadd.f32 %v4196_v6, %v5105_v51 }
 0x1af   : > { %1399 = vmatmul.f32.gmra.mxu2 %v5101_v61  ;;  %v2076_v33 = vadd.f32 %v2075_v47, %v1661_v2  ;;  %v5107_v61 = vld [vmem:[#allocation60_spill] sm:$0xff] }
 0x1b0   : > { %v2358_v9 = vpop.f32.mrf.mxu1 }
 0x1b1   : > { %v2355_v25 = vadd.f32 %v2354_v53, %v2076_v33  ;;  %1761 = vmatmul.f32.gmra.mxu3 %v5103_v57  ;;  %2142 = vmatmul.f32.gmra.mxu0 %v5104_v5  ;;  %v5106_v53 = vld [vmem:[#allocation47_spill] sm:$0xff]  ;;  %v1037_v33 = vadd.f32 %v5107_v61, %v494_v32  ;;  %v5111_v32 = vld [vmem:[#allocation54_spill] sm:$0xff] }
 0x1b2   : > { %v1320_v22 = vpop.f32.mrf.mxu2 }
 0x1b3   : > { %vm2606_vm3 = vcmp.ge.f32.partialorder %v2355_v25, 0.0  ;;  %v2670_v19 = vmul.f32 0.2, %v2355_v25  ;;  %v1321_v29 = vadd.f32 %v1320_v22, %v1033_v15  ;;  %2421 = vmatmul.f32.gmra.mxu1 %v5104_v5  ;;  %v5108_v15 = vand.u32 4294901760, %v5106_v53  ;;  %v5109_v5 = vld [vmem:[#allocation45_spill] sm:$0xff] }
 0x1b4   : > { %v1666_v36 = vpop.f32.mrf.mxu3 }
 0x1b5   : > { %v2734_v47 = vsel %vm2606_vm3, %v2355_v25, %v2670_v19  ;;  %v1667_v40 = vadd.f32 %v1666_v36, %v1321_v29  ;;  %v5110_v36 = vld [vmem:[#allocation65_spill] sm:$0xff] }
 0x1b6   : > { %2799 = vst.msk [vmem:[%s4210_s10 + $0x8] sm:$0xff] %vm2797_vm2, %v2734_v47  ;;  %v2083_v45 = vpop.f32.mrf.mxu0  ;;  %v502_v51 = vadd.f32 %v4196_v6, %v5110_v36 }
 0x1b7   : > { %1404 = vmatmul.f32.gmra.mxu2 %v5106_v53  ;;  %v2080_v27 = vadd.f32 %v2079_v39, %v1667_v40 }
 0x1b8   : > { %v2362_v2 = vpop.f32.mrf.mxu1 }
 0x1b9   : > { %v2359_v57 = vadd.f32 %v2358_v9, %v2080_v27  ;;  %1767 = vmatmul.f32.gmra.mxu3 %v5108_v15  ;;  %2146 = vmatmul.f32.gmra.mxu0 %v5109_v5  ;;  %v5112_v27 = vld [vmem:[#allocation67_spill] sm:$0xff] }
 0x1ba   : > { %v1325_v22 = vpop.f32.mrf.mxu2  ;;  %v1041_v61 = vadd.f32 %v5112_v27, %v502_v51  ;;  %v5116_v51 = vld [vmem:[#allocation61_spill] sm:$0xff] }
 0x1bb   : > { %vm2607_vm4 = vcmp.ge.f32.partialorder %v2359_v57, 0.0  ;;  %v2671_v25 = vmul.f32 0.2, %v2359_v57  ;;  %v1326_v19 = vadd.f32 %v1325_v22, %v1037_v33  ;;  %2425 = vmatmul.f32.gmra.mxu1 %v5109_v5  ;;  %v5113_v33 = vand.u32 4294901760, %v5111_v32  ;;  %v5114_v5 = vld [vmem:[#allocation50_spill] sm:$0xff] }
 0x1bc   : > { %v1672_v29 = vpop.f32.mrf.mxu3 }
 0x1bd   : > { %v2735_v39 = vsel %vm2607_vm4, %v2359_v57, %v2671_v25  ;;  %v1673_v47 = vadd.f32 %v1672_v29, %v1326_v19  ;;  %v5115_v29 = vld [vmem:[#allocation72_spill] sm:$0xff] }
 0x1be   : > { %2800 = vst.msk [vmem:[%s4210_s10 + $0x10] sm:$0xff] %vm2797_vm2, %v2735_v39  ;;  %v2087_v9 = vpop.f32.mrf.mxu0  ;;  %v510_v36 = vadd.f32 %v4196_v6, %v5115_v29 }
 0x1bf   : > { %1409 = vmatmul.f32.gmra.mxu2 %v5111_v32  ;;  %v2084_v40 = vadd.f32 %v2083_v45, %v1673_v47 }
 0x1c0   : > { %v2366_v53 = vpop.f32.mrf.mxu1 }
 0x1c1   : > { %v2363_v15 = vadd.f32 %v2362_v2, %v2084_v40  ;;  %1773 = vmatmul.f32.gmra.mxu3 %v5113_v33  ;;  %2150 = vmatmul.f32.gmra.mxu0 %v5114_v5  ;;  %v5117_v40 = vld [vmem:[#allocation74_spill] sm:$0xff] }
 0x1c2   : > { %v1330_v22 = vpop.f32.mrf.mxu2  ;;  %v1045_v27 = vadd.f32 %v5117_v40, %v510_v36  ;;  %v5121_v36 = vld [vmem:[#allocation68_spill] sm:$0xff] }
 0x1c3   : > { %vm2608_vm5 = vcmp.ge.f32.partialorder %v2363_v15, 0.0  ;;  %v2672_v57 = vmul.f32 0.2, %v2363_v15  ;;  %v1331_v25 = vadd.f32 %v1330_v22, %v1041_v61  ;;  %2429 = vmatmul.f32.gmra.mxu1 %v5114_v5  ;;  %v5118_v61 = vand.u32 4294901760, %v5116_v51  ;;  %v5119_v5 = vld [vmem:[#allocation57_spill] sm:$0xff] }
 0x1c4   : > { %v1678_v19 = vpop.f32.mrf.mxu3 }
 0x1c5   : > { %v2736_v45 = vsel %vm2608_vm5, %v2363_v15, %v2672_v57  ;;  %v1679_v39 = vadd.f32 %v1678_v19, %v1331_v25  ;;  %v5120_v19 = vld [vmem:[#allocation79_spill] sm:$0xff] }
 0x1c6   : > { %2801 = vst.msk [vmem:[%s4210_s10 + $0x18] sm:$0xff] %vm2797_vm2, %v2736_v45  ;;  %v2091_v2 = vpop.f32.mrf.mxu0  ;;  %v518_v29 = vadd.f32 %v4196_v6, %v5120_v19 }
 0x1c7   : > { %1414 = vmatmul.f32.gmra.mxu2 %v5116_v51  ;;  %v2088_v47 = vadd.f32 %v2087_v9, %v1679_v39 }
 0x1c8   : > { %v2370_v32 = vpop.f32.mrf.mxu1 }
 0x1c9   : > { %v2367_v33 = vadd.f32 %v2366_v53, %v2088_v47  ;;  %1779 = vmatmul.f32.gmra.mxu3 %v5118_v61  ;;  %2154 = vmatmul.f32.gmra.mxu0 %v5119_v5  ;;  %v5122_v47 = vld [vmem:[#allocation81_spill] sm:$0xff] }
 0x1ca   : > { %v1335_v22 = vpop.f32.mrf.mxu2  ;;  %v1049_v40 = vadd.f32 %v5122_v47, %v518_v29  ;;  %v5126_v29 = vld [vmem:[#allocation75_spill] sm:$0xff] }
 0x1cb   : > { %vm2609_vm6 = vcmp.ge.f32.partialorder %v2367_v33, 0.0  ;;  %v2673_v15 = vmul.f32 0.2, %v2367_v33  ;;  %v1336_v57 = vadd.f32 %v1335_v22, %v1045_v27  ;;  %2433 = vmatmul.f32.gmra.mxu1 %v5119_v5  ;;  %v5123_v27 = vand.u32 4294901760, %v5121_v36  ;;  %v5124_v5 = vld [vmem:[#allocation64_spill] sm:$0xff] }
 0x1cc   : > { %v1684_v25 = vpop.f32.mrf.mxu3 }
 0x1cd   : > { %v2737_v9 = vsel %vm2609_vm6, %v2367_v33, %v2673_v15  ;;  %v1685_v45 = vadd.f32 %v1684_v25, %v1336_v57  ;;  %v5125_v25 = vld [vmem:[#allocation86_spill] sm:$0xff] }
 0x1ce   : > { %2802 = vst.msk [vmem:[%s4210_s10 + $0x20] sm:$0xff] %vm2797_vm2, %v2737_v9  ;;  %v2095_v53 = vpop.f32.mrf.mxu0  ;;  %v526_v19 = vadd.f32 %v4196_v6, %v5125_v25 }
 0x1cf   : > { %1419 = vmatmul.f32.gmra.mxu2 %v5121_v36  ;;  %v2092_v39 = vadd.f32 %v2091_v2, %v1685_v45 }
 0x1d0   : > { %v2374_v51 = vpop.f32.mrf.mxu1 }
 0x1d1   : > { %v2371_v61 = vadd.f32 %v2370_v32, %v2092_v39  ;;  %1785 = vmatmul.f32.gmra.mxu3 %v5123_v27  ;;  %2158 = vmatmul.f32.gmra.mxu0 %v5124_v5  ;;  %v5127_v39 = vld [vmem:[#allocation88_spill] sm:$0xff] }
 0x1d2   : > { %v1340_v22 = vpop.f32.mrf.mxu2  ;;  %v1053_v47 = vadd.f32 %v5127_v39, %v526_v19  ;;  %v5131_v19 = vld [vmem:[#allocation82_spill] sm:$0xff] }
 0x1d3   : > { %vm2610_vm7 = vcmp.ge.f32.partialorder %v2371_v61, 0.0  ;;  %v2674_v33 = vmul.f32 0.2, %v2371_v61  ;;  %v1341_v15 = vadd.f32 %v1340_v22, %v1049_v40  ;;  %2437 = vmatmul.f32.gmra.mxu1 %v5124_v5  ;;  %v5128_v40 = vand.u32 4294901760, %v5126_v29  ;;  %v5129_v5 = vld [vmem:[#allocation71_spill] sm:$0xff] }
 0x1d4   : > { %v1690_v57 = vpop.f32.mrf.mxu3 }
 0x1d5   : > { %v2738_v2 = vsel %vm2610_vm7, %v2371_v61, %v2674_v33  ;;  %v1691_v9 = vadd.f32 %v1690_v57, %v1341_v15  ;;  %v5130_v57 = vld [vmem:[#allocation93_spill] sm:$0xff] }
 0x1d6   : > { %2803 = vst.msk [vmem:[%s4210_s10 + $0x28] sm:$0xff] %vm2797_vm2, %v2738_v2  ;;  %v2099_v32 = vpop.f32.mrf.mxu0  ;;  %v534_v25 = vadd.f32 %v4196_v6, %v5130_v57 }
 0x1d7   : > { %1424 = vmatmul.f32.gmra.mxu2 %v5126_v29  ;;  %v2096_v45 = vadd.f32 %v2095_v53, %v1691_v9 }
 0x1d8   : > { %v2378_v36 = vpop.f32.mrf.mxu1 }
 0x1d9   : > { %v2375_v27 = vadd.f32 %v2374_v51, %v2096_v45  ;;  %1791 = vmatmul.f32.gmra.mxu3 %v5128_v40  ;;  %2162 = vmatmul.f32.gmra.mxu0 %v5129_v5  ;;  %v5132_v45 = vld [vmem:[#allocation95_spill] sm:$0xff] }
 0x1da   : > { %v1345_v22 = vpop.f32.mrf.mxu2  ;;  %v1057_v39 = vadd.f32 %v5132_v45, %v534_v25  ;;  %v5136_v25 = vld [vmem:[#allocation89_spill] sm:$0xff] }
 0x1db   : > { %vm2611_vm8 = vcmp.ge.f32.partialorder %v2375_v27, 0.0  ;;  %v2675_v61 = vmul.f32 0.2, %v2375_v27  ;;  %v1346_v33 = vadd.f32 %v1345_v22, %v1053_v47  ;;  %2441 = vmatmul.f32.gmra.mxu1 %v5129_v5  ;;  %v5133_v47 = vand.u32 4294901760, %v5131_v19  ;;  %v5134_v5 = vld [vmem:[#allocation78_spill] sm:$0xff] }
 0x1dc   : > { %v1696_v15 = vpop.f32.mrf.mxu3 }
 0x1dd   : > { %v2739_v53 = vsel %vm2611_vm8, %v2375_v27, %v2675_v61  ;;  %v1697_v2 = vadd.f32 %v1696_v15, %v1346_v33  ;;  %v5135_v15 = vld [vmem:[#allocation100_spill] sm:$0xff] }
 0x1de   : > { %2804 = vst.msk [vmem:[%s4210_s10 + $0x30] sm:$0xff] %vm2797_vm2, %v2739_v53  ;;  %v2103_v51 = vpop.f32.mrf.mxu0  ;;  %v542_v57 = vadd.f32 %v4196_v6, %v5135_v15 }
 0x1df   : > { %1429 = vmatmul.f32.gmra.mxu2 %v5131_v19  ;;  %v2100_v9 = vadd.f32 %v2099_v32, %v1697_v2 }
 0x1e0   : > { %v2382_v29 = vpop.f32.mrf.mxu1 }
 0x1e1   : > { %v2379_v40 = vadd.f32 %v2378_v36, %v2100_v9  ;;  %1797 = vmatmul.f32.gmra.mxu3 %v5133_v47  ;;  %2166 = vmatmul.f32.gmra.mxu0 %v5134_v5  ;;  %v5137_v9 = vld [vmem:[#allocation102_spill] sm:$0xff] }
 0x1e2   : > { %v1350_v22 = vpop.f32.mrf.mxu2  ;;  %v1061_v45 = vadd.f32 %v5137_v9, %v542_v57  ;;  %v5141_v57 = vld [vmem:[#allocation96_spill] sm:$0xff] }
 0x1e3   : > { %vm2612_vm9 = vcmp.ge.f32.partialorder %v2379_v40, 0.0  ;;  %v2676_v27 = vmul.f32 0.2, %v2379_v40  ;;  %v1351_v61 = vadd.f32 %v1350_v22, %v1057_v39  ;;  %2445 = vmatmul.f32.gmra.mxu1 %v5134_v5  ;;  %v5138_v39 = vand.u32 4294901760, %v5136_v25  ;;  %v5139_v5 = vld [vmem:[#allocation85_spill] sm:$0xff] }
 0x1e4   : > { %v1702_v33 = vpop.f32.mrf.mxu3 }
 0x1e5   : > { %v2740_v32 = vsel %vm2612_vm9, %v2379_v40, %v2676_v27  ;;  %v1703_v53 = vadd.f32 %v1702_v33, %v1351_v61  ;;  %v5140_v33 = vld [vmem:[#allocation106_spill] sm:$0xff] }
 0x1e6   : > { %2805 = vst.msk [vmem:[%s4210_s10 + $0x38] sm:$0xff] %vm2797_vm2, %v2740_v32  ;;  %v2107_v36 = vpop.f32.mrf.mxu0  ;;  %v550_v15 = vadd.f32 %v4196_v6, %v5140_v33 }
 0x1e7   : > { %1434 = vmatmul.f32.gmra.mxu2 %v5136_v25  ;;  %v2104_v2 = vadd.f32 %v2103_v51, %v1703_v53 }
 0x1e8   : > { %v2386_v19 = vpop.f32.mrf.mxu1 }
 0x1e9   : > { %v2383_v47 = vadd.f32 %v2382_v29, %v2104_v2  ;;  %1803 = vmatmul.f32.gmra.mxu3 %v5138_v39  ;;  %2170 = vmatmul.f32.gmra.mxu0 %v5139_v5  ;;  %v5142_v2 = vld [vmem:[#allocation108_spill] sm:$0xff] }
 0x1ea   : > { %v1355_v22 = vpop.f32.mrf.mxu2  ;;  %v1065_v9 = vadd.f32 %v5142_v2, %v550_v15  ;;  %v5146_v15 = vld [vmem:[#allocation103_spill] sm:$0xff] }
 0x1eb   : > { %vm2613_vm10 = vcmp.ge.f32.partialorder %v2383_v47, 0.0  ;;  %v2677_v40 = vmul.f32 0.2, %v2383_v47  ;;  %v1356_v27 = vadd.f32 %v1355_v22, %v1061_v45  ;;  %2449 = vmatmul.f32.gmra.mxu1 %v5139_v5  ;;  %v5143_v45 = vand.u32 4294901760, %v5141_v57  ;;  %v5144_v5 = vld [vmem:[#allocation92_spill] sm:$0xff] }
 0x1ec   : > { %v1708_v61 = vpop.f32.mrf.mxu3 }
 0x1ed   : > { %v2741_v51 = vsel %vm2613_vm10, %v2383_v47, %v2677_v40  ;;  %v1709_v32 = vadd.f32 %v1708_v61, %v1356_v27  ;;  %v5145_v61 = vld [vmem:[#allocation112_spill] sm:$0xff] }
 0x1ee   : > { %2806 = vst.msk [vmem:[%s4210_s10 + $0x40] sm:$0xff] %vm2797_vm2, %v2741_v51  ;;  %v2111_v29 = vpop.f32.mrf.mxu0  ;;  %v558_v33 = vadd.f32 %v4196_v6, %v5145_v61 }
 0x1ef   : > { %1439 = vmatmul.f32.gmra.mxu2 %v5141_v57  ;;  %v2108_v53 = vadd.f32 %v2107_v36, %v1709_v32 }
 0x1f0   : > { %v2390_v25 = vpop.f32.mrf.mxu1 }
 0x1f1   : > { %v2387_v39 = vadd.f32 %v2386_v19, %v2108_v53  ;;  %1809 = vmatmul.f32.gmra.mxu3 %v5143_v45  ;;  %2174 = vmatmul.f32.gmra.mxu0 %v5144_v5  ;;  %v5147_v53 = vld [vmem:[#allocation114_spill] sm:$0xff] }
 0x1f2   : > { %v1360_v22 = vpop.f32.mrf.mxu2  ;;  %v1069_v2 = vadd.f32 %v5147_v53, %v558_v33  ;;  %v5150_v33 = vld [vmem:[#allocation109_spill] sm:$0xff] }
 0x1f3   : > { %vm2614_vm11 = vcmp.ge.f32.partialorder %v2387_v39, 0.0  ;;  %v2678_v47 = vmul.f32 0.2, %v2387_v39  ;;  %v1361_v40 = vadd.f32 %v1360_v22, %v1065_v9  ;;  %2453 = vmatmul.f32.gmra.mxu1 %v5144_v5  ;;  %v5148_v9 = vand.u32 4294901760, %v5146_v15  ;;  %v5149_v5 = vld [vmem:[#allocation99_spill] sm:$0xff] }
 0x1f4   : > { %v1714_v27 = vpop.f32.mrf.mxu3 }
 0x1f5   : > { %v2742_v36 = vsel %vm2614_vm11, %v2387_v39, %v2678_v47  ;;  %v1715_v51 = vadd.f32 %v1714_v27, %v1361_v40  ;;  %v566_v27 = vadd.f32 %v4196_v6, %v3916_v42 }
 0x1f6   : > { %2807 = vst.msk [vmem:[%s4210_s10 + $0x48] sm:$0xff] %vm2797_vm2, %v2742_v36  ;;  %v2115_v19 = vpop.f32.mrf.mxu0 }
 0x1f7   : > { %1444 = vmatmul.f32.gmra.mxu2 %v5146_v15  ;;  %v2112_v32 = vadd.f32 %v2111_v29, %v1715_v51  ;;  %v5151_v15 = vld [vmem:[#allocation119_spill] sm:$0xff] }
 0x1f8   : > { %v2394_v57 = vpop.f32.mrf.mxu1 }
 0x1f9   : > { %v2391_v45 = vadd.f32 %v2390_v25, %v2112_v32  ;;  %1815 = vmatmul.f32.gmra.mxu3 %v5148_v9  ;;  %2178 = vmatmul.f32.gmra.mxu0 %v5149_v5  ;;  %v1073_v32 = vadd.f32 %v5151_v15, %v566_v27 }
 0x1fa   : > { %v1365_v22 = vpop.f32.mrf.mxu2 }
 0x1fb   : > { %vm2615_vm12 = vcmp.ge.f32.partialorder %v2391_v45, 0.0  ;;  %v2679_v39 = vmul.f32 0.2, %v2391_v45  ;;  %v1366_v47 = vadd.f32 %v1365_v22, %v1069_v2  ;;  %2457 = vmatmul.f32.gmra.mxu1 %v5149_v5  ;;  %v5152_v2 = vand.u32 4294901760, %v5150_v33 }
 0x1fc   : > { %v1720_v40 = vpop.f32.mrf.mxu3  ;;  %v574_v22 = vadd.f32 %v4196_v6, %v3946_v50 }
 0x1fd   : > { %v2743_v29 = vsel %vm2615_vm12, %v2391_v45, %v2679_v39  ;;  %v1721_v61 = vadd.f32 %v1720_v40, %v1366_v47  ;;  %v5153_v47 = vld [vmem:[#allocation115_spill] sm:$0xff] }
 0x1fe   : > { %2808 = vst.msk [vmem:[%s4210_s10 + $0x50] sm:$0xff] %vm2797_vm2, %v2743_v29  ;;  %v2119_v25 = vpop.f32.mrf.mxu0  ;;  %v5154_v29 = vld [vmem:[#allocation123_spill] sm:$0xff] }
 0x1ff   : > { %1449 = vmatmul.f32.gmra.mxu2 %v5150_v33  ;;  %v2116_v36 = vadd.f32 %v2115_v19, %v1721_v61  ;;  %v1077_v61 = vadd.f32 %v5154_v29, %v574_v22  ;;  %v5156_v22 = vand.u32 4294901760, %v3933_v35 }
 0x200   : > { %v2398_v51 = vpop.f32.mrf.mxu1 }
 0x201   : > { %v2395_v53 = vadd.f32 %v2394_v57, %v2116_v36  ;;  %1821 = vmatmul.f32.gmra.mxu3 %v5152_v2  ;;  %2182 = vmatmul.f32.gmra.mxu0 %v3852_v43  ;;  %v5155_v36 = vand.u32 4294901760, %v5153_v47 }
 0x202   : > { %v1370_v9 = vpop.f32.mrf.mxu2 }
 0x203   : > { %vm2616_vm13 = vcmp.ge.f32.partialorder %v2395_v53, 0.0  ;;  %v2680_v42 = vmul.f32 0.2, %v2395_v53  ;;  %v1371_v45 = vadd.f32 %v1370_v9, %v1073_v32  ;;  %2461 = vmatmul.f32.gmra.mxu1 %v3852_v43 }
 0x204   : > { %v1726_v5 = vpop.f32.mrf.mxu3 }
 0x205   : > { %v2744_v19 = vsel %vm2616_vm13, %v2395_v53, %v2680_v42  ;;  %v1727_v39 = vadd.f32 %v1726_v5, %v1371_v45  ;;  %v582_v53 = vadd.f32 %v4196_v6, %v3969_v16 }
 0x206   : > { %2809 = vst.msk [vmem:[%s4210_s10 + $0x58] sm:$0xff] %vm2797_vm2, %v2744_v19  ;;  %v2123_v57 = vpop.f32.mrf.mxu0 }
 0x207   : > { %1454 = vmatmul.f32.gmra.mxu2 %v5153_v47  ;;  %v2120_v40 = vadd.f32 %v2119_v25, %v1727_v39  ;;  %v1081_v45 = vadd.f32 %v3974_v12, %v582_v53  ;;  %v590_v47 = vadd.f32 %v4196_v6, %v3984_v58  ;;  %v5158_v53 = vld [vmem:[#allocation3_spill] sm:$0xff] }
 0x208   : > { %v2402_v27 = vpop.f32.mrf.mxu1 }
 0x209   : > { %v2399_v33 = vadd.f32 %v2398_v51, %v2120_v40  ;;  %1827 = vmatmul.f32.gmra.mxu3 %v5155_v36  ;;  %2186 = vmatmul.f32.gmra.mxu0 %v3883_v10  ;;  %v1085_v29 = vadd.f32 %v3986_v46, %v590_v47 }
 0x20a   : > { %v1375_v43 = vpop.f32.mrf.mxu2 }
 0x20b   : > { %vm2617_vm14 = vcmp.ge.f32.partialorder %v2399_v33, 0.0  ;;  %v2681_v50 = vmul.f32 0.2, %v2399_v33  ;;  %v1376_v15 = vadd.f32 %v1375_v43, %v1077_v61  ;;  %2465 = vmatmul.f32.gmra.mxu1 %v3883_v10 }
 0x20c   : > { %v1732_v32 = vpop.f32.mrf.mxu3 }
 0x20d   : > { %v2745_v25 = vsel %vm2617_vm14, %v2399_v33, %v2681_v50  ;;  %v1733_v2 = vadd.f32 %v1732_v32, %v1376_v15  ;;  %v5157_v33 = vand.u32 4294901760, %v3961_v26  ;;  %v598_v50 = vadd.f32 %v4196_v6, %v3993_v60 }
 0x20e   : > { %2810 = vst.msk [vmem:[%s4210_s10 + $0x60] sm:$0xff] %vm2797_vm2, %v2745_v25  ;;  %v2127_v51 = vpop.f32.mrf.mxu0 }
 0x20f   : > { %1459 = vmatmul.f32.gmra.mxu2 %v3933_v35  ;;  %v2124_v9 = vadd.f32 %v2123_v57, %v1733_v2  ;;  %v1089_v2 = vadd.f32 %v3996_v31, %v598_v50 }
 0x210   : > { %v2406_v42 = vpop.f32.mrf.mxu1 }
 0x211   : > { %v2403_v5 = vadd.f32 %v2402_v27, %v2124_v9  ;;  %1833 = vmatmul.f32.gmra.mxu3 %v5156_v22  ;;  %2190 = vmatmul.f32.gmra.mxu0 %v3914_v41  ;;  %v5159_v9 = vand.u32 4294901760, %v5158_v53  ;;  %v606_v22 = vadd.f32 %v4196_v6, %v4005_v7 }
 0x212   : > { %v1380_v10 = vpop.f32.mrf.mxu2 }
 0x213   : > { %vm2618_vm15 = vcmp.ge.f32.partialorder %v2403_v5, 0.0  ;;  %v2682_v16 = vmul.f32 0.2, %v2403_v5  ;;  %v1381_v19 = vadd.f32 %v1380_v10, %v1081_v45  ;;  %2469 = vmatmul.f32.gmra.mxu1 %v3914_v41 }
 0x214   : > { %v1738_v39 = vpop.f32.mrf.mxu3 }
 0x215   : > { %v2746_v57 = vsel %vm2618_vm15, %v2403_v5, %v2682_v16  ;;  %v1739_v40 = vadd.f32 %v1738_v39, %v1381_v19  ;;  %v5161_v19 = vld [vmem:[#allocation5_spill] sm:$0xff] }
 0x216   : > { %2811 = vst.msk [vmem:[%s4210_s10 + $0x68] sm:$0xff] %vm2797_vm2, %v2746_v57  ;;  %v2131_v12 = vpop.f32.mrf.mxu0  ;;  %v1093_v57 = vadd.f32 %v4008_v55, %v606_v22 }
 0x217   : > { %1464 = vmatmul.f32.gmra.mxu2 %v3961_v26  ;;  %v2128_v35 = vadd.f32 %v2127_v51, %v1739_v40 }
 0x218   : > { %v2410_v27 = vpop.f32.mrf.mxu1 }
 0x219   : > { %v2407_v61 = vadd.f32 %v2406_v42, %v2128_v35  ;;  %1839 = vmatmul.f32.gmra.mxu3 %v5157_v33  ;;  %2194 = vmatmul.f32.gmra.mxu0 %v3944_v24  ;;  %v5163_v35 = vld [vmem:[#allocation4_spill] sm:$0xff]  ;;  %v614_v33 = vadd.f32 %v4196_v6, %v4017_v30 }
 0x21a   : > { %v1385_v41 = vpop.f32.mrf.mxu2 }
 0x21b   : > { %vm2619_vm0 = vcmp.ge.f32.partialorder %v2407_v61, 0.0  ;;  %v2683_v58 = vmul.f32 0.2, %v2407_v61  ;;  %v1386_v36 = vadd.f32 %v1385_v41, %v1085_v29  ;;  %2473 = vmatmul.f32.gmra.mxu1 %v3944_v24  ;;  %v5160_v24 = vld [vmem:[#allocation2_spill] sm:$0xff] }
 0x21c   : > { %v1744_v43 = vpop.f32.mrf.mxu3 }
 0x21d   : > { %v2747_v15 = vsel %vm2619_vm0, %v2407_v61, %v2683_v58  ;;  %v1745_v32 = vadd.f32 %v1744_v43, %v1386_v36  ;;  %v5164_v36 = vld [vmem:[#allocation7_spill] sm:$0xff] }
 0x21e   : > { %2812 = vst.msk [vmem:[%s4210_s10 + $0x70] sm:$0xff] %vm2797_vm2, %v2747_v15  ;;  %v2135_v46 = vpop.f32.mrf.mxu0  ;;  %v1097_v15 = vadd.f32 %v4020_v13, %v614_v33  ;;  %v5172_v33 = vld [vmem:[#allocation10_spill] sm:$0xff] }
 0x21f   : > { %1469 = vmatmul.f32.gmra.mxu2 %v5158_v53  ;;  %v2132_v26 = vadd.f32 %v2131_v12, %v1745_v32  ;;  %v5162_v12 = vand.u32 4294901760, %v5161_v19  ;;  %v5166_v53 = vld [vmem:[#allocation6_spill] sm:$0xff] }
 0x220   : > { %v2414_v25 = vpop.f32.mrf.mxu1 }
 0x221   : > { %v2411_v51 = vadd.f32 %v2410_v27, %v2132_v26  ;;  %1845 = vmatmul.f32.gmra.mxu3 %v5159_v9  ;;  %2198 = vmatmul.f32.gmra.mxu0 %v5160_v24 }
 0x222   : > { %v1390_v42 = vpop.f32.mrf.mxu2 }
 0x223   : > { %vm2620_vm1 = vcmp.ge.f32.partialorder %v2411_v51, 0.0  ;;  %v2684_v60 = vmul.f32 0.2, %v2411_v51  ;;  %v1391_v45 = vadd.f32 %v1390_v42, %v1089_v2  ;;  %2477 = vmatmul.f32.gmra.mxu1 %v5160_v24  ;;  %v5167_v42 = vld [vmem:[#allocation9_spill] sm:$0xff] }
 0x224   : > { %v1750_v5 = vpop.f32.mrf.mxu3 }
 0x225   : > { %v2748_v10 = vsel %vm2620_vm1, %v2411_v51, %v2684_v60  ;;  %v1751_v16 = vadd.f32 %v1750_v5, %v1391_v45  ;;  %v622_v51 = vadd.f32 %v4196_v6, %v4029_v59 }
 0x226   : > { %2813 = vst.msk [vmem:[%s4210_s10 + $0x78] sm:$0xff] %vm2797_vm2, %v2748_v10  ;;  %v2139_v31 = vpop.f32.mrf.mxu0  ;;  %v5168_v10 = vand.u32 4294901760, %v5167_v42 }
 0x227   : > { %1474 = vmatmul.f32.gmra.mxu2 %v5161_v19  ;;  %v2136_v39 = vadd.f32 %v2135_v46, %v1751_v16  ;;  %v5165_v46 = vand.u32 4294901760, %v5164_v36  ;;  %v1101_v5 = vadd.f32 %v4032_v44, %v622_v51  ;;  %v5169_v16 = vld [vmem:[#allocation8_spill] sm:$0xff] }
 0x228   : > { %v2418_v47 = vpop.f32.mrf.mxu1 }
 0x229   : > { %v2415_v40 = vadd.f32 %v2414_v25, %v2136_v39  ;;  %1851 = vmatmul.f32.gmra.mxu3 %v5162_v12  ;;  %2202 = vmatmul.f32.gmra.mxu0 %v5163_v35  ;;  %v5170_v12 = vld [vmem:[#allocation11_spill] sm:$0xff] }
 0x22a   : > { %v1395_v27 = vpop.f32.mrf.mxu2 }
 0x22b   : > { %vm2621_vm3 = vcmp.ge.f32.partialorder %v2415_v40, 0.0  ;;  %v2685_v7 = vmul.f32 0.2, %v2415_v40  ;;  %v1396_v29 = vadd.f32 %v1395_v27, %v1093_v57  ;;  %2481 = vmatmul.f32.gmra.mxu1 %v5163_v35 }
 0x22c   : > { %v1756_v61 = vpop.f32.mrf.mxu3 }
 0x22d   : > { %v2749_v41 = vsel %vm2621_vm3, %v2415_v40, %v2685_v7  ;;  %v1757_v58 = vadd.f32 %v1756_v61, %v1396_v29  ;;  %v5171_v61 = vand.u32 4294901760, %v5170_v12 }
 0x22e   : > { %2814 = vst.msk [vmem:[%s4210_s10 + $0x80] sm:$0xff] %vm2797_vm2, %v2749_v41  ;;  %v2143_v55 = vpop.f32.mrf.mxu0 }
 0x22f   : > { %1479 = vmatmul.f32.gmra.mxu2 %v5164_v36  ;;  %v2140_v43 = vadd.f32 %v2139_v31, %v1757_v58  ;;  %v638_v36 = vadd.f32 %v4196_v6, %v4053_v63 }
 0x230   : > { %v2422_v50 = vpop.f32.mrf.mxu1 }
 0x231   : > { %v2419_v32 = vadd.f32 %v2418_v47, %v2140_v43  ;;  %1857 = vmatmul.f32.gmra.mxu3 %v5165_v46  ;;  %2206 = vmatmul.f32.gmra.mxu0 %v5166_v53  ;;  %v630_v47 = vadd.f32 %v4196_v6, %v4041_v8 }
 0x232   : > { %v1400_v26 = vpop.f32.mrf.mxu2 }
 0x233   : > { %vm2622_vm4 = vcmp.ge.f32.partialorder %v2419_v32, 0.0  ;;  %v2686_v30 = vmul.f32 0.2, %v2419_v32  ;;  %v1401_v25 = vadd.f32 %v1400_v26, %v1097_v15  ;;  %2485 = vmatmul.f32.gmra.mxu1 %v5166_v53  ;;  %v1105_v7 = vadd.f32 %v4044_v49, %v630_v47  ;;  %v5173_v15 = vld [vmem:[#allocation13_spill] sm:$0xff] }
 0x234   : > { %v1762_v2 = vpop.f32.mrf.mxu3  ;;  %v1109_v53 = vadd.f32 %v4056_v1, %v638_v36  ;;  %v654_v47 = vadd.f32 %v4196_v6, %v4077_v52 }
 0x235   : > { %v2750_v9 = vsel %vm2622_vm4, %v2419_v32, %v2686_v30  ;;  %v1763_v24 = vadd.f32 %v1762_v2, %v1401_v25  ;;  %v5174_v30 = vand.u32 4294901760, %v5173_v15  ;;  %v5175_v25 = vld [vmem:[#allocation12_spill] sm:$0xff] }
 0x236   : > { %2815 = vst.msk [vmem:[%s4210_s10 + $0x88] sm:$0xff] %vm2797_vm2, %v2750_v9  ;;  %v2147_v13 = vpop.f32.mrf.mxu0 }
 0x237   : > { %1484 = vmatmul.f32.gmra.mxu2 %v5167_v42  ;;  %v2144_v60 = vadd.f32 %v2143_v55, %v1763_v24  ;;  %v646_v24 = vadd.f32 %v4196_v6, %v4065_v20 }
 0x238   : > { %v2426_v45 = vpop.f32.mrf.mxu1 }
 0x239   : > { %v2423_v22 = vadd.f32 %v2422_v50, %v2144_v60  ;;  %1863 = vmatmul.f32.gmra.mxu3 %v5168_v10  ;;  %2210 = vmatmul.f32.gmra.mxu0 %v5169_v16  ;;  %v5176_v60 = vld [vmem:[#allocation15_spill] sm:$0xff] }
 0x23a   : > { %v1405_v31 = vpop.f32.mrf.mxu2 }
 0x23b   : > { %vm2623_vm5 = vcmp.ge.f32.partialorder %v2423_v22, 0.0  ;;  %v2687_v59 = vmul.f32 0.2, %v2423_v22  ;;  %v1406_v19 = vadd.f32 %v1405_v31, %v1101_v5  ;;  %2489 = vmatmul.f32.gmra.mxu1 %v5169_v16  ;;  %v5177_v16 = vand.u32 4294901760, %v5176_v60  ;;  %v5178_v31 = vld [vmem:[#allocation14_spill] sm:$0xff] }
 0x23c   : > { %v1768_v39 = vpop.f32.mrf.mxu3 }
 0x23d   : > { %v2751_v57 = vsel %vm2623_vm5, %v2423_v22, %v2687_v59  ;;  %v1769_v40 = vadd.f32 %v1768_v39, %v1406_v19  ;;  %v1113_v22 = vadd.f32 %v4068_v28, %v646_v24 }
 0x23e   : > { %2816 = vst.msk [vmem:[%s4210_s10 + $0x90] sm:$0xff] %vm2797_vm2, %v2751_v57  ;;  %v2151_v44 = vpop.f32.mrf.mxu0 }
 0x23f   : > { %1489 = vmatmul.f32.gmra.mxu2 %v5170_v12  ;;  %v2148_v35 = vadd.f32 %v2147_v13, %v1769_v40 }
 0x240   : > { %v2430_v27 = vpop.f32.mrf.mxu1 }
 0x241   : > { %v2427_v29 = vadd.f32 %v2426_v45, %v2148_v35  ;;  %1869 = vmatmul.f32.gmra.mxu3 %v5171_v61  ;;  %2214 = vmatmul.f32.gmra.mxu0 %v5172_v33  ;;  %v5181_v61 = vld [vmem:[#allocation16_spill] sm:$0xff] }
 0x242   : > { %v1410_v41 = vpop.f32.mrf.mxu2 }
 0x243   : > { %vm2624_vm6 = vcmp.ge.f32.partialorder %v2427_v29, 0.0  ;;  %v2688_v8 = vmul.f32 0.2, %v2427_v29  ;;  %v1411_v58 = vadd.f32 %v1410_v41, %v1105_v7  ;;  %2493 = vmatmul.f32.gmra.mxu1 %v5172_v33 }
 0x244   : > { %v1774_v55 = vpop.f32.mrf.mxu3 }
 0x245   : > { %v2752_v43 = vsel %vm2624_vm6, %v2427_v29, %v2688_v8  ;;  %v1775_v50 = vadd.f32 %v1774_v55, %v1411_v58  ;;  %v662_v58 = vadd.f32 %v4196_v6, %v4089_v54 }
 0x246   : > { %2817 = vst.msk [vmem:[%s4210_s10 + $0x98] sm:$0xff] %vm2797_vm2, %v2752_v43  ;;  %v2155_v49 = vpop.f32.mrf.mxu0  ;;  %v5182_v43 = vld [vmem:[#allocation19_spill] sm:$0xff] }
 0x247   : > { %1494 = vmatmul.f32.gmra.mxu2 %v5173_v15  ;;  %v2152_v32 = vadd.f32 %v2151_v44, %v1775_v50  ;;  %v5179_v44 = vld [vmem:[#allocation17_spill] sm:$0xff]  ;;  %v1121_v15 = vadd.f32 %v4092_v48, %v662_v58 }
 0x248   : > { %v2434_v46 = vpop.f32.mrf.mxu1  ;;  %v5180_v29 = vand.u32 4294901760, %v5179_v44 }
 0x249   : > { %v2431_v26 = vadd.f32 %v2430_v27, %v2152_v32  ;;  %1875 = vmatmul.f32.gmra.mxu3 %v5174_v30  ;;  %2218 = vmatmul.f32.gmra.mxu0 %v5175_v25  ;;  %v1117_v27 = vadd.f32 %v4080_v34, %v654_v47 }
 0x24a   : > { %v1415_v2 = vpop.f32.mrf.mxu2 }
 0x24b   : > { %vm2625_vm7 = vcmp.ge.f32.partialorder %v2431_v26, 0.0  ;;  %v2689_v63 = vmul.f32 0.2, %v2431_v26  ;;  %v1416_v51 = vadd.f32 %v1415_v2, %v1109_v53  ;;  %2497 = vmatmul.f32.gmra.mxu1 %v5175_v25  ;;  %v5184_v53 = vld [vmem:[#allocation18_spill] sm:$0xff]  ;;  %v670_v2 = vadd.f32 %v4196_v6, %v4101_v18 }
 0x24c   : > { %v1780_v9 = vpop.f32.mrf.mxu3 }
 0x24d   : > { %v2753_v13 = vsel %vm2625_vm7, %v2431_v26, %v2689_v63  ;;  %v1781_v42 = vadd.f32 %v1780_v9, %v1416_v51  ;;  %v5185_v9 = vld [vmem:[#allocation21_spill] sm:$0xff] }
 0x24e   : > { %2818 = vst.msk [vmem:[%s4210_s10 + $0xa0] sm:$0xff] %vm2797_vm2, %v2753_v13  ;;  %v2159_v1 = vpop.f32.mrf.mxu0 }
 0x24f   : > { %1499 = vmatmul.f32.gmra.mxu2 %v5176_v60  ;;  %v2156_v45 = vadd.f32 %v2155_v49, %v1781_v42  ;;  %v1125_v42 = vadd.f32 %v4104_v23, %v670_v2  ;;  %v5186_v60 = vand.u32 4294901760, %v5185_v9 }
 0x250   : > { %v2438_v5 = vpop.f32.mrf.mxu1 }
 0x251   : > { %v2435_v10 = vadd.f32 %v2434_v46, %v2156_v45  ;;  %1881 = vmatmul.f32.gmra.mxu3 %v5177_v16  ;;  %2222 = vmatmul.f32.gmra.mxu0 %v5178_v31  ;;  %v5183_v46 = vand.u32 4294901760, %v5182_v43  ;;  %v5187_v45 = vld [vmem:[#allocation20_spill] sm:$0xff]  ;;  %v678_v16 = vadd.f32 %v4196_v6, %v4113_v21 }
 0x252   : > { %v1420_v59 = vpop.f32.mrf.mxu2 }
 0x253   : > { %vm2626_vm8 = vcmp.ge.f32.partialorder %v2435_v10, 0.0  ;;  %v2690_v20 = vmul.f32 0.2, %v2435_v10  ;;  %v1421_v19 = vadd.f32 %v1420_v59, %v1113_v22  ;;  %2501 = vmatmul.f32.gmra.mxu1 %v5178_v31  ;;  %v1129_v47 = vadd.f32 %v4116_v11, %v678_v16  ;;  %v2951_v16 = vld [vmem:[%s4699_s2] ss:$0 sm:$0xff] }
 0x254   : > { %v1786_v39 = vpop.f32.mrf.mxu3 }
 0x255   : > { %v2754_v57 = vsel %vm2626_vm8, %v2435_v10, %v2690_v20  ;;  %v1787_v40 = vadd.f32 %v1786_v39, %v1421_v19  ;;  %v5188_v20 = vld [vmem:[#allocation23_spill] sm:$0xff] }
 0x256   : > { %2819 = vst.msk [vmem:[%s4210_s10 + $0xa8] sm:$0xff] %vm2797_vm2, %v2754_v57  ;;  %v2163_v28 = vpop.f32.mrf.mxu0 }
 0x257   : > { %1504 = vmatmul.f32.gmra.mxu2 %v5179_v44  ;;  %v2160_v12 = vadd.f32 %v2159_v1, %v1787_v40  ;;  %v5189_v40 = vand.u32 4294901760, %v5188_v20 }
 0x258   : > { %v2442_v35 = vpop.f32.mrf.mxu1 }
 0x259   : > { %v2439_v7 = vadd.f32 %v2438_v5, %v2160_v12  ;;  %1887 = vmatmul.f32.gmra.mxu3 %v5180_v29  ;;  %2226 = vmatmul.f32.gmra.mxu0 %v5181_v61 }
 0x25a   : > { %v1425_v33 = vpop.f32.mrf.mxu2 }
 0x25b   : > { %vm2627_vm9 = vcmp.ge.f32.partialorder %v2439_v7, 0.0  ;;  %v2691_v52 = vmul.f32 0.2, %v2439_v7  ;;  %v1426_v41 = vadd.f32 %v1425_v33, %v1117_v27  ;;  %2505 = vmatmul.f32.gmra.mxu1 %v5181_v61  ;;  %v686_v27 = vadd.f32 %v4196_v6, %v4125_v17  ;;  %v5191_v61 = vld [vmem:[#allocation25_spill] sm:$0xff] }
 0x25c   : > { %v1792_v8 = vpop.f32.mrf.mxu3  ;;  %v5192_v58 = vand.u32 4294901760, %v5191_v61 }
 0x25d   : > { %v2755_v55 = vsel %vm2627_vm9, %v2439_v7, %v2691_v52  ;;  %v1793_v36 = vadd.f32 %v1792_v8, %v1426_v41  ;;  %v1133_v41 = vadd.f32 %v4128_v3, %v686_v27 }
 0x25e   : > { %2820 = vst.msk [vmem:[%s4210_s10 + $0xb0] sm:$0xff] %vm2797_vm2, %v2755_v55  ;;  %v2167_v34 = vpop.f32.mrf.mxu0  ;;  %v5193_v55 = vld [vmem:[#allocation24_spill] sm:$0xff] }
 0x25f   : > { %1509 = vmatmul.f32.gmra.mxu2 %v5182_v43  ;;  %v2164_v50 = vadd.f32 %v2163_v28, %v1793_v36  ;;  %v5190_v28 = vld [vmem:[#allocation22_spill] sm:$0xff] }
 0x260   : > { %v2446_v49 = vpop.f32.mrf.mxu1 }
 0x261   : > { %v2443_v32 = vadd.f32 %v2442_v35, %v2164_v50  ;;  %1893 = vmatmul.f32.gmra.mxu3 %v5183_v46  ;;  %2230 = vmatmul.f32.gmra.mxu0 %v5184_v53  ;;  %v694_v50 = vadd.f32 %v4196_v6, %v4137_v62 }
 0x262   : > { %v1430_v26 = vpop.f32.mrf.mxu2 }
 0x263   : > { %vm2628_vm10 = vcmp.ge.f32.partialorder %v2443_v32, 0.0  ;;  %v2692_v54 = vmul.f32 0.2, %v2443_v32  ;;  %v1431_v30 = vadd.f32 %v1430_v26, %v1121_v15  ;;  %2509 = vmatmul.f32.gmra.mxu1 %v5184_v53  ;;  %v1137_v26 = vadd.f32 %v4140_v0, %v694_v50 }
 0x264   : > { %v1798_v25 = vpop.f32.mrf.mxu3 }
 0x265   : > { %v2756_v63 = vsel %vm2628_vm10, %v2443_v32, %v2692_v54  ;;  %v1799_v51 = vadd.f32 %v1798_v25, %v1431_v30  ;;  %v5194_v32 = vld [vmem:[#allocation27_spill] sm:$0xff]  ;;  %v5196_v25 = vld [vmem:[#allocation26_spill] sm:$0xff] }
 0x266   : > { %2821 = vst.msk [vmem:[%s4210_s10 + $0xb8] sm:$0xff] %vm2797_vm2, %v2756_v63  ;;  %v2171_v48 = vpop.f32.mrf.mxu0  ;;  %v5195_v30 = vand.u32 4294901760, %v5194_v32 }
 0x267   : > { %1514 = vmatmul.f32.gmra.mxu2 %v5185_v9  ;;  %v2168_v24 = vadd.f32 %v2167_v34, %v1799_v51 }
 0x268   : > { %v2450_v13 = vpop.f32.mrf.mxu1 }
 0x269   : > { %v2447_v1 = vadd.f32 %v2446_v49, %v2168_v24  ;;  %1899 = vmatmul.f32.gmra.mxu3 %v5186_v60  ;;  %2234 = vmatmul.f32.gmra.mxu0 %v5187_v45 }
 0x26a   : > { %v1435_v5 = vpop.f32.mrf.mxu2 }
 0x26b   : > { %vm2629_vm11 = vcmp.ge.f32.partialorder %v2447_v1, 0.0  ;;  %v2693_v18 = vmul.f32 0.2, %v2447_v1  ;;  %v1436_v22 = vadd.f32 %v1435_v5, %v1125_v42  ;;  %2513 = vmatmul.f32.gmra.mxu1 %v5187_v45 }
 0x26c   : > { %v1804_v10 = vpop.f32.mrf.mxu3 }
 0x26d   : > { %v2757_v31 = vsel %vm2629_vm11, %v2447_v1, %v2693_v18  ;;  %v1805_v59 = vadd.f32 %v1804_v10, %v1436_v22  ;;  %v5199_v18 = vld [vmem:[#allocation28_spill] sm:$0xff] }
 0x26e   : > { %2822 = vst.msk [vmem:[%s4210_s10 + $0xc0] sm:$0xff] %vm2797_vm2, %v2757_v31  ;;  %v2175_v23 = vpop.f32.mrf.mxu0  ;;  %v710_v31 = vadd.f32 %v2951_v16, %v4161_v56 }
 0x26f   : > { %1519 = vmatmul.f32.gmra.mxu2 %v5188_v20  ;;  %v2172_v19 = vadd.f32 %v2171_v48, %v1805_v59  ;;  %v702_v48 = vadd.f32 %v4196_v6, %v4149_v4  ;;  %v5200_v20 = vld [vmem:[#allocation31_spill] sm:$0xff] }
 0x270   : > { %v2454_v39 = vpop.f32.mrf.mxu1 }
 0x271   : > { %v2451_v57 = vadd.f32 %v2450_v13, %v2172_v19  ;;  %1905 = vmatmul.f32.gmra.mxu3 %v5189_v40  ;;  %2238 = vmatmul.f32.gmra.mxu0 %v5190_v28  ;;  %v5197_v13 = vld [vmem:[#allocation29_spill] sm:$0xff]  ;;  %v1141_v60 = vadd.f32 %v4152_v14, %v702_v48  ;;  %v5201_v40 = vand.u32 4294901760, %v5200_v20  ;;  %v5211_v48 = vld [vmem:[#allocation38_spill] sm:$0xff] }
 0x272   : > { %v1440_v44 = vpop.f32.mrf.mxu2  ;;  %v5198_v5 = vand.u32 4294901760, %v5197_v13 }
 0x273   : > { %vm2630_vm12 = vcmp.ge.f32.partialorder %v2451_v57, 0.0  ;;  %v2694_v21 = vmul.f32 0.2, %v2451_v57  ;;  %v1441_v12 = vadd.f32 %v1440_v44, %v1129_v47  ;;  %2517 = vmatmul.f32.gmra.mxu1 %v5190_v28  ;;  %v1145_v47 = vadd.f32 %v4164_v37, %v710_v31  ;;  %v5202_v28 = vld [vmem:[#allocation30_spill] sm:$0xff] }
 0x274   : > { %v1810_v35 = vpop.f32.mrf.mxu3 }
 0x275   : > { %v2758_v7 = vsel %vm2630_vm12, %v2451_v57, %v2694_v21  ;;  %v1811_v29 = vadd.f32 %v1810_v35, %v1441_v12  ;;  %v718_v35 = vadd.f32 %v2951_v16, %v4173_v38 }
 0x276   : > { %2823 = vst.msk [vmem:[%s4210_s10 + $0xc8] sm:$0xff] %vm2797_vm2, %v2758_v7  ;;  %v2179_v11 = vpop.f32.mrf.mxu0 }
 0x277   : > { %1524 = vmatmul.f32.gmra.mxu2 %v5191_v61  ;;  %v2176_v33 = vadd.f32 %v2175_v23, %v1811_v29  ;;  %v5203_v29 = vld [vmem:[#allocation33_spill] sm:$0xff] }
 0x278   : > { %v2458_v52 = vpop.f32.mrf.mxu1 }
 0x279   : > { %v2455_v8 = vadd.f32 %v2454_v39, %v2176_v33  ;;  %1911 = vmatmul.f32.gmra.mxu3 %v5192_v58  ;;  %2242 = vmatmul.f32.gmra.mxu0 %v5193_v55  ;;  %v5204_v33 = vld [vmem:[#allocation142_spill] sm:$0xff]  ;;  %v5206_v58 = vld [vmem:[#allocation32_spill] sm:$0xff] }
 0x27a   : > { %v1445_v36 = vpop.f32.mrf.mxu2 }
 0x27b   : > { %vm2631_vm13 = vcmp.ge.f32.partialorder %v2455_v8, 0.0  ;;  %v2695_v17 = vmul.f32 0.2, %v2455_v8  ;;  %v1446_v34 = vadd.f32 %v1445_v36, %v1133_v41  ;;  %2521 = vmatmul.f32.gmra.mxu1 %v5193_v55 }
 0x27c   : > { %v1816_v43 = vpop.f32.mrf.mxu3 }
 0x27d   : > { %v2759_v49 = vsel %vm2631_vm13, %v2455_v8, %v2695_v17  ;;  %v1817_v15 = vadd.f32 %v1816_v43, %v1446_v34  ;;  %v5205_v8 = vand.u32 4294901760, %v5203_v29 }
 0x27e   : > { %2824 = vst.msk [vmem:[%s4210_s10 + $0xd0] sm:$0xff] %vm2797_vm2, %v2759_v49  ;;  %v2183_v3 = vpop.f32.mrf.mxu0  ;;  %v5207_v49 = vld [vmem:[#allocation35_spill] sm:$0xff] }
 0x27f   : > { %1529 = vmatmul.f32.gmra.mxu2 %v5194_v32  ;;  %v2180_v46 = vadd.f32 %v2179_v11, %v1817_v15 }
 0x280   : > { %v2462_v53 = vpop.f32.mrf.mxu1 }
 0x281   : > { %v2459_v54 = vadd.f32 %v2458_v52, %v2180_v46  ;;  %1917 = vmatmul.f32.gmra.mxu3 %v5195_v30  ;;  %2246 = vmatmul.f32.gmra.mxu0 %v5196_v25  ;;  %v1149_v52 = vadd.f32 %v5204_v33, %v718_v35  ;;  %v5208_v46 = vand.u32 4294901760, %v5207_v49  ;;  %v5210_v30 = vld [vmem:[#allocation44_spill] sm:$0xff] }
 0x282   : > { %v1450_v2 = vpop.f32.mrf.mxu2 }
 0x283   : > { %vm2632_vm14 = vcmp.ge.f32.partialorder %v2459_v54, 0.0  ;;  %v2696_v62 = vmul.f32 0.2, %v2459_v54  ;;  %v1451_v63 = vadd.f32 %v1450_v2, %v1137_v26  ;;  %2525 = vmatmul.f32.gmra.mxu1 %v5196_v25 }
 0x284   : > { %v1822_v51 = vpop.f32.mrf.mxu3 }
 0x285   : > { %v2760_v9 = vsel %vm2632_vm14, %v2459_v54, %v2696_v62  ;;  %v1823_v24 = vadd.f32 %v1822_v51, %v1451_v63 }
 0x286   : > { %2825 = vst.msk [vmem:[%s4210_s10 + $0xd8] sm:$0xff] %vm2797_vm2, %v2760_v9  ;;  %v2187_v0 = vpop.f32.mrf.mxu0 }
 0x287   : > { %1534 = vmatmul.f32.gmra.mxu2 %v5197_v13  ;;  %v2184_v42 = vadd.f32 %v2183_v3, %v1823_v24  ;;  %v5212_v13 = vand.u32 4294901760, %v5211_v48 }
 0x288   : > { %v2466_v1 = vpop.f32.mrf.mxu1 }
 0x289   : > { %v2463_v45 = vadd.f32 %v2462_v53, %v2184_v42  ;;  %1923 = vmatmul.f32.gmra.mxu3 %v5198_v5  ;;  %2250 = vmatmul.f32.gmra.mxu0 %v5199_v18  ;;  %v5209_v53 = vld [vmem:[#allocation34_spill] sm:$0xff]  ;;  %v5213_v42 = vld [vmem:[#allocation36_spill] sm:$0xff] }
 0x28a   : > { %v1455_v22 = vpop.f32.mrf.mxu2 }
 0x28b   : > { %vm2633_vm15 = vcmp.ge.f32.partialorder %v2463_v45, 0.0  ;;  %v2697_v4 = vmul.f32 0.2, %v2463_v45  ;;  %v1456_v6 = vadd.f32 %v1455_v22, %v1141_v60  ;;  %2529 = vmatmul.f32.gmra.mxu1 %v5199_v18 }
 0x28c   : > { %v1828_v10 = vpop.f32.mrf.mxu3 }
 0x28d   : > { %v2761_v14 = vsel %vm2633_vm15, %v2463_v45, %v2697_v4  ;;  %v1829_v59 = vadd.f32 %v1828_v10, %v1456_v6  ;;  %v5214_v45 = vld [vmem:[#allocation49_spill] sm:$0xff] }
 0x28e   : > { %2826 = vst.msk [vmem:[%s4210_s10 + $0xe0] sm:$0xff] %vm2797_vm2, %v2761_v14  ;;  %v2191_v23 = vpop.f32.mrf.mxu0  ;;  %v5215_v10 = vld [vmem:[#allocation41_spill] sm:$0xff] }
 0x28f   : > { %1539 = vmatmul.f32.gmra.mxu2 %v5200_v20  ;;  %v2188_v19 = vadd.f32 %v2187_v0, %v1829_v59  ;;  %v5216_v59 = vand.u32 4294901760, %v5215_v10 }
 0x290   : > { %v2470_v39 = vpop.f32.mrf.mxu1 }
 0x291   : > { %v2467_v57 = vadd.f32 %v2466_v1, %v2188_v19  ;;  %1929 = vmatmul.f32.gmra.mxu3 %v5201_v40  ;;  %2254 = vmatmul.f32.gmra.mxu0 %v5202_v28 }
 0x292   : > { %v1460_v44 = vpop.f32.mrf.mxu2 }
 0x293   : > { %vm2634_vm0 = vcmp.ge.f32.partialorder %v2467_v57, 0.0  ;;  %v2698_v56 = vmul.f32 0.2, %v2467_v57  ;;  %v1461_v21 = vadd.f32 %v1460_v44, %v1145_v47  ;;  %2533 = vmatmul.f32.gmra.mxu1 %v5202_v28 }
 0x294   : > { %v1834_v12 = vpop.f32.mrf.mxu3 }
 0x295   : > { %v2762_v27 = vsel %vm2634_vm0, %v2467_v57, %v2698_v56  ;;  %v1835_v7 = vadd.f32 %v1834_v12, %v1461_v21  ;;  %v5219_v56 = vld [vmem:[#allocation46_spill] sm:$0xff] }
 0x296   : > { %2827 = vst.msk [vmem:[%s4210_s10 + $0xe8] sm:$0xff] %vm2797_vm2, %v2762_v27  ;;  %v2195_v37 = vpop.f32.mrf.mxu0  ;;  %v5220_v27 = vand.u32 4294901760, %v5219_v56 }
 0x297   : > { %1544 = vmatmul.f32.gmra.mxu2 %v5203_v29  ;;  %v2192_v11 = vadd.f32 %v2191_v23, %v1835_v7  ;;  %v5217_v23 = vld [vmem:[#allocation39_spill] sm:$0xff] }
 0x298   : > { %v2474_v61 = vpop.f32.mrf.mxu1  ;;  %v5221_v7 = vld [vmem:[#allocation43_spill] sm:$0xff] }
 0x299   : > { %v2471_v41 = vadd.f32 %v2470_v39, %v2192_v11  ;;  %1935 = vmatmul.f32.gmra.mxu3 %v5205_v8  ;;  %2258 = vmatmul.f32.gmra.mxu0 %v5206_v58  ;;  %v5218_v39 = vld [vmem:[#allocation56_spill] sm:$0xff]  ;;  %v5222_v11 = vld [vmem:[#allocation63_spill] sm:$0xff] }
 0x29a   : > { %v1465_v55 = vpop.f32.mrf.mxu2 }
 0x29b   : > { %vm2635_vm1 = vcmp.ge.f32.partialorder %v2471_v41, 0.0  ;;  %v2699_v38 = vmul.f32 0.2, %v2471_v41  ;;  %v1466_v36 = vadd.f32 %v1465_v55, %v1149_v52  ;;  %2537 = vmatmul.f32.gmra.mxu1 %v5206_v58  ;;  %v5223_v58 = vld [vmem:[#allocation52_spill] sm:$0xff] }
 0x29c   : > { %v1840_v17 = vpop.f32.mrf.mxu3 }
 0x29d   : > { %v2763_v34 = vsel %vm2635_vm1, %v2471_v41, %v2699_v38  ;;  %v1841_v43 = vadd.f32 %v1840_v17, %v1466_v36  ;;  %v5224_v17 = vand.u32 4294901760, %v5223_v58 }
 0x29e   : > { %2828 = vst.msk [vmem:[%s4210_s10 + $0xf0] sm:$0xff] %vm2797_vm2, %v2763_v34  ;;  %v2199_v50 = vpop.f32.mrf.mxu0  ;;  %v5225_v34 = vld [vmem:[#allocation48_spill] sm:$0xff] }
 0x29f   : > { %1549 = vmatmul.f32.gmra.mxu2 %v5207_v49  ;;  %v2196_v15 = vadd.f32 %v2195_v37, %v1841_v43  ;;  %v5226_v49 = vld [vmem:[#allocation70_spill] sm:$0xff] }
 0x2a0   : > { %v2478_v3 = vpop.f32.mrf.mxu1 }
 0x2a1   : > { %v2475_v32 = vadd.f32 %v2474_v61, %v2196_v15  ;;  %1941 = vmatmul.f32.gmra.mxu3 %v5208_v46  ;;  %2262 = vmatmul.f32.gmra.mxu0 %v5209_v53 }
 0x2a2   : > { %v1470_v26 = vpop.f32.mrf.mxu2 }
 0x2a3   : > { %vm2636_vm3 = vcmp.ge.f32.partialorder %v2475_v32, 0.0  ;;  %v2700_v54 = vmul.f32 0.2, %v2475_v32  ;;  %v1471_v25 = vadd.f32 %v1470_v26, %v5210_v30  ;;  %2541 = vmatmul.f32.gmra.mxu1 %v5209_v53  ;;  %v5227_v26 = vld [vmem:[#allocation59_spill] sm:$0xff] }
 0x2a4   : > { %v1846_v2 = vpop.f32.mrf.mxu3 }
 0x2a5   : > { %v2764_v62 = vsel %vm2636_vm3, %v2475_v32, %v2700_v54  ;;  %v1847_v63 = vadd.f32 %v1846_v2, %v1471_v25  ;;  %v5228_v2 = vand.u32 4294901760, %v5227_v26 }
 0x2a6   : > { %2829 = vst.msk [vmem:[%s4210_s10 + $0xf8] sm:$0xff] %vm2797_vm2, %v2764_v62  ;;  %v2203_v51 = vpop.f32.mrf.mxu0  ;;  %v5229_v62 = vld [vmem:[#allocation55_spill] sm:$0xff] }
 0x2a7   : > { %1554 = vmatmul.f32.gmra.mxu2 %v5211_v48  ;;  %v2200_v9 = vadd.f32 %v2199_v50, %v1847_v63  ;;  %v5230_v48 = vld [vmem:[#allocation77_spill] sm:$0xff] }
 0x2a8   : > { %v2482_v24 = vpop.f32.mrf.mxu1 }
 0x2a9   : > { %v2479_v0 = vadd.f32 %v2478_v3, %v2200_v9  ;;  %1947 = vmatmul.f32.gmra.mxu3 %v5212_v13  ;;  %2266 = vmatmul.f32.gmra.mxu0 %v5213_v42 }
 0x2aa   : > { %v1475_v1 = vpop.f32.mrf.mxu2 }
 0x2ab   : > { %vm2637_vm4 = vcmp.ge.f32.partialorder %v2479_v0, 0.0  ;;  %v2701_v60 = vmul.f32 0.2, %v2479_v0  ;;  %v1476_v5 = vadd.f32 %v1475_v1, %v5214_v45  ;;  %2545 = vmatmul.f32.gmra.mxu1 %v5213_v42  ;;  %v5231_v1 = vld [vmem:[#allocation66_spill] sm:$0xff] }
 0x2ac   : > { %v1852_v18 = vpop.f32.mrf.mxu3 }
 0x2ad   : > { %v2765_v22 = vsel %vm2637_vm4, %v2479_v0, %v2701_v60  ;;  %v1853_v4 = vadd.f32 %v1852_v18, %v1476_v5  ;;  %v5232_v18 = vand.u32 4294901760, %v5231_v1 }
 0x2ae   : > { %2830 = vst.msk [vmem:[%s4210_s10 + $0x100] sm:$0xff] %vm2797_vm2, %v2765_v22  ;;  %v2207_v6 = vpop.f32.mrf.mxu0  ;;  %v5233_v22 = vld [vmem:[#allocation62_spill] sm:$0xff] }
 0x2af   : > { %1559 = vmatmul.f32.gmra.mxu2 %v5215_v10  ;;  %v2204_v16 = vadd.f32 %v2203_v51, %v1853_v4  ;;  %v5234_v10 = vld [vmem:[#allocation84_spill] sm:$0xff] }
 0x2b0   : > { %v2486_v31 = vpop.f32.mrf.mxu1 }
 0x2b1   : > { %v2483_v14 = vadd.f32 %v2482_v24, %v2204_v16  ;;  %1953 = vmatmul.f32.gmra.mxu3 %v5216_v59  ;;  %2270 = vmatmul.f32.gmra.mxu0 %v5217_v23 }
 0x2b2   : > { %v1480_v20 = vpop.f32.mrf.mxu2 }
 0x2b3   : > { %vm2638_vm5 = vcmp.ge.f32.partialorder %v2483_v14, 0.0  ;;  %v2702_v19 = vmul.f32 0.2, %v2483_v14  ;;  %v1481_v47 = vadd.f32 %v1480_v20, %v5218_v39  ;;  %2549 = vmatmul.f32.gmra.mxu1 %v5217_v23  ;;  %v5235_v20 = vld [vmem:[#allocation73_spill] sm:$0xff] }
 0x2b4   : > { %v1858_v57 = vpop.f32.mrf.mxu3 }
 0x2b5   : > { %v2766_v40 = vsel %vm2638_vm5, %v2483_v14, %v2702_v19  ;;  %v1859_v28 = vadd.f32 %v1858_v57, %v1481_v47  ;;  %v5236_v57 = vand.u32 4294901760, %v5235_v20 }
 0x2b6   : > { %2831 = vst.msk [vmem:[%s4210_s10 + $0x108] sm:$0xff] %vm2797_vm2, %v2766_v40  ;;  %v2211_v44 = vpop.f32.mrf.mxu0  ;;  %v5237_v40 = vld [vmem:[#allocation69_spill] sm:$0xff] }
 0x2b7   : > { %1564 = vmatmul.f32.gmra.mxu2 %v5219_v56  ;;  %v2208_v21 = vadd.f32 %v2207_v6, %v1859_v28  ;;  %v5238_v56 = vld [vmem:[#allocation91_spill] sm:$0xff] }
 0x2b8   : > { %v2490_v12 = vpop.f32.mrf.mxu1 }
 0x2b9   : > { %v2487_v35 = vadd.f32 %v2486_v31, %v2208_v21  ;;  %1959 = vmatmul.f32.gmra.mxu3 %v5220_v27  ;;  %2274 = vmatmul.f32.gmra.mxu0 %v5221_v7 }
 0x2ba   : > { %v1485_v37 = vpop.f32.mrf.mxu2 }
 0x2bb   : > { %vm2639_vm6 = vcmp.ge.f32.partialorder %v2487_v35, 0.0  ;;  %v2703_v29 = vmul.f32 0.2, %v2487_v35  ;;  %v1486_v61 = vadd.f32 %v1485_v37, %v5222_v11  ;;  %2553 = vmatmul.f32.gmra.mxu1 %v5221_v7  ;;  %v5239_v37 = vld [vmem:[#allocation80_spill] sm:$0xff] }
 0x2bc   : > { %v1864_v33 = vpop.f32.mrf.mxu3 }
 0x2bd   : > { %v2767_v52 = vsel %vm2639_vm6, %v2487_v35, %v2703_v29  ;;  %v1865_v41 = vadd.f32 %v1864_v33, %v1486_v61  ;;  %v5240_v33 = vand.u32 4294901760, %v5239_v37 }
 0x2be   : > { %2832 = vst.msk [vmem:[%s4210_s10 + $0x110] sm:$0xff] %vm2797_vm2, %v2767_v52  ;;  %v2215_v8 = vpop.f32.mrf.mxu0  ;;  %v5241_v52 = vld [vmem:[#allocation76_spill] sm:$0xff] }
 0x2bf   : > { %1569 = vmatmul.f32.gmra.mxu2 %v5223_v58  ;;  %v2212_v55 = vadd.f32 %v2211_v44, %v1865_v41  ;;  %v5242_v58 = vld [vmem:[#allocation98_spill] sm:$0xff] }
 0x2c0   : > { %v2494_v38 = vpop.f32.mrf.mxu1 }
 0x2c1   : > { %v2491_v36 = vadd.f32 %v2490_v12, %v2212_v55  ;;  %1965 = vmatmul.f32.gmra.mxu3 %v5224_v17  ;;  %2278 = vmatmul.f32.gmra.mxu0 %v5225_v34 }
 0x2c2   : > { %v1490_v43 = vpop.f32.mrf.mxu2 }
 0x2c3   : > { %vm2640_vm7 = vcmp.ge.f32.partialorder %v2491_v36, 0.0  ;;  %v2704_v50 = vmul.f32 0.2, %v2491_v36  ;;  %v1491_v15 = vadd.f32 %v1490_v43, %v5226_v49  ;;  %2557 = vmatmul.f32.gmra.mxu1 %v5225_v34  ;;  %v5243_v43 = vld [vmem:[#allocation87_spill] sm:$0xff] }
 0x2c4   : > { %v1870_v3 = vpop.f32.mrf.mxu3 }
 0x2c5   : > { %v2768_v32 = vsel %vm2640_vm7, %v2491_v36, %v2704_v50  ;;  %v1871_v46 = vadd.f32 %v1870_v3, %v1491_v15  ;;  %v5244_v3 = vand.u32 4294901760, %v5243_v43 }
 0x2c6   : > { %2833 = vst.msk [vmem:[%s4210_s10 + $0x118] sm:$0xff] %vm2797_vm2, %v2768_v32  ;;  %v2219_v53 = vpop.f32.mrf.mxu0  ;;  %v5245_v32 = vld [vmem:[#allocation83_spill] sm:$0xff] }
 0x2c7   : > { %1574 = vmatmul.f32.gmra.mxu2 %v5227_v26  ;;  %v2216_v54 = vadd.f32 %v2215_v8, %v1871_v46  ;;  %v5246_v26 = vld [vmem:[#allocation105_spill] sm:$0xff] }
 0x2c8   : > { %v2498_v30 = vpop.f32.mrf.mxu1 }
 0x2c9   : > { %v2495_v25 = vadd.f32 %v2494_v38, %v2216_v54  ;;  %1971 = vmatmul.f32.gmra.mxu3 %v5228_v2  ;;  %2282 = vmatmul.f32.gmra.mxu0 %v5229_v62 }
 0x2ca   : > { %v1495_v63 = vpop.f32.mrf.mxu2 }
 0x2cb   : > { %vm2641_vm8 = vcmp.ge.f32.partialorder %v2495_v25, 0.0  ;;  %v2705_v51 = vmul.f32 0.2, %v2495_v25  ;;  %v1496_v9 = vadd.f32 %v1495_v63, %v5230_v48  ;;  %2561 = vmatmul.f32.gmra.mxu1 %v5229_v62  ;;  %v5247_v63 = vld [vmem:[#allocation94_spill] sm:$0xff] }
 0x2cc   : > { %v1876_v24 = vpop.f32.mrf.mxu3 }
 0x2cd   : > { %v2769_v0 = vsel %vm2641_vm8, %v2495_v25, %v2705_v51  ;;  %v1877_v13 = vadd.f32 %v1876_v24, %v1496_v9  ;;  %v5248_v24 = vand.u32 4294901760, %v5247_v63 }
 0x2ce   : > { %2834 = vst.msk [vmem:[%s4210_s10 + $0x120] sm:$0xff] %vm2797_vm2, %v2769_v0  ;;  %v2223_v42 = vpop.f32.mrf.mxu0  ;;  %v5249_v0 = vld [vmem:[#allocation90_spill] sm:$0xff] }
 0x2cf   : > { %1579 = vmatmul.f32.gmra.mxu2 %v5231_v1  ;;  %v2220_v60 = vadd.f32 %v2219_v53, %v1877_v13  ;;  %v5250_v1 = vld [vmem:[#allocation111_spill] sm:$0xff] }
 0x2d0   : > { %v2502_v45 = vpop.f32.mrf.mxu1 }
 0x2d1   : > { %v2499_v5 = vadd.f32 %v2498_v30, %v2220_v60  ;;  %1977 = vmatmul.f32.gmra.mxu3 %v5232_v18  ;;  %2286 = vmatmul.f32.gmra.mxu0 %v5233_v22 }
 0x2d2   : > { %v1500_v4 = vpop.f32.mrf.mxu2 }
 0x2d3   : > { %vm2642_vm9 = vcmp.ge.f32.partialorder %v2499_v5, 0.0  ;;  %v2706_v6 = vmul.f32 0.2, %v2499_v5  ;;  %v1501_v16 = vadd.f32 %v1500_v4, %v5234_v10  ;;  %2565 = vmatmul.f32.gmra.mxu1 %v5233_v22  ;;  %v5251_v4 = vld [vmem:[#allocation101_spill] sm:$0xff] }
 0x2d4   : > { %v1882_v31 = vpop.f32.mrf.mxu3 }
 0x2d5   : > { %v2770_v14 = vsel %vm2642_vm9, %v2499_v5, %v2706_v6  ;;  %v1883_v59 = vadd.f32 %v1882_v31, %v1501_v16  ;;  %v5252_v31 = vand.u32 4294901760, %v5251_v4 }
 0x2d6   : > { %2835 = vst.msk [vmem:[%s4210_s10 + $0x128] sm:$0xff] %vm2797_vm2, %v2770_v14  ;;  %v2227_v23 = vpop.f32.mrf.mxu0  ;;  %v5253_v14 = vld [vmem:[#allocation97_spill] sm:$0xff] }
 0x2d7   : > { %1584 = vmatmul.f32.gmra.mxu2 %v5235_v20  ;;  %v2224_v19 = vadd.f32 %v2223_v42, %v1883_v59  ;;  %v5254_v20 = vld [vmem:[#allocation117_spill] sm:$0xff] }
 0x2d8   : > { %v2506_v39 = vpop.f32.mrf.mxu1 }
 0x2d9   : > { %v2503_v47 = vadd.f32 %v2502_v45, %v2224_v19  ;;  %1983 = vmatmul.f32.gmra.mxu3 %v5236_v57  ;;  %2290 = vmatmul.f32.gmra.mxu0 %v5237_v40 }
 0x2da   : > { %v1505_v28 = vpop.f32.mrf.mxu2 }
 0x2db   : > { %vm2643_vm10 = vcmp.ge.f32.partialorder %v2503_v47, 0.0  ;;  %v2707_v44 = vmul.f32 0.2, %v2503_v47  ;;  %v1506_v21 = vadd.f32 %v1505_v28, %v5238_v56  ;;  %2569 = vmatmul.f32.gmra.mxu1 %v5237_v40  ;;  %v5255_v28 = vld [vmem:[#allocation107_spill] sm:$0xff] }
 0x2dc   : > { %v1888_v12 = vpop.f32.mrf.mxu3 }
 0x2dd   : > { %v2771_v35 = vsel %vm2643_vm10, %v2503_v47, %v2707_v44  ;;  %v1889_v27 = vadd.f32 %v1888_v12, %v1506_v21  ;;  %v5256_v12 = vand.u32 4294901760, %v5255_v28 }
 0x2de   : > { %2836 = vst.msk [vmem:[%s4210_s10 + $0x130] sm:$0xff] %vm2797_vm2, %v2771_v35  ;;  %v2231_v7 = vpop.f32.mrf.mxu0  ;;  %v5257_v35 = vld [vmem:[#allocation104_spill] sm:$0xff] }
 0x2df   : > { %1589 = vmatmul.f32.gmra.mxu2 %v5239_v37  ;;  %v2228_v29 = vadd.f32 %v2227_v23, %v1889_v27  ;;  %v5258_v37 = vld [vmem:[#allocation121_spill] sm:$0xff] }
 0x2e0   : > { %v2510_v11 = vpop.f32.mrf.mxu1 }
 0x2e1   : > { %v2507_v61 = vadd.f32 %v2506_v39, %v2228_v29  ;;  %1989 = vmatmul.f32.gmra.mxu3 %v5240_v33  ;;  %2294 = vmatmul.f32.gmra.mxu0 %v5241_v52 }
 0x2e2   : > { %v1510_v41 = vpop.f32.mrf.mxu2 }
 0x2e3   : > { %vm2644_vm11 = vcmp.ge.f32.partialorder %v2507_v61, 0.0  ;;  %v2708_v8 = vmul.f32 0.2, %v2507_v61  ;;  %v1511_v55 = vadd.f32 %v1510_v41, %v5242_v58  ;;  %2573 = vmatmul.f32.gmra.mxu1 %v5241_v52  ;;  %v5259_v41 = vld [vmem:[#allocation113_spill] sm:$0xff] }
 0x2e4   : > { %v1894_v38 = vpop.f32.mrf.mxu3 }
 0x2e5   : > { %v2772_v36 = vsel %vm2644_vm11, %v2507_v61, %v2708_v8  ;;  %v1895_v17 = vadd.f32 %v1894_v38, %v1511_v55  ;;  %v5260_v38 = vand.u32 4294901760, %v5259_v41 }
 0x2e6   : > { %2837 = vst.msk [vmem:[%s4210_s10 + $0x138] sm:$0xff] %vm2797_vm2, %v2772_v36  ;;  %v2235_v34 = vpop.f32.mrf.mxu0  ;;  %v5261_v36 = vld [vmem:[#allocation110_spill] sm:$0xff] }
 0x2e7   : > { %1594 = vmatmul.f32.gmra.mxu2 %v5243_v43  ;;  %v2232_v50 = vadd.f32 %v2231_v7, %v1895_v17  ;;  %v5262_v43 = vld [vmem:[#allocation124_spill] sm:$0xff] }
 0x2e8   : > { %v2514_v49 = vpop.f32.mrf.mxu1 }
 0x2e9   : > { %v2511_v15 = vadd.f32 %v2510_v11, %v2232_v50  ;;  %1995 = vmatmul.f32.gmra.mxu3 %v5244_v3  ;;  %2298 = vmatmul.f32.gmra.mxu0 %v5245_v32 }
 0x2ea   : > { %v1515_v46 = vpop.f32.mrf.mxu2 }
 0x2eb   : > { %vm2645_vm12 = vcmp.ge.f32.partialorder %v2511_v15, 0.0  ;;  %v2709_v53 = vmul.f32 0.2, %v2511_v15  ;;  %v1516_v54 = vadd.f32 %v1515_v46, %v5246_v26  ;;  %2577 = vmatmul.f32.gmra.mxu1 %v5245_v32  ;;  %v5263_v46 = vld [vmem:[#allocation118_spill] sm:$0xff] }
 0x2ec   : > { %v1900_v30 = vpop.f32.mrf.mxu3 }
 0x2ed   : > { %v2773_v25 = vsel %vm2645_vm12, %v2511_v15, %v2709_v53  ;;  %v1901_v2 = vadd.f32 %v1900_v30, %v1516_v54  ;;  %v5264_v30 = vand.u32 4294901760, %v5263_v46 }
 0x2ee   : > { %2838 = vst.msk [vmem:[%s4210_s10 + $0x140] sm:$0xff] %vm2797_vm2, %v2773_v25  ;;  %v2239_v62 = vpop.f32.mrf.mxu0  ;;  %v5265_v25 = vld [vmem:[#allocation116_spill] sm:$0xff] }
 0x2ef   : > { %1599 = vmatmul.f32.gmra.mxu2 %v5247_v63  ;;  %v2236_v51 = vadd.f32 %v2235_v34, %v1901_v2  ;;  %v5266_v63 = vld [vmem:[#allocation125_spill] sm:$0xff] }
 0x2f0   : > { %v2518_v48 = vpop.f32.mrf.mxu1 }
 0x2f1   : > { %v2515_v9 = vadd.f32 %v2514_v49, %v2236_v51  ;;  %2001 = vmatmul.f32.gmra.mxu3 %v5248_v24  ;;  %2302 = vmatmul.f32.gmra.mxu0 %v5249_v0 }
 0x2f2   : > { %v1520_v13 = vpop.f32.mrf.mxu2 }
 0x2f3   : > { %vm2646_vm13 = vcmp.ge.f32.partialorder %v2515_v9, 0.0  ;;  %v2710_v42 = vmul.f32 0.2, %v2515_v9  ;;  %v1521_v60 = vadd.f32 %v1520_v13, %v5250_v1  ;;  %2581 = vmatmul.f32.gmra.mxu1 %v5249_v0  ;;  %v5267_v13 = vld [vmem:[#allocation122_spill] sm:$0xff] }
 0x2f4   : > { %v1906_v45 = vpop.f32.mrf.mxu3 }
 0x2f5   : > { %v2774_v5 = vsel %vm2646_vm13, %v2515_v9, %v2710_v42  ;;  %v1907_v18 = vadd.f32 %v1906_v45, %v1521_v60  ;;  %v5268_v45 = vand.u32 4294901760, %v5267_v13 }
 0x2f6   : > { %2839 = vst.msk [vmem:[%s4210_s10 + $0x148] sm:$0xff] %vm2797_vm2, %v2774_v5  ;;  %v2243_v22 = vpop.f32.mrf.mxu0  ;;  %v5269_v5 = vld [vmem:[#allocation120_spill] sm:$0xff] }
 0x2f7   : > { %1604 = vmatmul.f32.gmra.mxu2 %v5251_v4  ;;  %v2240_v6 = vadd.f32 %v2239_v62, %v1907_v18  ;;  %v5270_v4 = vld [vmem:[#allocation126_spill] sm:$0xff] }
 0x2f8   : > { %v2522_v10 = vpop.f32.mrf.mxu1 }
 0x2f9   : > { %v2519_v16 = vadd.f32 %v2518_v48, %v2240_v6  ;;  %2007 = vmatmul.f32.gmra.mxu3 %v5252_v31  ;;  %2306 = vmatmul.f32.gmra.mxu0 %v5253_v14 }
 0x2fa   : > { %v1525_v59 = vpop.f32.mrf.mxu2 }
 0x2fb   : > { %vm2647_vm14 = vcmp.ge.f32.partialorder %v2519_v16, 0.0  ;;  %v2711_v23 = vmul.f32 0.2, %v2519_v16  ;;  %v1526_v19 = vadd.f32 %v1525_v59, %v5254_v20  ;;  %2585 = vmatmul.f32.gmra.mxu1 %v5253_v14 }
 0x2fc   : > { %v1912_v39 = vpop.f32.mrf.mxu3 }
 0x2fd   : > { %v2775_v47 = vsel %vm2647_vm14, %v2519_v16, %v2711_v23  ;;  %v1913_v57 = vadd.f32 %v1912_v39, %v1526_v19 }
 0x2fe   : > { %2840 = vst.msk [vmem:[%s4210_s10 + $0x150] sm:$0xff] %vm2797_vm2, %v2775_v47  ;;  %v2247_v40 = vpop.f32.mrf.mxu0  ;;  %v5271_v47 = vld [vmem:[#allocation127_spill] sm:$0xff] }
 0x2ff   : > { %1609 = vmatmul.f32.gmra.mxu2 %v5255_v28  ;;  %v2244_v44 = vadd.f32 %v2243_v22, %v1913_v57 }
 0x300   : > { %v2526_v56 = vpop.f32.mrf.mxu1 }
 0x301   : > { %v2523_v21 = vadd.f32 %v2522_v10, %v2244_v44  ;;  %2013 = vmatmul.f32.gmra.mxu3 %v5256_v12  ;;  %2310 = vmatmul.f32.gmra.mxu0 %v5257_v35 }
 0x302   : > { %v1530_v27 = vpop.f32.mrf.mxu2 }
 0x303   : > { %vm2648_vm15 = vcmp.ge.f32.partialorder %v2523_v21, 0.0  ;;  %v2712_v7 = vmul.f32 0.2, %v2523_v21  ;;  %v1531_v29 = vadd.f32 %v1530_v27, %v5258_v37  ;;  %2589 = vmatmul.f32.gmra.mxu1 %v5257_v35  ;;  %v5272_v37 = vld [vmem:[#allocation128_spill] sm:$0xff] }
 0x304   : > { %v1918_v11 = vpop.f32.mrf.mxu3 }
 0x305   : > { %v2776_v61 = vsel %vm2648_vm15, %v2523_v21, %v2712_v7  ;;  %v1919_v33 = vadd.f32 %v1918_v11, %v1531_v29 }
 0x306   : > { %2841 = vst.msk [vmem:[%s4210_s10 + $0x158] sm:$0xff] %vm2797_vm2, %v2776_v61  ;;  %v2251_v52 = vpop.f32.mrf.mxu0 }
 0x307   : > { %1614 = vmatmul.f32.gmra.mxu2 %v5259_v41  ;;  %v2248_v8 = vadd.f32 %v2247_v40, %v1919_v33 }
 0x308   : > { %v2530_v58 = vpop.f32.mrf.mxu1 }
 0x309   : > { %v2527_v55 = vadd.f32 %v2526_v56, %v2248_v8  ;;  %2019 = vmatmul.f32.gmra.mxu3 %v5260_v38  ;;  %2314 = vmatmul.f32.gmra.mxu0 %v5261_v36 }
 0x30a   : > { %v1535_v17 = vpop.f32.mrf.mxu2 }
 0x30b   : > { %vm2649_vm0 = vcmp.ge.f32.partialorder %v2527_v55, 0.0  ;;  %v2713_v34 = vmul.f32 0.2, %v2527_v55  ;;  %v1536_v50 = vadd.f32 %v1535_v17, %v5262_v43  ;;  %2593 = vmatmul.f32.gmra.mxu1 %v5261_v36  ;;  %v5273_v36 = vld [vmem:[#allocation129_spill] sm:$0xff] }
 0x30c   : > { %v1924_v49 = vpop.f32.mrf.mxu3 }
 0x30d   : > { %v2777_v15 = vsel %vm2649_vm0, %v2527_v55, %v2713_v34  ;;  %v1925_v3 = vadd.f32 %v1924_v49, %v1536_v50 }
 0x30e   : > { %2842 = vst.msk [vmem:[%s4210_s10 + $0x160] sm:$0xff] %vm2797_vm2, %v2777_v15  ;;  %v2255_v32 = vpop.f32.mrf.mxu0 }
 0x30f   : > { %1619 = vmatmul.f32.gmra.mxu2 %v5263_v46  ;;  %v2252_v53 = vadd.f32 %v2251_v52, %v1925_v3 }
 0x310   : > { %v2534_v26 = vpop.f32.mrf.mxu1 }
 0x311   : > { %v2531_v54 = vadd.f32 %v2530_v58, %v2252_v53  ;;  %2025 = vmatmul.f32.gmra.mxu3 %v5264_v30  ;;  %2318 = vmatmul.f32.gmra.mxu0 %v5265_v25 }
 0x312   : > { %v1540_v2 = vpop.f32.mrf.mxu2 }
 0x313   : > { %vm2650_vm1 = vcmp.ge.f32.partialorder %v2531_v54, 0.0  ;;  %v2714_v62 = vmul.f32 0.2, %v2531_v54  ;;  %v1541_v51 = vadd.f32 %v1540_v2, %v5266_v63  ;;  %2597 = vmatmul.f32.gmra.mxu1 %v5265_v25 }
 0x314   : > { %v1930_v48 = vpop.f32.mrf.mxu3 }
 0x315   : > { %v2778_v9 = vsel %vm2650_vm1, %v2531_v54, %v2714_v62  ;;  %v1931_v24 = vadd.f32 %v1930_v48, %v1541_v51 }
 0x316   : > { %2843 = vst.msk [vmem:[%s4210_s10 + $0x168] sm:$0xff] %vm2797_vm2, %v2778_v9  ;;  %v2259_v0 = vpop.f32.mrf.mxu0 }
 0x317   : > { %1624 = vmatmul.f32.gmra.mxu2 %v5267_v13  ;;  %v2256_v42 = vadd.f32 %v2255_v32, %v1931_v24 }
 0x318   : > { %v2538_v1 = vpop.f32.mrf.mxu1 }
 0x319   : > { %v2535_v60 = vadd.f32 %v2534_v26, %v2256_v42  ;;  %2031 = vmatmul.f32.gmra.mxu3 %v5268_v45  ;;  %2322 = vmatmul.f32.gmra.mxu0 %v5269_v5  ;;  %v5274_v26 = vld [vmem:[#allocation130_spill] sm:$0xff] }
 0x31a   : > { %v1545_v18 = vpop.f32.mrf.mxu2 }
 0x31b   : > { %vm2651_vm3 = vcmp.ge.f32.partialorder %v2535_v60, 0.0  ;;  %v2715_v22 = vmul.f32 0.2, %v2535_v60  ;;  %v1546_v6 = vadd.f32 %v1545_v18, %v5270_v4  ;;  %2601 = vmatmul.f32.gmra.mxu1 %v5269_v5 }
 0x31c   : > { %v1936_v10 = vpop.f32.mrf.mxu3 }
 0x31d   : > { %v2779_v16 = vsel %vm2651_vm3, %v2535_v60, %v2715_v22  ;;  %v1937_v31 = vadd.f32 %v1936_v10, %v1546_v6  ;;  %v5276_v10 = vld [vmem:[#allocation132_spill] sm:$0xff] }
 0x31e   : > { %2844 = vst.msk [vmem:[%s4210_s10 + $0x170] sm:$0xff] %vm2797_vm2, %v2779_v16  ;;  %v2263_v14 = vpop.f32.mrf.mxu0 }
 0x31f   : > { %v2260_v59 = vadd.f32 %v2259_v0, %v1937_v31  ;;  %v5275_v0 = vld [vmem:[#allocation131_spill] sm:$0xff] }
 0x320   : > { %v2542_v23 = vpop.f32.mrf.mxu1 }
 0x321   : > { %v2539_v20 = vadd.f32 %v2538_v1, %v2260_v59 }
 0x322   : > { %v1550_v19 = vpop.f32.mrf.mxu2 }
 0x323   : > { %vm2652_vm4 = vcmp.ge.f32.partialorder %v2539_v20, 0.0  ;;  %v2716_v39 = vmul.f32 0.2, %v2539_v20  ;;  %v1551_v57 = vadd.f32 %v1550_v19, %v5271_v47 }
 0x324   : > { %v1942_v40 = vpop.f32.mrf.mxu3 }
 0x325   : > { %v2780_v28 = vsel %vm2652_vm4, %v2539_v20, %v2716_v39  ;;  %v1943_v44 = vadd.f32 %v1942_v40, %v1551_v57  ;;  %v5277_v40 = vld [vmem:[#allocation133_spill] sm:$0xff] }
 0x326   : > { %2845 = vst.msk [vmem:[%s4210_s10 + $0x178] sm:$0xff] %vm2797_vm2, %v2780_v28  ;;  %v2267_v56 = vpop.f32.mrf.mxu0 }
 0x327   : > { %v2264_v21 = vadd.f32 %v2263_v14, %v1943_v44 }
 0x328   : > { %v2546_v12 = vpop.f32.mrf.mxu1 }
 0x329   : > { %v2543_v35 = vadd.f32 %v2542_v23, %v2264_v21 }
 0x32a   : > { %v1555_v27 = vpop.f32.mrf.mxu2 }
 0x32b   : > { %vm2653_vm5 = vcmp.ge.f32.partialorder %v2543_v35, 0.0  ;;  %v2717_v7 = vmul.f32 0.2, %v2543_v35  ;;  %v1556_v29 = vadd.f32 %v1555_v27, %v5272_v37 }
 0x32c   : > { %v1948_v11 = vpop.f32.mrf.mxu3 }
 0x32d   : > { %v2781_v61 = vsel %vm2653_vm5, %v2543_v35, %v2717_v7  ;;  %v1949_v33 = vadd.f32 %v1948_v11, %v1556_v29  ;;  %v5278_v11 = vld [vmem:[#allocation134_spill] sm:$0xff] }
 0x32e   : > { %2846 = vst.msk [vmem:[%s4210_s10 + $0x180] sm:$0xff] %vm2797_vm2, %v2781_v61  ;;  %v2271_v52 = vpop.f32.mrf.mxu0 }
 0x32f   : > { %v2268_v41 = vadd.f32 %v2267_v56, %v1949_v33 }
 0x330   : > { %v2550_v8 = vpop.f32.mrf.mxu1 }
 0x331   : > { %v2547_v58 = vadd.f32 %v2546_v12, %v2268_v41 }
 0x332   : > { %v1560_v55 = vpop.f32.mrf.mxu2 }
 0x333   : > { %vm2654_vm6 = vcmp.ge.f32.partialorder %v2547_v58, 0.0  ;;  %v2718_v38 = vmul.f32 0.2, %v2547_v58  ;;  %v1561_v17 = vadd.f32 %v1560_v55, %v5273_v36 }
 0x334   : > { %v1954_v34 = vpop.f32.mrf.mxu3 }
 0x335   : > { %v2782_v43 = vsel %vm2654_vm6, %v2547_v58, %v2718_v38  ;;  %v1955_v50 = vadd.f32 %v1954_v34, %v1561_v17  ;;  %v5279_v34 = vld [vmem:[#allocation135_spill] sm:$0xff] }
 0x336   : > { %2847 = vst.msk [vmem:[%s4210_s10 + $0x188] sm:$0xff] %vm2797_vm2, %v2782_v43  ;;  %v2275_v49 = vpop.f32.mrf.mxu0 }
 0x337   : > { %v2272_v15 = vadd.f32 %v2271_v52, %v1955_v50 }
 0x338   : > { %v2554_v3 = vpop.f32.mrf.mxu1 }
 0x339   : > { %v2551_v32 = vadd.f32 %v2550_v8, %v2272_v15 }
 0x33a   : > { %v1565_v46 = vpop.f32.mrf.mxu2 }
 0x33b   : > { %vm2655_vm7 = vcmp.ge.f32.partialorder %v2551_v32, 0.0  ;;  %v2719_v53 = vmul.f32 0.2, %v2551_v32  ;;  %v1566_v54 = vadd.f32 %v1565_v46, %v5274_v26 }
 0x33c   : > { %v1960_v30 = vpop.f32.mrf.mxu3 }
 0x33d   : > { %v2783_v25 = vsel %vm2655_vm7, %v2551_v32, %v2719_v53  ;;  %v1961_v2 = vadd.f32 %v1960_v30, %v1566_v54  ;;  %v5280_v30 = vld [vmem:[#allocation136_spill] sm:$0xff] }
 0x33e   : > { %2848 = vst.msk [vmem:[%s4210_s10 + $0x190] sm:$0xff] %vm2797_vm2, %v2783_v25  ;;  %v2279_v62 = vpop.f32.mrf.mxu0 }
 0x33f   : > { %v2276_v63 = vadd.f32 %v2275_v49, %v1961_v2 }
 0x340   : > { %v2558_v51 = vpop.f32.mrf.mxu1 }
 0x341   : > { %v2555_v48 = vadd.f32 %v2554_v3, %v2276_v63 }
 0x342   : > { %v1570_v9 = vpop.f32.mrf.mxu2 }
 0x343   : > { %vm2656_vm8 = vcmp.ge.f32.partialorder %v2555_v48, 0.0  ;;  %v2720_v24 = vmul.f32 0.2, %v2555_v48  ;;  %v1571_v13 = vadd.f32 %v1570_v9, %v5275_v0 }
 0x344   : > { %v1966_v42 = vpop.f32.mrf.mxu3 }
 0x345   : > { %v2784_v1 = vsel %vm2656_vm8, %v2555_v48, %v2720_v24  ;;  %v1967_v60 = vadd.f32 %v1966_v42, %v1571_v13  ;;  %v5281_v42 = vld [vmem:[#allocation137_spill] sm:$0xff] }
 0x346   : > { %2849 = vst.msk [vmem:[%s4210_s10 + $0x198] sm:$0xff] %vm2797_vm2, %v2784_v1  ;;  %v2283_v45 = vpop.f32.mrf.mxu0 }
 0x347   : > { %v2280_v5 = vadd.f32 %v2279_v62, %v1967_v60 }
 0x348   : > { %v2562_v18 = vpop.f32.mrf.mxu1 }
 0x349   : > { %v2559_v22 = vadd.f32 %v2558_v51, %v2280_v5 }
 0x34a   : > { %v1575_v4 = vpop.f32.mrf.mxu2 }
 0x34b   : > { %vm2657_vm9 = vcmp.ge.f32.partialorder %v2559_v22, 0.0  ;;  %v2721_v6 = vmul.f32 0.2, %v2559_v22  ;;  %v1576_v16 = vadd.f32 %v1575_v4, %v5276_v10 }
 0x34c   : > { %v1972_v31 = vpop.f32.mrf.mxu3 }
 0x34d   : > { %v2785_v14 = vsel %vm2657_vm9, %v2559_v22, %v2721_v6  ;;  %v1973_v59 = vadd.f32 %v1972_v31, %v1576_v16  ;;  %v5282_v31 = vld [vmem:[#allocation138_spill] sm:$0xff] }
 0x34e   : > { %2850 = vst.msk [vmem:[%s4210_s10 + $0x1a0] sm:$0xff] %vm2797_vm2, %v2785_v14  ;;  %v2287_v23 = vpop.f32.mrf.mxu0 }
 0x34f   : > { %v2284_v20 = vadd.f32 %v2283_v45, %v1973_v59 }
 0x350   : > { %v2566_v19 = vpop.f32.mrf.mxu1 }
 0x351   : > { %v2563_v39 = vadd.f32 %v2562_v18, %v2284_v20 }
 0x352   : > { %v1580_v47 = vpop.f32.mrf.mxu2 }
 0x353   : > { %vm2658_vm10 = vcmp.ge.f32.partialorder %v2563_v39, 0.0  ;;  %v2722_v57 = vmul.f32 0.2, %v2563_v39  ;;  %v1581_v28 = vadd.f32 %v1580_v47, %v5277_v40 }
 0x354   : > { %v1978_v44 = vpop.f32.mrf.mxu3 }
 0x355   : > { %v2786_v56 = vsel %vm2658_vm10, %v2563_v39, %v2722_v57  ;;  %v1979_v21 = vadd.f32 %v1978_v44, %v1581_v28  ;;  %v5283_v44 = vld [vmem:[#allocation139_spill] sm:$0xff] }
 0x356   : > { %2851 = vst.msk [vmem:[%s4210_s10 + $0x1a8] sm:$0xff] %vm2797_vm2, %v2786_v56  ;;  %v2291_v12 = vpop.f32.mrf.mxu0 }
 0x357   : > { %v2288_v35 = vadd.f32 %v2287_v23, %v1979_v21 }
 0x358   : > { %v2570_v27 = vpop.f32.mrf.mxu1 }
 0x359   : > { %v2567_v7 = vadd.f32 %v2566_v19, %v2288_v35 }
 0x35a   : > { %v1585_v37 = vpop.f32.mrf.mxu2 }
 0x35b   : > { %vm2659_vm11 = vcmp.ge.f32.partialorder %v2567_v7, 0.0  ;;  %v2723_v29 = vmul.f32 0.2, %v2567_v7  ;;  %v1586_v61 = vadd.f32 %v1585_v37, %v5278_v11 }
 0x35c   : > { %v1984_v33 = vpop.f32.mrf.mxu3 }
 0x35d   : > { %v2787_v52 = vsel %vm2659_vm11, %v2567_v7, %v2723_v29  ;;  %v1985_v41 = vadd.f32 %v1984_v33, %v1586_v61  ;;  %v5284_v33 = vld [vmem:[#allocation140_spill] sm:$0xff] }
 0x35e   : > { %2852 = vst.msk [vmem:[%s4210_s10 + $0x1b0] sm:$0xff] %vm2797_vm2, %v2787_v52  ;;  %v2295_v8 = vpop.f32.mrf.mxu0 }
 0x35f   : > { %v2292_v58 = vadd.f32 %v2291_v12, %v1985_v41 }
 0x360   : > { %v2574_v55 = vpop.f32.mrf.mxu1 }
 0x361   : > { %v2571_v38 = vadd.f32 %v2570_v27, %v2292_v58 }
 0x362   : > { %v1590_v36 = vpop.f32.mrf.mxu2 }
 0x363   : > { %vm2660_vm12 = vcmp.ge.f32.partialorder %v2571_v38, 0.0  ;;  %v2724_v17 = vmul.f32 0.2, %v2571_v38  ;;  %v1591_v43 = vadd.f32 %v1590_v36, %v5279_v34 }
 0x364   : > { %v1990_v50 = vpop.f32.mrf.mxu3 }
 0x365   : > { %v2788_v49 = vsel %vm2660_vm12, %v2571_v38, %v2724_v17  ;;  %v1991_v15 = vadd.f32 %v1990_v50, %v1591_v43  ;;  %v5285_v43 = vld [vmem:[#allocation141_spill] sm:$0xff] }
 0x366   : > { %2853 = vst.msk [vmem:[%s4210_s10 + $0x1b8] sm:$0xff] %vm2797_vm2, %v2788_v49  ;;  %v2299_v3 = vpop.f32.mrf.mxu0 }
 0x367   : > { %v2296_v32 = vadd.f32 %v2295_v8, %v1991_v15 }
 0x368   : > { %v2578_v46 = vpop.f32.mrf.mxu1 }
 0x369   : > { %v2575_v53 = vadd.f32 %v2574_v55, %v2296_v32 }
 0x36a   : > { %v1595_v26 = vpop.f32.mrf.mxu2 }
 0x36b   : > { %vm2661_vm13 = vcmp.ge.f32.partialorder %v2575_v53, 0.0  ;;  %v2725_v54 = vmul.f32 0.2, %v2575_v53  ;;  %v1596_v25 = vadd.f32 %v1595_v26, %v5280_v30  ;;  %v5286_v30 = vld [vmem:[#allocation143_spill] sm:$0xff] }
 0x36c   : > { %v1996_v2 = vpop.f32.mrf.mxu3 }
 0x36d   : > { %v2789_v62 = vsel %vm2661_vm13, %v2575_v53, %v2725_v54  ;;  %v1997_v63 = vadd.f32 %v1996_v2, %v1596_v25 }
 0x36e   : > { %2854 = vst.msk [vmem:[%s4210_s10 + $0x1c0] sm:$0xff] %vm2797_vm2, %v2789_v62  ;;  %v2303_v51 = vpop.f32.mrf.mxu0 }
 0x36f   : > { %v2300_v48 = vadd.f32 %v2299_v3, %v1997_v63 }
 0x370   : > { %v2582_v9 = vpop.f32.mrf.mxu1 }
 0x371   : > { %v2579_v24 = vadd.f32 %v2578_v46, %v2300_v48 }
 0x372   : > { %v1600_v0 = vpop.f32.mrf.mxu2 }
 0x373   : > { %vm2662_vm14 = vcmp.ge.f32.partialorder %v2579_v24, 0.0  ;;  %v2726_v13 = vmul.f32 0.2, %v2579_v24  ;;  %v1601_v1 = vadd.f32 %v1600_v0, %v5281_v42 }
 0x374   : > { %v2002_v60 = vpop.f32.mrf.mxu3 }
 0x375   : > { %v2790_v45 = vsel %vm2662_vm14, %v2579_v24, %v2726_v13  ;;  %v2003_v5 = vadd.f32 %v2002_v60, %v1601_v1 }
 0x376   : > { %2855 = vst.msk [vmem:[%s4210_s10 + $0x1c8] sm:$0xff] %vm2797_vm2, %v2790_v45  ;;  %v2307_v18 = vpop.f32.mrf.mxu0 }
 0x377   : > { %v2304_v22 = vadd.f32 %v2303_v51, %v2003_v5 }
 0x378   : > { %v2586_v4 = vpop.f32.mrf.mxu1 }
 0x379   : > { %v2583_v6 = vadd.f32 %v2582_v9, %v2304_v22 }
 0x37a   : > { %v1605_v10 = vpop.f32.mrf.mxu2 }
 0x37b   : > { %vm2663_vm15 = vcmp.ge.f32.partialorder %v2583_v6, 0.0  ;;  %v2727_v16 = vmul.f32 0.2, %v2583_v6  ;;  %v1606_v14 = vadd.f32 %v1605_v10, %v5282_v31 }
 0x37c   : > { %v2008_v59 = vpop.f32.mrf.mxu3 }
 0x37d   : > { %v2791_v23 = vsel %vm2663_vm15, %v2583_v6, %v2727_v16  ;;  %v2009_v20 = vadd.f32 %v2008_v59, %v1606_v14 }
 0x37e   : > { %2856 = vst.msk [vmem:[%s4210_s10 + $0x1d0] sm:$0xff] %vm2797_vm2, %v2791_v23  ;;  %v2311_v19 = vpop.f32.mrf.mxu0 }
 0x37f   : > { %v2308_v39 = vadd.f32 %v2307_v18, %v2009_v20 }
 0x380   : > { %v2590_v47 = vpop.f32.mrf.mxu1 }
 0x381   : > { %v2587_v57 = vadd.f32 %v2586_v4, %v2308_v39 }
 0x382   : > { %v1610_v40 = vpop.f32.mrf.mxu2 }
 0x383   : > { %vm2664_vm0 = vcmp.ge.f32.partialorder %v2587_v57, 0.0  ;;  %v2728_v28 = vmul.f32 0.2, %v2587_v57  ;;  %v1611_v56 = vadd.f32 %v1610_v40, %v5283_v44 }
 0x384   : > { %v2014_v21 = vpop.f32.mrf.mxu3 }
 0x385   : > { %v2792_v12 = vsel %vm2664_vm0, %v2587_v57, %v2728_v28  ;;  %v2015_v35 = vadd.f32 %v2014_v21, %v1611_v56 }
 0x386   : > { %2857 = vst.msk [vmem:[%s4210_s10 + $0x1d8] sm:$0xff] %vm2797_vm2, %v2792_v12  ;;  %v2315_v7 = vpop.f32.mrf.mxu0 }
 0x387   : > { %v2312_v27 = vadd.f32 %v2311_v19, %v2015_v35 }
 0x388   : > { %v2594_v11 = vpop.f32.mrf.mxu1 }
 0x389   : > { %v2591_v37 = vadd.f32 %v2590_v47, %v2312_v27 }
 0x38a   : > { %v1615_v29 = vpop.f32.mrf.mxu2 }
 0x38b   : > { %vm2665_vm1 = vcmp.ge.f32.partialorder %v2591_v37, 0.0  ;;  %v2729_v61 = vmul.f32 0.2, %v2591_v37  ;;  %v1616_v52 = vadd.f32 %v1615_v29, %v5284_v33 }
 0x38c   : > { %v2020_v41 = vpop.f32.mrf.mxu3 }
 0x38d   : > { %v2793_v8 = vsel %vm2665_vm1, %v2591_v37, %v2729_v61  ;;  %v2021_v58 = vadd.f32 %v2020_v41, %v1616_v52 }
 0x38e   : > { %2858 = vst.msk [vmem:[%s4210_s10 + $0x1e0] sm:$0xff] %vm2797_vm2, %v2793_v8  ;;  %v2319_v17 = vpop.f32.mrf.mxu0 }
 0x38f   : > { %v2316_v55 = vadd.f32 %v2315_v7, %v2021_v58 }
 0x390   : > { %v2598_v15 = vpop.f32.mrf.mxu1 }
 0x391   : > { %v2595_v38 = vadd.f32 %v2594_v11, %v2316_v55 }
 0x392   : > { %v1620_v36 = vpop.f32.mrf.mxu2 }
 0x393   : > { %vm2666_vm3 = vcmp.ge.f32.partialorder %v2595_v38, 0.0  ;;  %v2730_v34 = vmul.f32 0.2, %v2595_v38  ;;  %v1621_v50 = vadd.f32 %v1620_v36, %v5285_v43 }
 0x394   : > { %v2026_v49 = vpop.f32.mrf.mxu3 }
 0x395   : > { %v2794_v3 = vsel %vm2666_vm3, %v2595_v38, %v2730_v34  ;;  %v2027_v32 = vadd.f32 %v2026_v49, %v1621_v50 }
 0x396   : > { %2859 = vst.msk [vmem:[%s4210_s10 + $0x1e8] sm:$0xff] %vm2797_vm2, %v2794_v3  ;;  %v2323_v62 = vpop.f32.mrf.mxu0 }
 0x397   : > { %v2320_v46 = vadd.f32 %v2319_v17, %v2027_v32 }
 0x398   : > { %v2602_v48 = vpop.f32.mrf.mxu1 }
 0x399   : > { %v2599_v53 = vadd.f32 %v2598_v15, %v2320_v46 }
 0x39a   : > { %v1625_v26 = vpop.f32.mrf.mxu2 }
 0x39b   : > { %vm2667_vm4 = vcmp.ge.f32.partialorder %v2599_v53, 0.0  ;;  %v2731_v54 = vmul.f32 0.2, %v2599_v53  ;;  %v1626_v25 = vadd.f32 %v1625_v26, %v5286_v30 }
 0x39c   : > { %v2032_v2 = vpop.f32.mrf.mxu3 }
 0x39d   : > { %v2795_v63 = vsel %vm2667_vm4, %v2599_v53, %v2731_v54  ;;  %v2033_v51 = vadd.f32 %v2032_v2, %v1626_v25 }
 0x39e   : > { %2860 = vst.msk [vmem:[%s4210_s10 + $0x1f0] sm:$0xff] %vm2797_vm2, %v2795_v63 }
 0x39f   : > { %v2324_v9 = vadd.f32 %v2323_v62, %v2033_v51 }
 0x3a1   : > { %v2603_v24 = vadd.f32 %v2602_v48, %v2324_v9 }
 0x3a3   : > { %vm2668_vm5 = vcmp.ge.f32.partialorder %v2603_v24, 0.0  ;;  %v2732_v0 = vmul.f32 0.2, %v2603_v24 }
 0x3a5   : > { %v2796_v13 = vsel %vm2668_vm5, %v2603_v24, %v2732_v0 }
 0x3a6   : > { %2861 = vst.msk [vmem:[%s4210_s10 + $0x1f8] sm:$0xff] %vm2797_vm2, %v2796_v13 }
 0x3a7 PF: > { %s13_s12 = sadd.s32 1, %s2958_s12  }
 0x3a8   : > { %p10_p4 = scmp.ge.s32.totalorder %s13_s12, 6  }
 0x3aa   :  { %12 = sbr.rel (!%p10_p4) target bundleno = 1 (0x1), region = 62 }

</bundles_post_ra>
